<compile_context>
chip_gen: v7x
topology: tpu7x:2x2x1
jax: 0.10.0
libtpu: 0.0.40
codegen_flags: <defaults>
</compile_context>

<pallas_src>
import functools
import math

import jax
import jax.numpy as jnp
from jax.experimental import pallas as pl
from jax.experimental.pallas import tpu as pltpu


def _conv_out(size, k, s):
    return (size - k) // s + 1


# ----------------------------------------------------------------------------
# Fused whole-network kernel.
#   Activation layout in VMEM scratch: (H, N, W*C)  (lane dim = W*C).
#   p1 rows are ordered (ox, oy, n); p1 columns are (c_in, ki, kj).
# ----------------------------------------------------------------------------
def _dqn_fused_kernel(p1_ref, w1_ref, b1_ref, w2_ref, b2_ref, w3_ref, b3_ref,
                      w4_ref, b4_ref, w5_ref, b5_ref, out_ref,
                      a1_ref, a2_ref, a3_ref,
                      *, n, oh1, ow1, oh2, ow2, oh3, ow3, c1, c2, c3):
    # ---------------- conv1: one MXU matmul on pre-assembled patches --------
    r1 = jnp.dot(p1_ref[...], w1_ref[...], preferred_element_type=jnp.float32)
    r1 = jnp.maximum(r1 + b1_ref[...], 0.0)          # (ow1*oh1*n, c1) f32
    for ox in range(ow1):
        for oy in range(oh1):
            row = (ox * oh1 + oy) * n
            a1_ref[oy, :, ox * c1:(ox + 1) * c1] = r1[row:row + n, :]

    # --------- generic conv on the (H, N, W*C) activation layout ------------
    def conv_step(in_ref, out_ref_l, w_ref, b_ref, cin, cout, k, s, hout, wout):
        w_rows = [w_ref[di] for di in range(k)]       # each (k*cin, cout) bf16
        bias = b_ref[...]                             # (1, cout) f32
        for oy in range(hout):
            for ox in range(wout):
                acc = None
                for di in range(k):
                    sl = in_ref[oy * s + di, :,
                                ox * s * cin:(ox * s + k) * cin]   # (n, k*cin)
                    d = jnp.dot(sl.astype(jnp.bfloat16), w_rows[di],
                                preferred_element_type=jnp.float32)
                    acc = d if acc is None else acc + d
                out_ref_l[oy, :, ox * cout:(ox + 1) * cout] = (
                    jnp.maximum(acc + bias, 0.0))

    conv_step(a1_ref, a2_ref, w2_ref, b2_ref, c1, c2, 4, 2, oh2, ow2)
    conv_step(a2_ref, a3_ref, w3_ref, b3_ref, c2, c3, 3, 1, oh3, ow3)

    # ---- flatten in (h, w, c) order (fc1 weight rows pre-permuted) ----------
    chunks = [a3_ref[hh, :, ww * c3:(ww + 1) * c3]
              for hh in range(oh3) for ww in range(ow3)]
    fc_in = chunks[0] if len(chunks) == 1 else jnp.concatenate(chunks, axis=-1)

    z = jnp.dot(fc_in.astype(jnp.bfloat16), w4_ref[...],
                preferred_element_type=jnp.float32)
    z = jnp.maximum(z + b4_ref[...], 0.0)
    out = jnp.dot(z.astype(jnp.bfloat16), w5_ref[...],
                  preferred_element_type=jnp.float32) + b5_ref[...]
    out_ref[...] = out.astype(out_ref.dtype)


# ----------------------------------------------------------------------------
# One-time rearrangement of PyTorch-layout params into kernel layout.
# ----------------------------------------------------------------------------
def prepare_params(params, input_shape, c1_pad=64, out_pad=128):
    C, H, W = input_shape
    oh1, ow1 = _conv_out(H, 8, 4), _conv_out(W, 8, 4)
    oh2, ow2 = _conv_out(oh1, 4, 2), _conv_out(ow1, 4, 2)
    oh3, ow3 = _conv_out(oh2, 3, 1), _conv_out(ow2, 3, 1)
    feat = 64 * oh3 * ow3

    f32, bf16 = jnp.float32, jnp.bfloat16
    kp = {}
    # conv1: (OC, C, 8, 8) -> (C*8*8, OC), OC zero-padded to c1_pad.
    w1 = params["c1_w"].reshape(32, C * 8 * 8).T
    kp["w1"] = jnp.pad(w1, ((0, 0), (0, c1_pad - 32))).astype(bf16)
    kp["b1"] = jnp.pad(params["c1_b"], (0, c1_pad - 32)).reshape(1, c1_pad).astype(f32)
    # conv2: input channels zero-padded to c1_pad; rows ordered (kj, c_in).
    w2 = jnp.pad(params["c2_w"], ((0, 0), (0, c1_pad - 32), (0, 0), (0, 0)))
    kp["w2"] = w2.transpose(2, 3, 1, 0).reshape(4, 4 * c1_pad, 64).astype(bf16)
    kp["b2"] = params["c2_b"].reshape(1, 64).astype(f32)
    # conv3
    kp["w3"] = params["c3_w"].transpose(2, 3, 1, 0).reshape(3, 3 * 64, 64).astype(bf16)
    kp["b3"] = params["c3_b"].reshape(1, 64).astype(f32)
    # fc1: stored rows follow the PyTorch (c, h, w) flatten; kernel uses (h, w, c).
    kp["w4"] = (params["fc1_w"].reshape(64, oh3, ow3, 512)
                .transpose(1, 2, 0, 3).reshape(feat, 512).astype(bf16))
    kp["b4"] = params["fc1_b"].reshape(1, 512).astype(f32)
    # fc2: pad output (lane) dim to 128 for a dense final HBM store.
    na = params["fc2_w"].shape[1]
    kp["w5"] = jnp.pad(params["fc2_w"], ((0, 0), (0, out_pad - na))).astype(bf16)
    kp["b5"] = jnp.pad(params["fc2_b"], (0, out_pad - na)).reshape(1, out_pad).astype(f32)
    return kp


# ----------------------------------------------------------------------------
# Forward pass: thin wrapper (conv1 im2col) + single fused pallas_call.
# ----------------------------------------------------------------------------
def dqn_cnn_forward(x, kparams, num_actions, c1_pad=64, out_pad=128):
    n, C, H, W = x.shape
    oh1, ow1 = _conv_out(H, 8, 4), _conv_out(W, 8, 4)
    oh2, ow2 = _conv_out(oh1, 4, 2), _conv_out(ow1, 4, 2)
    oh3, ow3 = _conv_out(oh2, 3, 1), _conv_out(ow2, 3, 1)

    # conv1 im2col in the wrapper (input-sized, one-off); rows (ox, oy, n),
    # columns (c, ki, kj).  All later layers extract patches inside the kernel.
    patches = []
    for ki in range(8):
        for kj in range(8):
            patches.append(
                x[:, :, ki:ki + 4 * (oh1 - 1) + 1:4, kj:kj + 4 * (ow1 - 1) + 1:4])
    p = jnp.stack(patches, axis=2)                    # (n, C, 64, oh1, ow1)
    p1 = (p.transpose(4, 3, 0, 1, 2)                  # (ow1, oh1, n, C, 64)
          .reshape(ow1 * oh1 * n, C * 8 * 8).astype(jnp.bfloat16))

    kernel = functools.partial(
        _dqn_fused_kernel, n=n, oh1=oh1, ow1=ow1, oh2=oh2, ow2=ow2,
        oh3=oh3, ow3=ow3, c1=c1_pad, c2=64, c3=64)

    in_specs = [
        pl.BlockSpec(p1.shape, lambda i: (0, 0)),
        pl.BlockSpec(kparams["w1"].shape, lambda i: (0, 0)),
        pl.BlockSpec(kparams["b1"].shape, lambda i: (0, 0)),
        pl.BlockSpec(kparams["w2"].shape, lambda i: (0, 0, 0)),
        pl.BlockSpec(kparams["b2"].shape, lambda i: (0, 0)),
        pl.BlockSpec(kparams["w3"].shape, lambda i: (0, 0, 0)),
        pl.BlockSpec(kparams["b3"].shape, lambda i: (0, 0)),
        pl.BlockSpec(kparams["w4"].shape, lambda i: (0, 0)),
        pl.BlockSpec(kparams["b4"].shape, lambda i: (0, 0)),
        pl.BlockSpec(kparams["w5"].shape, lambda i: (0, 0)),
        pl.BlockSpec(kparams["b5"].shape, lambda i: (0, 0)),
    ]
    out = pl.pallas_call(
        kernel,
        out_shape=jax.ShapeDtypeStruct((n, out_pad), jnp.float32),
        grid=(1,),
        in_specs=in_specs,
        out_specs=pl.BlockSpec((n, out_pad), lambda i: (0, 0)),
        scratch_shapes=[
            pltpu.VMEM((oh1, n, ow1 * c1_pad), jnp.float32),   # conv1 act
            pltpu.VMEM((oh2, n, ow2 * 64), jnp.float32),       # conv2 act
            pltpu.VMEM((oh3, n, ow3 * 64), jnp.float32),       # conv3 act
        ],
        compiler_params=pltpu.CompilerParams(
            dimension_semantics=("arbitrary",)),
    )(p1, kparams["w1"], kparams["b1"], kparams["w2"], kparams["b2"],
      kparams["w3"], kparams["b3"], kparams["w4"], kparams["b4"],
      kparams["w5"], kparams["b5"])
    return out[:, :num_actions]


# ----------------------------------------------------------------------------
# PyTorch-default-style init (uniform +/- 1/sqrt(fan_in)), PyTorch layouts.
# Linear weights are stored in (in, out) matmul layout with fc1 rows following
# the PyTorch (c, h, w) flatten order.
# ----------------------------------------------------------------------------
def init_params(key, in_channels, feature_size, num_actions):
    ks = jax.random.split(key, 10)

    def u(k, shape, fan_in):
        bound = 1.0 / math.sqrt(fan_in)
        return jax.random.uniform(k, shape, jnp.float32, -bound, bound)

    p = {}
    p["c1_w"] = u(ks[0], (32, in_channels, 8, 8), in_channels * 8 * 8)
    p["c1_b"] = u(ks[1], (32,), in_channels * 8 * 8)
    p["c2_w"] = u(ks[2], (64, 32, 4, 4), 32 * 4 * 4)
    p["c2_b"] = u(ks[3], (64,), 32 * 4 * 4)
    p["c3_w"] = u(ks[4], (64, 64, 3, 3), 64 * 3 * 3)
    p["c3_b"] = u(ks[5], (64,), 64 * 3 * 3)
    p["fc1_w"] = u(ks[6], (feature_size, 512), feature_size)
    p["fc1_b"] = u(ks[7], (512,), feature_size)
    p["fc2_w"] = u(ks[8], (512, num_actions), 512)
    p["fc2_b"] = u(ks[9], (num_actions,), 512)
    return p


if __name__ == "__main__":
    # input_shape=(4, 36, 36): conv spatial sizes 36 -> 8 -> 3 -> 1, so
    # feature_size() == 64 * 1 * 1 = 64.
    batch = 2
    in_channels, H, W = 4, 36, 36
    num_actions = 6
    feature_size = 64 * 1 * 1

    key = jax.random.PRNGKey(0)
    kx, kp = jax.random.split(key)
    x = jax.random.normal(kx, (batch, in_channels, H, W), jnp.float32)
    params = init_params(kp, in_channels, feature_size, num_actions)
    kparams = prepare_params(params, (in_channels, H, W))

    fwd = jax.jit(functools.partial(dqn_cnn_forward, num_actions=num_actions))
    out = fwd(x, kparams)
    out = jax.block_until_ready(out)

    assert out.shape == (batch, num_actions), out.shape
    assert bool(jnp.all(jnp.isfinite(out)))
    print("KERNEL_OK")
</pallas_src>

<mosaic_0001>
module attributes {stable_mosaic.version = 11 : i64} {
  func.func @_dqn_fused_kernel(%arg0: i32, %arg1: memref<128x256xbf16, #tpu.memory_space<vmem>>, %arg2: memref<256x64xbf16, #tpu.memory_space<vmem>>, %arg3: memref<1x64xf32, #tpu.memory_space<vmem>>, %arg4: memref<4x256x64xbf16, #tpu.memory_space<vmem>>, %arg5: memref<1x64xf32, #tpu.memory_space<vmem>>, %arg6: memref<3x192x64xbf16, #tpu.memory_space<vmem>>, %arg7: memref<1x64xf32, #tpu.memory_space<vmem>>, %arg8: memref<64x512xbf16, #tpu.memory_space<vmem>>, %arg9: memref<1x512xf32, #tpu.memory_space<vmem>>, %arg10: memref<512x128xbf16, #tpu.memory_space<vmem>>, %arg11: memref<1x128xf32, #tpu.memory_space<vmem>>, %arg12: memref<2x128xf32, #tpu.memory_space<vmem>>, %arg13: memref<8x2x512xf32, #tpu.memory_space<vmem>>, %arg14: memref<3x2x192xf32, #tpu.memory_space<vmem>>, %arg15: memref<1x2x64xf32, #tpu.memory_space<vmem>>) attributes {dimension_semantics = [#tpu.dimension_semantics<arbitrary>], iteration_bounds = array<i64: 1>, scalar_prefetch = 0 : i64, scratch_operands = 3 : i64, tpu.core_type = #tpu.core_type<tc>, window_params = [{pipeline_mode = #tpu.pipeline_mode<synchronous>, transform_indices = @transform_0, window_bounds = array<i64: 128, 256>}, {pipeline_mode = #tpu.pipeline_mode<synchronous>, transform_indices = @transform_1, window_bounds = array<i64: 256, 64>}, {pipeline_mode = #tpu.pipeline_mode<synchronous>, transform_indices = @transform_2, window_bounds = array<i64: 1, 64>}, {pipeline_mode = #tpu.pipeline_mode<synchronous>, transform_indices = @transform_3, window_bounds = array<i64: 4, 256, 64>}, {pipeline_mode = #tpu.pipeline_mode<synchronous>, transform_indices = @transform_4, window_bounds = array<i64: 1, 64>}, {pipeline_mode = #tpu.pipeline_mode<synchronous>, transform_indices = @transform_5, window_bounds = array<i64: 3, 192, 64>}, {pipeline_mode = #tpu.pipeline_mode<synchronous>, transform_indices = @transform_6, window_bounds = array<i64: 1, 64>}, {pipeline_mode = #tpu.pipeline_mode<synchronous>, transform_indices = @transform_7, window_bounds = array<i64: 64, 512>}, {pipeline_mode = #tpu.pipeline_mode<synchronous>, transform_indices = @transform_8, window_bounds = array<i64: 1, 512>}, {pipeline_mode = #tpu.pipeline_mode<synchronous>, transform_indices = @transform_9, window_bounds = array<i64: 512, 128>}, {pipeline_mode = #tpu.pipeline_mode<synchronous>, transform_indices = @transform_10, window_bounds = array<i64: 1, 128>}, {pipeline_mode = #tpu.pipeline_mode<synchronous>, transform_indices = @transform_11, window_bounds = array<i64: 2, 128>}]} {
    %c0 = arith.constant 0 : index
    %c0_0 = arith.constant 0 : index
    %0 = vector.load %arg1[%c0, %c0_0] : memref<128x256xbf16, #tpu.memory_space<vmem>>, vector<128x256xbf16>
    %c0_1 = arith.constant 0 : index
    %c0_2 = arith.constant 0 : index
    %1 = vector.load %arg2[%c0_1, %c0_2] : memref<256x64xbf16, #tpu.memory_space<vmem>>, vector<256x64xbf16>
    %cst = arith.constant dense<0.000000e+00> : vector<128x64xf32>
    %2 = tpu.matmul %0, %1, %cst {dimension_numbers = #tpu.dot_dimension_numbers<[1], [0], [0], [1], [0, 0, 1, 1], [], []>} : vector<128x256xbf16>, vector<256x64xbf16>, vector<128x64xf32> -> vector<128x64xf32>
    %c0_3 = arith.constant 0 : index
    %c0_4 = arith.constant 0 : index
    %3 = vector.load %arg3[%c0_3, %c0_4] : memref<1x64xf32, #tpu.memory_space<vmem>>, vector<1x64xf32>
    %4 = vector.broadcast %3 : vector<1x64xf32> to vector<128x64xf32>
    %5 = arith.addf %2, %4 : vector<128x64xf32>
    %cst_5 = arith.constant 0.000000e+00 : f32
    %6 = vector.broadcast %cst_5 : f32 to vector<128x64xf32>
    %7 = arith.maximumf %5, %6 : vector<128x64xf32>
    %8 = vector.extract_strided_slice %7 {offsets = [0, 0], sizes = [2, 64], strides = [1, 1]} : vector<128x64xf32> to vector<2x64xf32>
    %c0_6 = arith.constant 0 : index
    %c0_7 = arith.constant 0 : index
    %c0_8 = arith.constant 0 : index
    %9 = vector.load %arg13[%c0_6, %c0_7, %c0_8] : memref<8x2x512xf32, #tpu.memory_space<vmem>>, vector<1x2x64xf32>
    %10 = vector.shape_cast %9 : vector<1x2x64xf32> to vector<2x64xf32>
    %11 = vector.shape_cast %8 : vector<2x64xf32> to vector<1x2x64xf32>
    tpu.vector_store %arg13[%c0_6, %c0_7, %c0_8], %11 {strides = array<i32>} : memref<8x2x512xf32, #tpu.memory_space<vmem>>, vector<1x2x64xf32>,
    %12 = vector.extract_strided_slice %7 {offsets = [2, 0], sizes = [2, 64], strides = [1, 1]} : vector<128x64xf32> to vector<2x64xf32>
    %c1 = arith.constant 1 : index
    %c0_9 = arith.constant 0 : index
    %c0_10 = arith.constant 0 : index
    %13 = vector.load %arg13[%c1, %c0_9, %c0_10] : memref<8x2x512xf32, #tpu.memory_space<vmem>>, vector<1x2x64xf32>
    %14 = vector.shape_cast %13 : vector<1x2x64xf32> to vector<2x64xf32>
    %15 = vector.shape_cast %12 : vector<2x64xf32> to vector<1x2x64xf32>
    tpu.vector_store %arg13[%c1, %c0_9, %c0_10], %15 {strides = array<i32>} : memref<8x2x512xf32, #tpu.memory_space<vmem>>, vector<1x2x64xf32>,
    %16 = vector.extract_strided_slice %7 {offsets = [4, 0], sizes = [2, 64], strides = [1, 1]} : vector<128x64xf32> to vector<2x64xf32>
    %c2 = arith.constant 2 : index
    %c0_11 = arith.constant 0 : index
    %c0_12 = arith.constant 0 : index
    %17 = vector.load %arg13[%c2, %c0_11, %c0_12] : memref<8x2x512xf32, #tpu.memory_space<vmem>>, vector<1x2x64xf32>
    %18 = vector.shape_cast %17 : vector<1x2x64xf32> to vector<2x64xf32>
    %19 = vector.shape_cast %16 : vector<2x64xf32> to vector<1x2x64xf32>
    tpu.vector_store %arg13[%c2, %c0_11, %c0_12], %19 {strides = array<i32>} : memref<8x2x512xf32, #tpu.memory_space<vmem>>, vector<1x2x64xf32>,
    %20 = vector.extract_strided_slice %7 {offsets = [6, 0], sizes = [2, 64], strides = [1, 1]} : vector<128x64xf32> to vector<2x64xf32>
    %c3 = arith.constant 3 : index
    %c0_13 = arith.constant 0 : index
    %c0_14 = arith.constant 0 : index
    %21 = vector.load %arg13[%c3, %c0_13, %c0_14] : memref<8x2x512xf32, #tpu.memory_space<vmem>>, vector<1x2x64xf32>
    %22 = vector.shape_cast %21 : vector<1x2x64xf32> to vector<2x64xf32>
    %23 = vector.shape_cast %20 : vector<2x64xf32> to vector<1x2x64xf32>
    tpu.vector_store %arg13[%c3, %c0_13, %c0_14], %23 {strides = array<i32>} : memref<8x2x512xf32, #tpu.memory_space<vmem>>, vector<1x2x64xf32>,
    %24 = vector.extract_strided_slice %7 {offsets = [8, 0], sizes = [2, 64], strides = [1, 1]} : vector<128x64xf32> to vector<2x64xf32>
    %c4 = arith.constant 4 : index
    %c0_15 = arith.constant 0 : index
    %c0_16 = arith.constant 0 : index
    %25 = vector.load %arg13[%c4, %c0_15, %c0_16] : memref<8x2x512xf32, #tpu.memory_space<vmem>>, vector<1x2x64xf32>
    %26 = vector.shape_cast %25 : vector<1x2x64xf32> to vector<2x64xf32>
    %27 = vector.shape_cast %24 : vector<2x64xf32> to vector<1x2x64xf32>
    tpu.vector_store %arg13[%c4, %c0_15, %c0_16], %27 {strides = array<i32>} : memref<8x2x512xf32, #tpu.memory_space<vmem>>, vector<1x2x64xf32>,
    %28 = vector.extract_strided_slice %7 {offsets = [10, 0], sizes = [2, 64], strides = [1, 1]} : vector<128x64xf32> to vector<2x64xf32>
    %c5 = arith.constant 5 : index
    %c0_17 = arith.constant 0 : index
    %c0_18 = arith.constant 0 : index
    %29 = vector.load %arg13[%c5, %c0_17, %c0_18] : memref<8x2x512xf32, #tpu.memory_space<vmem>>, vector<1x2x64xf32>
    %30 = vector.shape_cast %29 : vector<1x2x64xf32> to vector<2x64xf32>
    %31 = vector.shape_cast %28 : vector<2x64xf32> to vector<1x2x64xf32>
    tpu.vector_store %arg13[%c5, %c0_17, %c0_18], %31 {strides = array<i32>} : memref<8x2x512xf32, #tpu.memory_space<vmem>>, vector<1x2x64xf32>,
    %32 = vector.extract_strided_slice %7 {offsets = [12, 0], sizes = [2, 64], strides = [1, 1]} : vector<128x64xf32> to vector<2x64xf32>
    %c6 = arith.constant 6 : index
    %c0_19 = arith.constant 0 : index
    %c0_20 = arith.constant 0 : index
    %33 = vector.load %arg13[%c6, %c0_19, %c0_20] : memref<8x2x512xf32, #tpu.memory_space<vmem>>, vector<1x2x64xf32>
    %34 = vector.shape_cast %33 : vector<1x2x64xf32> to vector<2x64xf32>
    %35 = vector.shape_cast %32 : vector<2x64xf32> to vector<1x2x64xf32>
    tpu.vector_store %arg13[%c6, %c0_19, %c0_20], %35 {strides = array<i32>} : memref<8x2x512xf32, #tpu.memory_space<vmem>>, vector<1x2x64xf32>,
    %36 = vector.extract_strided_slice %7 {offsets = [14, 0], sizes = [2, 64], strides = [1, 1]} : vector<128x64xf32> to vector<2x64xf32>
    %c7 = arith.constant 7 : index
    %c0_21 = arith.constant 0 : index
    %c0_22 = arith.constant 0 : index
    %37 = vector.load %arg13[%c7, %c0_21, %c0_22] : memref<8x2x512xf32, #tpu.memory_space<vmem>>, vector<1x2x64xf32>
    %38 = vector.shape_cast %37 : vector<1x2x64xf32> to vector<2x64xf32>
    %39 = vector.shape_cast %36 : vector<2x64xf32> to vector<1x2x64xf32>
    tpu.vector_store %arg13[%c7, %c0_21, %c0_22], %39 {strides = array<i32>} : memref<8x2x512xf32, #tpu.memory_space<vmem>>, vector<1x2x64xf32>,
    %40 = vector.extract_strided_slice %7 {offsets = [16, 0], sizes = [2, 64], strides = [1, 1]} : vector<128x64xf32> to vector<2x64xf32>
    %c0_23 = arith.constant 0 : index
    %c0_24 = arith.constant 0 : index
    %c64 = arith.constant 64 : index
    %41 = vector.load %arg13[%c0_23, %c0_24, %c64] : memref<8x2x512xf32, #tpu.memory_space<vmem>>, vector<1x2x64xf32>
    %42 = vector.shape_cast %41 : vector<1x2x64xf32> to vector<2x64xf32>
    %43 = vector.shape_cast %40 : vector<2x64xf32> to vector<1x2x64xf32>
    tpu.vector_store %arg13[%c0_23, %c0_24, %c64], %43 {strides = array<i32>} : memref<8x2x512xf32, #tpu.memory_space<vmem>>, vector<1x2x64xf32>,
    %44 = vector.extract_strided_slice %7 {offsets = [18, 0], sizes = [2, 64], strides = [1, 1]} : vector<128x64xf32> to vector<2x64xf32>
    %c1_25 = arith.constant 1 : index
    %c0_26 = arith.constant 0 : index
    %c64_27 = arith.constant 64 : index
    %45 = vector.load %arg13[%c1_25, %c0_26, %c64_27] : memref<8x2x512xf32, #tpu.memory_space<vmem>>, vector<1x2x64xf32>
    %46 = vector.shape_cast %45 : vector<1x2x64xf32> to vector<2x64xf32>
    %47 = vector.shape_cast %44 : vector<2x64xf32> to vector<1x2x64xf32>
    tpu.vector_store %arg13[%c1_25, %c0_26, %c64_27], %47 {strides = array<i32>} : memref<8x2x512xf32, #tpu.memory_space<vmem>>, vector<1x2x64xf32>,
    %48 = vector.extract_strided_slice %7 {offsets = [20, 0], sizes = [2, 64], strides = [1, 1]} : vector<128x64xf32> to vector<2x64xf32>
    %c2_28 = arith.constant 2 : index
    %c0_29 = arith.constant 0 : index
    %c64_30 = arith.constant 64 : index
    %49 = vector.load %arg13[%c2_28, %c0_29, %c64_30] : memref<8x2x512xf32, #tpu.memory_space<vmem>>, vector<1x2x64xf32>
    %50 = vector.shape_cast %49 : vector<1x2x64xf32> to vector<2x64xf32>
    %51 = vector.shape_cast %48 : vector<2x64xf32> to vector<1x2x64xf32>
    tpu.vector_store %arg13[%c2_28, %c0_29, %c64_30], %51 {strides = array<i32>} : memref<8x2x512xf32, #tpu.memory_space<vmem>>, vector<1x2x64xf32>,
    %52 = vector.extract_strided_slice %7 {offsets = [22, 0], sizes = [2, 64], strides = [1, 1]} : vector<128x64xf32> to vector<2x64xf32>
    %c3_31 = arith.constant 3 : index
    %c0_32 = arith.constant 0 : index
    %c64_33 = arith.constant 64 : index
    %53 = vector.load %arg13[%c3_31, %c0_32, %c64_33] : memref<8x2x512xf32, #tpu.memory_space<vmem>>, vector<1x2x64xf32>
    %54 = vector.shape_cast %53 : vector<1x2x64xf32> to vector<2x64xf32>
    %55 = vector.shape_cast %52 : vector<2x64xf32> to vector<1x2x64xf32>
    tpu.vector_store %arg13[%c3_31, %c0_32, %c64_33], %55 {strides = array<i32>} : memref<8x2x512xf32, #tpu.memory_space<vmem>>, vector<1x2x64xf32>,
    %56 = vector.extract_strided_slice %7 {offsets = [24, 0], sizes = [2, 64], strides = [1, 1]} : vector<128x64xf32> to vector<2x64xf32>
    %c4_34 = arith.constant 4 : index
    %c0_35 = arith.constant 0 : index
    %c64_36 = arith.constant 64 : index
    %57 = vector.load %arg13[%c4_34, %c0_35, %c64_36] : memref<8x2x512xf32, #tpu.memory_space<vmem>>, vector<1x2x64xf32>
    %58 = vector.shape_cast %57 : vector<1x2x64xf32> to vector<2x64xf32>
    %59 = vector.shape_cast %56 : vector<2x64xf32> to vector<1x2x64xf32>
    tpu.vector_store %arg13[%c4_34, %c0_35, %c64_36], %59 {strides = array<i32>} : memref<8x2x512xf32, #tpu.memory_space<vmem>>, vector<1x2x64xf32>,
    %60 = vector.extract_strided_slice %7 {offsets = [26, 0], sizes = [2, 64], strides = [1, 1]} : vector<128x64xf32> to vector<2x64xf32>
    %c5_37 = arith.constant 5 : index
    %c0_38 = arith.constant 0 : index
    %c64_39 = arith.constant 64 : index
    %61 = vector.load %arg13[%c5_37, %c0_38, %c64_39] : memref<8x2x512xf32, #tpu.memory_space<vmem>>, vector<1x2x64xf32>
    %62 = vector.shape_cast %61 : vector<1x2x64xf32> to vector<2x64xf32>
    %63 = vector.shape_cast %60 : vector<2x64xf32> to vector<1x2x64xf32>
    tpu.vector_store %arg13[%c5_37, %c0_38, %c64_39], %63 {strides = array<i32>} : memref<8x2x512xf32, #tpu.memory_space<vmem>>, vector<1x2x64xf32>,
    %64 = vector.extract_strided_slice %7 {offsets = [28, 0], sizes = [2, 64], strides = [1, 1]} : vector<128x64xf32> to vector<2x64xf32>
    %c6_40 = arith.constant 6 : index
    %c0_41 = arith.constant 0 : index
    %c64_42 = arith.constant 64 : index
    %65 = vector.load %arg13[%c6_40, %c0_41, %c64_42] : memref<8x2x512xf32, #tpu.memory_space<vmem>>, vector<1x2x64xf32>
    %66 = vector.shape_cast %65 : vector<1x2x64xf32> to vector<2x64xf32>
    %67 = vector.shape_cast %64 : vector<2x64xf32> to vector<1x2x64xf32>
    tpu.vector_store %arg13[%c6_40, %c0_41, %c64_42], %67 {strides = array<i32>} : memref<8x2x512xf32, #tpu.memory_space<vmem>>, vector<1x2x64xf32>,
    %68 = vector.extract_strided_slice %7 {offsets = [30, 0], sizes = [2, 64], strides = [1, 1]} : vector<128x64xf32> to vector<2x64xf32>
    %c7_43 = arith.constant 7 : index
    %c0_44 = arith.constant 0 : index
    %c64_45 = arith.constant 64 : index
    %69 = vector.load %arg13[%c7_43, %c0_44, %c64_45] : memref<8x2x512xf32, #tpu.memory_space<vmem>>, vector<1x2x64xf32>
    %70 = vector.shape_cast %69 : vector<1x2x64xf32> to vector<2x64xf32>
    %71 = vector.shape_cast %68 : vector<2x64xf32> to vector<1x2x64xf32>
    tpu.vector_store %arg13[%c7_43, %c0_44, %c64_45], %71 {strides = array<i32>} : memref<8x2x512xf32, #tpu.memory_space<vmem>>, vector<1x2x64xf32>,
    %72 = vector.extract_strided_slice %7 {offsets = [32, 0], sizes = [2, 64], strides = [1, 1]} : vector<128x64xf32> to vector<2x64xf32>
    %c0_46 = arith.constant 0 : index
    %c0_47 = arith.constant 0 : index
    %c128 = arith.constant 128 : index
    %73 = vector.load %arg13[%c0_46, %c0_47, %c128] : memref<8x2x512xf32, #tpu.memory_space<vmem>>, vector<1x2x64xf32>
    %74 = vector.shape_cast %73 : vector<1x2x64xf32> to vector<2x64xf32>
    %75 = vector.shape_cast %72 : vector<2x64xf32> to vector<1x2x64xf32>
    tpu.vector_store %arg13[%c0_46, %c0_47, %c128], %75 {strides = array<i32>} : memref<8x2x512xf32, #tpu.memory_space<vmem>>, vector<1x2x64xf32>,
    %76 = vector.extract_strided_slice %7 {offsets = [34, 0], sizes = [2, 64], strides = [1, 1]} : vector<128x64xf32> to vector<2x64xf32>
    %c1_48 = arith.constant 1 : index
    %c0_49 = arith.constant 0 : index
    %c128_50 = arith.constant 128 : index
    %77 = vector.load %arg13[%c1_48, %c0_49, %c128_50] : memref<8x2x512xf32, #tpu.memory_space<vmem>>, vector<1x2x64xf32>
    %78 = vector.shape_cast %77 : vector<1x2x64xf32> to vector<2x64xf32>
    %79 = vector.shape_cast %76 : vector<2x64xf32> to vector<1x2x64xf32>
    tpu.vector_store %arg13[%c1_48, %c0_49, %c128_50], %79 {strides = array<i32>} : memref<8x2x512xf32, #tpu.memory_space<vmem>>, vector<1x2x64xf32>,
    %80 = vector.extract_strided_slice %7 {offsets = [36, 0], sizes = [2, 64], strides = [1, 1]} : vector<128x64xf32> to vector<2x64xf32>
    %c2_51 = arith.constant 2 : index
    %c0_52 = arith.constant 0 : index
    %c128_53 = arith.constant 128 : index
    %81 = vector.load %arg13[%c2_51, %c0_52, %c128_53] : memref<8x2x512xf32, #tpu.memory_space<vmem>>, vector<1x2x64xf32>
    %82 = vector.shape_cast %81 : vector<1x2x64xf32> to vector<2x64xf32>
    %83 = vector.shape_cast %80 : vector<2x64xf32> to vector<1x2x64xf32>
    tpu.vector_store %arg13[%c2_51, %c0_52, %c128_53], %83 {strides = array<i32>} : memref<8x2x512xf32, #tpu.memory_space<vmem>>, vector<1x2x64xf32>,
    %84 = vector.extract_strided_slice %7 {offsets = [38, 0], sizes = [2, 64], strides = [1, 1]} : vector<128x64xf32> to vector<2x64xf32>
    %c3_54 = arith.constant 3 : index
    %c0_55 = arith.constant 0 : index
    %c128_56 = arith.constant 128 : index
    %85 = vector.load %arg13[%c3_54, %c0_55, %c128_56] : memref<8x2x512xf32, #tpu.memory_space<vmem>>, vector<1x2x64xf32>
    %86 = vector.shape_cast %85 : vector<1x2x64xf32> to vector<2x64xf32>
    %87 = vector.shape_cast %84 : vector<2x64xf32> to vector<1x2x64xf32>
    tpu.vector_store %arg13[%c3_54, %c0_55, %c128_56], %87 {strides = array<i32>} : memref<8x2x512xf32, #tpu.memory_space<vmem>>, vector<1x2x64xf32>,
    %88 = vector.extract_strided_slice %7 {offsets = [40, 0], sizes = [2, 64], strides = [1, 1]} : vector<128x64xf32> to vector<2x64xf32>
    %c4_57 = arith.constant 4 : index
    %c0_58 = arith.constant 0 : index
    %c128_59 = arith.constant 128 : index
    %89 = vector.load %arg13[%c4_57, %c0_58, %c128_59] : memref<8x2x512xf32, #tpu.memory_space<vmem>>, vector<1x2x64xf32>
    %90 = vector.shape_cast %89 : vector<1x2x64xf32> to vector<2x64xf32>
    %91 = vector.shape_cast %88 : vector<2x64xf32> to vector<1x2x64xf32>
    tpu.vector_store %arg13[%c4_57, %c0_58, %c128_59], %91 {strides = array<i32>} : memref<8x2x512xf32, #tpu.memory_space<vmem>>, vector<1x2x64xf32>,
    %92 = vector.extract_strided_slice %7 {offsets = [42, 0], sizes = [2, 64], strides = [1, 1]} : vector<128x64xf32> to vector<2x64xf32>
    %c5_60 = arith.constant 5 : index
    %c0_61 = arith.constant 0 : index
    %c128_62 = arith.constant 128 : index
    %93 = vector.load %arg13[%c5_60, %c0_61, %c128_62] : memref<8x2x512xf32, #tpu.memory_space<vmem>>, vector<1x2x64xf32>
    %94 = vector.shape_cast %93 : vector<1x2x64xf32> to vector<2x64xf32>
    %95 = vector.shape_cast %92 : vector<2x64xf32> to vector<1x2x64xf32>
    tpu.vector_store %arg13[%c5_60, %c0_61, %c128_62], %95 {strides = array<i32>} : memref<8x2x512xf32, #tpu.memory_space<vmem>>, vector<1x2x64xf32>,
    %96 = vector.extract_strided_slice %7 {offsets = [44, 0], sizes = [2, 64], strides = [1, 1]} : vector<128x64xf32> to vector<2x64xf32>
    %c6_63 = arith.constant 6 : index
    %c0_64 = arith.constant 0 : index
    %c128_65 = arith.constant 128 : index
    %97 = vector.load %arg13[%c6_63, %c0_64, %c128_65] : memref<8x2x512xf32, #tpu.memory_space<vmem>>, vector<1x2x64xf32>
    %98 = vector.shape_cast %97 : vector<1x2x64xf32> to vector<2x64xf32>
    %99 = vector.shape_cast %96 : vector<2x64xf32> to vector<1x2x64xf32>
    tpu.vector_store %arg13[%c6_63, %c0_64, %c128_65], %99 {strides = array<i32>} : memref<8x2x512xf32, #tpu.memory_space<vmem>>, vector<1x2x64xf32>,
    %100 = vector.extract_strided_slice %7 {offsets = [46, 0], sizes = [2, 64], strides = [1, 1]} : vector<128x64xf32> to vector<2x64xf32>
    %c7_66 = arith.constant 7 : index
    %c0_67 = arith.constant 0 : index
    %c128_68 = arith.constant 128 : index
    %101 = vector.load %arg13[%c7_66, %c0_67, %c128_68] : memref<8x2x512xf32, #tpu.memory_space<vmem>>, vector<1x2x64xf32>
    %102 = vector.shape_cast %101 : vector<1x2x64xf32> to vector<2x64xf32>
    %103 = vector.shape_cast %100 : vector<2x64xf32> to vector<1x2x64xf32>
    tpu.vector_store %arg13[%c7_66, %c0_67, %c128_68], %103 {strides = array<i32>} : memref<8x2x512xf32, #tpu.memory_space<vmem>>, vector<1x2x64xf32>,
    %104 = vector.extract_strided_slice %7 {offsets = [48, 0], sizes = [2, 64], strides = [1, 1]} : vector<128x64xf32> to vector<2x64xf32>
    %c0_69 = arith.constant 0 : index
    %c0_70 = arith.constant 0 : index
    %c192 = arith.constant 192 : index
    %105 = vector.load %arg13[%c0_69, %c0_70, %c192] : memref<8x2x512xf32, #tpu.memory_space<vmem>>, vector<1x2x64xf32>
    %106 = vector.shape_cast %105 : vector<1x2x64xf32> to vector<2x64xf32>
    %107 = vector.shape_cast %104 : vector<2x64xf32> to vector<1x2x64xf32>
    tpu.vector_store %arg13[%c0_69, %c0_70, %c192], %107 {strides = array<i32>} : memref<8x2x512xf32, #tpu.memory_space<vmem>>, vector<1x2x64xf32>,
    %108 = vector.extract_strided_slice %7 {offsets = [50, 0], sizes = [2, 64], strides = [1, 1]} : vector<128x64xf32> to vector<2x64xf32>
    %c1_71 = arith.constant 1 : index
    %c0_72 = arith.constant 0 : index
    %c192_73 = arith.constant 192 : index
    %109 = vector.load %arg13[%c1_71, %c0_72, %c192_73] : memref<8x2x512xf32, #tpu.memory_space<vmem>>, vector<1x2x64xf32>
    %110 = vector.shape_cast %109 : vector<1x2x64xf32> to vector<2x64xf32>
    %111 = vector.shape_cast %108 : vector<2x64xf32> to vector<1x2x64xf32>
    tpu.vector_store %arg13[%c1_71, %c0_72, %c192_73], %111 {strides = array<i32>} : memref<8x2x512xf32, #tpu.memory_space<vmem>>, vector<1x2x64xf32>,
    %112 = vector.extract_strided_slice %7 {offsets = [52, 0], sizes = [2, 64], strides = [1, 1]} : vector<128x64xf32> to vector<2x64xf32>
    %c2_74 = arith.constant 2 : index
    %c0_75 = arith.constant 0 : index
    %c192_76 = arith.constant 192 : index
    %113 = vector.load %arg13[%c2_74, %c0_75, %c192_76] : memref<8x2x512xf32, #tpu.memory_space<vmem>>, vector<1x2x64xf32>
    %114 = vector.shape_cast %113 : vector<1x2x64xf32> to vector<2x64xf32>
    %115 = vector.shape_cast %112 : vector<2x64xf32> to vector<1x2x64xf32>
    tpu.vector_store %arg13[%c2_74, %c0_75, %c192_76], %115 {strides = array<i32>} : memref<8x2x512xf32, #tpu.memory_space<vmem>>, vector<1x2x64xf32>,
    %116 = vector.extract_strided_slice %7 {offsets = [54, 0], sizes = [2, 64], strides = [1, 1]} : vector<128x64xf32> to vector<2x64xf32>
    %c3_77 = arith.constant 3 : index
    %c0_78 = arith.constant 0 : index
    %c192_79 = arith.constant 192 : index
    %117 = vector.load %arg13[%c3_77, %c0_78, %c192_79] : memref<8x2x512xf32, #tpu.memory_space<vmem>>, vector<1x2x64xf32>
    %118 = vector.shape_cast %117 : vector<1x2x64xf32> to vector<2x64xf32>
    %119 = vector.shape_cast %116 : vector<2x64xf32> to vector<1x2x64xf32>
    tpu.vector_store %arg13[%c3_77, %c0_78, %c192_79], %119 {strides = array<i32>} : memref<8x2x512xf32, #tpu.memory_space<vmem>>, vector<1x2x64xf32>,
    %120 = vector.extract_strided_slice %7 {offsets = [56, 0], sizes = [2, 64], strides = [1, 1]} : vector<128x64xf32> to vector<2x64xf32>
    %c4_80 = arith.constant 4 : index
    %c0_81 = arith.constant 0 : index
    %c192_82 = arith.constant 192 : index
    %121 = vector.load %arg13[%c4_80, %c0_81, %c192_82] : memref<8x2x512xf32, #tpu.memory_space<vmem>>, vector<1x2x64xf32>
    %122 = vector.shape_cast %121 : vector<1x2x64xf32> to vector<2x64xf32>
    %123 = vector.shape_cast %120 : vector<2x64xf32> to vector<1x2x64xf32>
    tpu.vector_store %arg13[%c4_80, %c0_81, %c192_82], %123 {strides = array<i32>} : memref<8x2x512xf32, #tpu.memory_space<vmem>>, vector<1x2x64xf32>,
    %124 = vector.extract_strided_slice %7 {offsets = [58, 0], sizes = [2, 64], strides = [1, 1]} : vector<128x64xf32> to vector<2x64xf32>
    %c5_83 = arith.constant 5 : index
    %c0_84 = arith.constant 0 : index
    %c192_85 = arith.constant 192 : index
    %125 = vector.load %arg13[%c5_83, %c0_84, %c192_85] : memref<8x2x512xf32, #tpu.memory_space<vmem>>, vector<1x2x64xf32>
    %126 = vector.shape_cast %125 : vector<1x2x64xf32> to vector<2x64xf32>
    %127 = vector.shape_cast %124 : vector<2x64xf32> to vector<1x2x64xf32>
    tpu.vector_store %arg13[%c5_83, %c0_84, %c192_85], %127 {strides = array<i32>} : memref<8x2x512xf32, #tpu.memory_space<vmem>>, vector<1x2x64xf32>,
    %128 = vector.extract_strided_slice %7 {offsets = [60, 0], sizes = [2, 64], strides = [1, 1]} : vector<128x64xf32> to vector<2x64xf32>
    %c6_86 = arith.constant 6 : index
    %c0_87 = arith.constant 0 : index
    %c192_88 = arith.constant 192 : index
    %129 = vector.load %arg13[%c6_86, %c0_87, %c192_88] : memref<8x2x512xf32, #tpu.memory_space<vmem>>, vector<1x2x64xf32>
    %130 = vector.shape_cast %129 : vector<1x2x64xf32> to vector<2x64xf32>
    %131 = vector.shape_cast %128 : vector<2x64xf32> to vector<1x2x64xf32>
    tpu.vector_store %arg13[%c6_86, %c0_87, %c192_88], %131 {strides = array<i32>} : memref<8x2x512xf32, #tpu.memory_space<vmem>>, vector<1x2x64xf32>,
    %132 = vector.extract_strided_slice %7 {offsets = [62, 0], sizes = [2, 64], strides = [1, 1]} : vector<128x64xf32> to vector<2x64xf32>
    %c7_89 = arith.constant 7 : index
    %c0_90 = arith.constant 0 : index
    %c192_91 = arith.constant 192 : index
    %133 = vector.load %arg13[%c7_89, %c0_90, %c192_91] : memref<8x2x512xf32, #tpu.memory_space<vmem>>, vector<1x2x64xf32>
    %134 = vector.shape_cast %133 : vector<1x2x64xf32> to vector<2x64xf32>
    %135 = vector.shape_cast %132 : vector<2x64xf32> to vector<1x2x64xf32>
    tpu.vector_store %arg13[%c7_89, %c0_90, %c192_91], %135 {strides = array<i32>} : memref<8x2x512xf32, #tpu.memory_space<vmem>>, vector<1x2x64xf32>,
    %136 = vector.extract_strided_slice %7 {offsets = [64, 0], sizes = [2, 64], strides = [1, 1]} : vector<128x64xf32> to vector<2x64xf32>
    %c0_92 = arith.constant 0 : index
    %c0_93 = arith.constant 0 : index
    %c256 = arith.constant 256 : index
    %137 = vector.load %arg13[%c0_92, %c0_93, %c256] : memref<8x2x512xf32, #tpu.memory_space<vmem>>, vector<1x2x64xf32>
    %138 = vector.shape_cast %137 : vector<1x2x64xf32> to vector<2x64xf32>
    %139 = vector.shape_cast %136 : vector<2x64xf32> to vector<1x2x64xf32>
    tpu.vector_store %arg13[%c0_92, %c0_93, %c256], %139 {strides = array<i32>} : memref<8x2x512xf32, #tpu.memory_space<vmem>>, vector<1x2x64xf32>,
    %140 = vector.extract_strided_slice %7 {offsets = [66, 0], sizes = [2, 64], strides = [1, 1]} : vector<128x64xf32> to vector<2x64xf32>
    %c1_94 = arith.constant 1 : index
    %c0_95 = arith.constant 0 : index
    %c256_96 = arith.constant 256 : index
    %141 = vector.load %arg13[%c1_94, %c0_95, %c256_96] : memref<8x2x512xf32, #tpu.memory_space<vmem>>, vector<1x2x64xf32>
    %142 = vector.shape_cast %141 : vector<1x2x64xf32> to vector<2x64xf32>
    %143 = vector.shape_cast %140 : vector<2x64xf32> to vector<1x2x64xf32>
    tpu.vector_store %arg13[%c1_94, %c0_95, %c256_96], %143 {strides = array<i32>} : memref<8x2x512xf32, #tpu.memory_space<vmem>>, vector<1x2x64xf32>,
    %144 = vector.extract_strided_slice %7 {offsets = [68, 0], sizes = [2, 64], strides = [1, 1]} : vector<128x64xf32> to vector<2x64xf32>
    %c2_97 = arith.constant 2 : index
    %c0_98 = arith.constant 0 : index
    %c256_99 = arith.constant 256 : index
    %145 = vector.load %arg13[%c2_97, %c0_98, %c256_99] : memref<8x2x512xf32, #tpu.memory_space<vmem>>, vector<1x2x64xf32>
    %146 = vector.shape_cast %145 : vector<1x2x64xf32> to vector<2x64xf32>
    %147 = vector.shape_cast %144 : vector<2x64xf32> to vector<1x2x64xf32>
    tpu.vector_store %arg13[%c2_97, %c0_98, %c256_99], %147 {strides = array<i32>} : memref<8x2x512xf32, #tpu.memory_space<vmem>>, vector<1x2x64xf32>,
    %148 = vector.extract_strided_slice %7 {offsets = [70, 0], sizes = [2, 64], strides = [1, 1]} : vector<128x64xf32> to vector<2x64xf32>
    %c3_100 = arith.constant 3 : index
    %c0_101 = arith.constant 0 : index
    %c256_102 = arith.constant 256 : index
    %149 = vector.load %arg13[%c3_100, %c0_101, %c256_102] : memref<8x2x512xf32, #tpu.memory_space<vmem>>, vector<1x2x64xf32>
    %150 = vector.shape_cast %149 : vector<1x2x64xf32> to vector<2x64xf32>
    %151 = vector.shape_cast %148 : vector<2x64xf32> to vector<1x2x64xf32>
    tpu.vector_store %arg13[%c3_100, %c0_101, %c256_102], %151 {strides = array<i32>} : memref<8x2x512xf32, #tpu.memory_space<vmem>>, vector<1x2x64xf32>,
    %152 = vector.extract_strided_slice %7 {offsets = [72, 0], sizes = [2, 64], strides = [1, 1]} : vector<128x64xf32> to vector<2x64xf32>
    %c4_103 = arith.constant 4 : index
    %c0_104 = arith.constant 0 : index
    %c256_105 = arith.constant 256 : index
    %153 = vector.load %arg13[%c4_103, %c0_104, %c256_105] : memref<8x2x512xf32, #tpu.memory_space<vmem>>, vector<1x2x64xf32>
    %154 = vector.shape_cast %153 : vector<1x2x64xf32> to vector<2x64xf32>
    %155 = vector.shape_cast %152 : vector<2x64xf32> to vector<1x2x64xf32>
    tpu.vector_store %arg13[%c4_103, %c0_104, %c256_105], %155 {strides = array<i32>} : memref<8x2x512xf32, #tpu.memory_space<vmem>>, vector<1x2x64xf32>,
    %156 = vector.extract_strided_slice %7 {offsets = [74, 0], sizes = [2, 64], strides = [1, 1]} : vector<128x64xf32> to vector<2x64xf32>
    %c5_106 = arith.constant 5 : index
    %c0_107 = arith.constant 0 : index
    %c256_108 = arith.constant 256 : index
    %157 = vector.load %arg13[%c5_106, %c0_107, %c256_108] : memref<8x2x512xf32, #tpu.memory_space<vmem>>, vector<1x2x64xf32>
    %158 = vector.shape_cast %157 : vector<1x2x64xf32> to vector<2x64xf32>
    %159 = vector.shape_cast %156 : vector<2x64xf32> to vector<1x2x64xf32>
    tpu.vector_store %arg13[%c5_106, %c0_107, %c256_108], %159 {strides = array<i32>} : memref<8x2x512xf32, #tpu.memory_space<vmem>>, vector<1x2x64xf32>,
    %160 = vector.extract_strided_slice %7 {offsets = [76, 0], sizes = [2, 64], strides = [1, 1]} : vector<128x64xf32> to vector<2x64xf32>
    %c6_109 = arith.constant 6 : index
    %c0_110 = arith.constant 0 : index
    %c256_111 = arith.constant 256 : index
    %161 = vector.load %arg13[%c6_109, %c0_110, %c256_111] : memref<8x2x512xf32, #tpu.memory_space<vmem>>, vector<1x2x64xf32>
    %162 = vector.shape_cast %161 : vector<1x2x64xf32> to vector<2x64xf32>
    %163 = vector.shape_cast %160 : vector<2x64xf32> to vector<1x2x64xf32>
    tpu.vector_store %arg13[%c6_109, %c0_110, %c256_111], %163 {strides = array<i32>} : memref<8x2x512xf32, #tpu.memory_space<vmem>>, vector<1x2x64xf32>,
    %164 = vector.extract_strided_slice %7 {offsets = [78, 0], sizes = [2, 64], strides = [1, 1]} : vector<128x64xf32> to vector<2x64xf32>
    %c7_112 = arith.constant 7 : index
    %c0_113 = arith.constant 0 : index
    %c256_114 = arith.constant 256 : index
    %165 = vector.load %arg13[%c7_112, %c0_113, %c256_114] : memref<8x2x512xf32, #tpu.memory_space<vmem>>, vector<1x2x64xf32>
    %166 = vector.shape_cast %165 : vector<1x2x64xf32> to vector<2x64xf32>
    %167 = vector.shape_cast %164 : vector<2x64xf32> to vector<1x2x64xf32>
    tpu.vector_store %arg13[%c7_112, %c0_113, %c256_114], %167 {strides = array<i32>} : memref<8x2x512xf32, #tpu.memory_space<vmem>>, vector<1x2x64xf32>,
    %168 = vector.extract_strided_slice %7 {offsets = [80, 0], sizes = [2, 64], strides = [1, 1]} : vector<128x64xf32> to vector<2x64xf32>
    %c0_115 = arith.constant 0 : index
    %c0_116 = arith.constant 0 : index
    %c320 = arith.constant 320 : index
    %169 = vector.load %arg13[%c0_115, %c0_116, %c320] : memref<8x2x512xf32, #tpu.memory_space<vmem>>, vector<1x2x64xf32>
    %170 = vector.shape_cast %169 : vector<1x2x64xf32> to vector<2x64xf32>
    %171 = vector.shape_cast %168 : vector<2x64xf32> to vector<1x2x64xf32>
    tpu.vector_store %arg13[%c0_115, %c0_116, %c320], %171 {strides = array<i32>} : memref<8x2x512xf32, #tpu.memory_space<vmem>>, vector<1x2x64xf32>,
    %172 = vector.extract_strided_slice %7 {offsets = [82, 0], sizes = [2, 64], strides = [1, 1]} : vector<128x64xf32> to vector<2x64xf32>
    %c1_117 = arith.constant 1 : index
    %c0_118 = arith.constant 0 : index
    %c320_119 = arith.constant 320 : index
    %173 = vector.load %arg13[%c1_117, %c0_118, %c320_119] : memref<8x2x512xf32, #tpu.memory_space<vmem>>, vector<1x2x64xf32>
    %174 = vector.shape_cast %173 : vector<1x2x64xf32> to vector<2x64xf32>
    %175 = vector.shape_cast %172 : vector<2x64xf32> to vector<1x2x64xf32>
    tpu.vector_store %arg13[%c1_117, %c0_118, %c320_119], %175 {strides = array<i32>} : memref<8x2x512xf32, #tpu.memory_space<vmem>>, vector<1x2x64xf32>,
    %176 = vector.extract_strided_slice %7 {offsets = [84, 0], sizes = [2, 64], strides = [1, 1]} : vector<128x64xf32> to vector<2x64xf32>
    %c2_120 = arith.constant 2 : index
    %c0_121 = arith.constant 0 : index
    %c320_122 = arith.constant 320 : index
    %177 = vector.load %arg13[%c2_120, %c0_121, %c320_122] : memref<8x2x512xf32, #tpu.memory_space<vmem>>, vector<1x2x64xf32>
    %178 = vector.shape_cast %177 : vector<1x2x64xf32> to vector<2x64xf32>
    %179 = vector.shape_cast %176 : vector<2x64xf32> to vector<1x2x64xf32>
    tpu.vector_store %arg13[%c2_120, %c0_121, %c320_122], %179 {strides = array<i32>} : memref<8x2x512xf32, #tpu.memory_space<vmem>>, vector<1x2x64xf32>,
    %180 = vector.extract_strided_slice %7 {offsets = [86, 0], sizes = [2, 64], strides = [1, 1]} : vector<128x64xf32> to vector<2x64xf32>
    %c3_123 = arith.constant 3 : index
    %c0_124 = arith.constant 0 : index
    %c320_125 = arith.constant 320 : index
    %181 = vector.load %arg13[%c3_123, %c0_124, %c320_125] : memref<8x2x512xf32, #tpu.memory_space<vmem>>, vector<1x2x64xf32>
    %182 = vector.shape_cast %181 : vector<1x2x64xf32> to vector<2x64xf32>
    %183 = vector.shape_cast %180 : vector<2x64xf32> to vector<1x2x64xf32>
    tpu.vector_store %arg13[%c3_123, %c0_124, %c320_125], %183 {strides = array<i32>} : memref<8x2x512xf32, #tpu.memory_space<vmem>>, vector<1x2x64xf32>,
    %184 = vector.extract_strided_slice %7 {offsets = [88, 0], sizes = [2, 64], strides = [1, 1]} : vector<128x64xf32> to vector<2x64xf32>
    %c4_126 = arith.constant 4 : index
    %c0_127 = arith.constant 0 : index
    %c320_128 = arith.constant 320 : index
    %185 = vector.load %arg13[%c4_126, %c0_127, %c320_128] : memref<8x2x512xf32, #tpu.memory_space<vmem>>, vector<1x2x64xf32>
    %186 = vector.shape_cast %185 : vector<1x2x64xf32> to vector<2x64xf32>
    %187 = vector.shape_cast %184 : vector<2x64xf32> to vector<1x2x64xf32>
    tpu.vector_store %arg13[%c4_126, %c0_127, %c320_128], %187 {strides = array<i32>} : memref<8x2x512xf32, #tpu.memory_space<vmem>>, vector<1x2x64xf32>,
    %188 = vector.extract_strided_slice %7 {offsets = [90, 0], sizes = [2, 64], strides = [1, 1]} : vector<128x64xf32> to vector<2x64xf32>
    %c5_129 = arith.constant 5 : index
    %c0_130 = arith.constant 0 : index
    %c320_131 = arith.constant 320 : index
    %189 = vector.load %arg13[%c5_129, %c0_130, %c320_131] : memref<8x2x512xf32, #tpu.memory_space<vmem>>, vector<1x2x64xf32>
    %190 = vector.shape_cast %189 : vector<1x2x64xf32> to vector<2x64xf32>
    %191 = vector.shape_cast %188 : vector<2x64xf32> to vector<1x2x64xf32>
    tpu.vector_store %arg13[%c5_129, %c0_130, %c320_131], %191 {strides = array<i32>} : memref<8x2x512xf32, #tpu.memory_space<vmem>>, vector<1x2x64xf32>,
    %192 = vector.extract_strided_slice %7 {offsets = [92, 0], sizes = [2, 64], strides = [1, 1]} : vector<128x64xf32> to vector<2x64xf32>
    %c6_132 = arith.constant 6 : index
    %c0_133 = arith.constant 0 : index
    %c320_134 = arith.constant 320 : index
    %193 = vector.load %arg13[%c6_132, %c0_133, %c320_134] : memref<8x2x512xf32, #tpu.memory_space<vmem>>, vector<1x2x64xf32>
    %194 = vector.shape_cast %193 : vector<1x2x64xf32> to vector<2x64xf32>
    %195 = vector.shape_cast %192 : vector<2x64xf32> to vector<1x2x64xf32>
    tpu.vector_store %arg13[%c6_132, %c0_133, %c320_134], %195 {strides = array<i32>} : memref<8x2x512xf32, #tpu.memory_space<vmem>>, vector<1x2x64xf32>,
    %196 = vector.extract_strided_slice %7 {offsets = [94, 0], sizes = [2, 64], strides = [1, 1]} : vector<128x64xf32> to vector<2x64xf32>
    %c7_135 = arith.constant 7 : index
    %c0_136 = arith.constant 0 : index
    %c320_137 = arith.constant 320 : index
    %197 = vector.load %arg13[%c7_135, %c0_136, %c320_137] : memref<8x2x512xf32, #tpu.memory_space<vmem>>, vector<1x2x64xf32>
    %198 = vector.shape_cast %197 : vector<1x2x64xf32> to vector<2x64xf32>
    %199 = vector.shape_cast %196 : vector<2x64xf32> to vector<1x2x64xf32>
    tpu.vector_store %arg13[%c7_135, %c0_136, %c320_137], %199 {strides = array<i32>} : memref<8x2x512xf32, #tpu.memory_space<vmem>>, vector<1x2x64xf32>,
    %200 = vector.extract_strided_slice %7 {offsets = [96, 0], sizes = [2, 64], strides = [1, 1]} : vector<128x64xf32> to vector<2x64xf32>
    %c0_138 = arith.constant 0 : index
    %c0_139 = arith.constant 0 : index
    %c384 = arith.constant 384 : index
    %201 = vector.load %arg13[%c0_138, %c0_139, %c384] : memref<8x2x512xf32, #tpu.memory_space<vmem>>, vector<1x2x64xf32>
    %202 = vector.shape_cast %201 : vector<1x2x64xf32> to vector<2x64xf32>
    %203 = vector.shape_cast %200 : vector<2x64xf32> to vector<1x2x64xf32>
    tpu.vector_store %arg13[%c0_138, %c0_139, %c384], %203 {strides = array<i32>} : memref<8x2x512xf32, #tpu.memory_space<vmem>>, vector<1x2x64xf32>,
    %204 = vector.extract_strided_slice %7 {offsets = [98, 0], sizes = [2, 64], strides = [1, 1]} : vector<128x64xf32> to vector<2x64xf32>
    %c1_140 = arith.constant 1 : index
    %c0_141 = arith.constant 0 : index
    %c384_142 = arith.constant 384 : index
    %205 = vector.load %arg13[%c1_140, %c0_141, %c384_142] : memref<8x2x512xf32, #tpu.memory_space<vmem>>, vector<1x2x64xf32>
    %206 = vector.shape_cast %205 : vector<1x2x64xf32> to vector<2x64xf32>
    %207 = vector.shape_cast %204 : vector<2x64xf32> to vector<1x2x64xf32>
    tpu.vector_store %arg13[%c1_140, %c0_141, %c384_142], %207 {strides = array<i32>} : memref<8x2x512xf32, #tpu.memory_space<vmem>>, vector<1x2x64xf32>,
    %208 = vector.extract_strided_slice %7 {offsets = [100, 0], sizes = [2, 64], strides = [1, 1]} : vector<128x64xf32> to vector<2x64xf32>
    %c2_143 = arith.constant 2 : index
    %c0_144 = arith.constant 0 : index
    %c384_145 = arith.constant 384 : index
    %209 = vector.load %arg13[%c2_143, %c0_144, %c384_145] : memref<8x2x512xf32, #tpu.memory_space<vmem>>, vector<1x2x64xf32>
    %210 = vector.shape_cast %209 : vector<1x2x64xf32> to vector<2x64xf32>
    %211 = vector.shape_cast %208 : vector<2x64xf32> to vector<1x2x64xf32>
    tpu.vector_store %arg13[%c2_143, %c0_144, %c384_145], %211 {strides = array<i32>} : memref<8x2x512xf32, #tpu.memory_space<vmem>>, vector<1x2x64xf32>,
    %212 = vector.extract_strided_slice %7 {offsets = [102, 0], sizes = [2, 64], strides = [1, 1]} : vector<128x64xf32> to vector<2x64xf32>
    %c3_146 = arith.constant 3 : index
    %c0_147 = arith.constant 0 : index
    %c384_148 = arith.constant 384 : index
    %213 = vector.load %arg13[%c3_146, %c0_147, %c384_148] : memref<8x2x512xf32, #tpu.memory_space<vmem>>, vector<1x2x64xf32>
    %214 = vector.shape_cast %213 : vector<1x2x64xf32> to vector<2x64xf32>
    %215 = vector.shape_cast %212 : vector<2x64xf32> to vector<1x2x64xf32>
    tpu.vector_store %arg13[%c3_146, %c0_147, %c384_148], %215 {strides = array<i32>} : memref<8x2x512xf32, #tpu.memory_space<vmem>>, vector<1x2x64xf32>,
    %216 = vector.extract_strided_slice %7 {offsets = [104, 0], sizes = [2, 64], strides = [1, 1]} : vector<128x64xf32> to vector<2x64xf32>
    %c4_149 = arith.constant 4 : index
    %c0_150 = arith.constant 0 : index
    %c384_151 = arith.constant 384 : index
    %217 = vector.load %arg13[%c4_149, %c0_150, %c384_151] : memref<8x2x512xf32, #tpu.memory_space<vmem>>, vector<1x2x64xf32>
    %218 = vector.shape_cast %217 : vector<1x2x64xf32> to vector<2x64xf32>
    %219 = vector.shape_cast %216 : vector<2x64xf32> to vector<1x2x64xf32>
    tpu.vector_store %arg13[%c4_149, %c0_150, %c384_151], %219 {strides = array<i32>} : memref<8x2x512xf32, #tpu.memory_space<vmem>>, vector<1x2x64xf32>,
    %220 = vector.extract_strided_slice %7 {offsets = [106, 0], sizes = [2, 64], strides = [1, 1]} : vector<128x64xf32> to vector<2x64xf32>
    %c5_152 = arith.constant 5 : index
    %c0_153 = arith.constant 0 : index
    %c384_154 = arith.constant 384 : index
    %221 = vector.load %arg13[%c5_152, %c0_153, %c384_154] : memref<8x2x512xf32, #tpu.memory_space<vmem>>, vector<1x2x64xf32>
    %222 = vector.shape_cast %221 : vector<1x2x64xf32> to vector<2x64xf32>
    %223 = vector.shape_cast %220 : vector<2x64xf32> to vector<1x2x64xf32>
    tpu.vector_store %arg13[%c5_152, %c0_153, %c384_154], %223 {strides = array<i32>} : memref<8x2x512xf32, #tpu.memory_space<vmem>>, vector<1x2x64xf32>,
    %224 = vector.extract_strided_slice %7 {offsets = [108, 0], sizes = [2, 64], strides = [1, 1]} : vector<128x64xf32> to vector<2x64xf32>
    %c6_155 = arith.constant 6 : index
    %c0_156 = arith.constant 0 : index
    %c384_157 = arith.constant 384 : index
    %225 = vector.load %arg13[%c6_155, %c0_156, %c384_157] : memref<8x2x512xf32, #tpu.memory_space<vmem>>, vector<1x2x64xf32>
    %226 = vector.shape_cast %225 : vector<1x2x64xf32> to vector<2x64xf32>
    %227 = vector.shape_cast %224 : vector<2x64xf32> to vector<1x2x64xf32>
    tpu.vector_store %arg13[%c6_155, %c0_156, %c384_157], %227 {strides = array<i32>} : memref<8x2x512xf32, #tpu.memory_space<vmem>>, vector<1x2x64xf32>,
    %228 = vector.extract_strided_slice %7 {offsets = [110, 0], sizes = [2, 64], strides = [1, 1]} : vector<128x64xf32> to vector<2x64xf32>
    %c7_158 = arith.constant 7 : index
    %c0_159 = arith.constant 0 : index
    %c384_160 = arith.constant 384 : index
    %229 = vector.load %arg13[%c7_158, %c0_159, %c384_160] : memref<8x2x512xf32, #tpu.memory_space<vmem>>, vector<1x2x64xf32>
    %230 = vector.shape_cast %229 : vector<1x2x64xf32> to vector<2x64xf32>
    %231 = vector.shape_cast %228 : vector<2x64xf32> to vector<1x2x64xf32>
    tpu.vector_store %arg13[%c7_158, %c0_159, %c384_160], %231 {strides = array<i32>} : memref<8x2x512xf32, #tpu.memory_space<vmem>>, vector<1x2x64xf32>,
    %232 = vector.extract_strided_slice %7 {offsets = [112, 0], sizes = [2, 64], strides = [1, 1]} : vector<128x64xf32> to vector<2x64xf32>
    %c0_161 = arith.constant 0 : index
    %c0_162 = arith.constant 0 : index
    %c448 = arith.constant 448 : index
    %233 = vector.load %arg13[%c0_161, %c0_162, %c448] : memref<8x2x512xf32, #tpu.memory_space<vmem>>, vector<1x2x64xf32>
    %234 = vector.shape_cast %233 : vector<1x2x64xf32> to vector<2x64xf32>
    %235 = vector.shape_cast %232 : vector<2x64xf32> to vector<1x2x64xf32>
    tpu.vector_store %arg13[%c0_161, %c0_162, %c448], %235 {strides = array<i32>} : memref<8x2x512xf32, #tpu.memory_space<vmem>>, vector<1x2x64xf32>,
    %236 = vector.extract_strided_slice %7 {offsets = [114, 0], sizes = [2, 64], strides = [1, 1]} : vector<128x64xf32> to vector<2x64xf32>
    %c1_163 = arith.constant 1 : index
    %c0_164 = arith.constant 0 : index
    %c448_165 = arith.constant 448 : index
    %237 = vector.load %arg13[%c1_163, %c0_164, %c448_165] : memref<8x2x512xf32, #tpu.memory_space<vmem>>, vector<1x2x64xf32>
    %238 = vector.shape_cast %237 : vector<1x2x64xf32> to vector<2x64xf32>
    %239 = vector.shape_cast %236 : vector<2x64xf32> to vector<1x2x64xf32>
    tpu.vector_store %arg13[%c1_163, %c0_164, %c448_165], %239 {strides = array<i32>} : memref<8x2x512xf32, #tpu.memory_space<vmem>>, vector<1x2x64xf32>,
    %240 = vector.extract_strided_slice %7 {offsets = [116, 0], sizes = [2, 64], strides = [1, 1]} : vector<128x64xf32> to vector<2x64xf32>
    %c2_166 = arith.constant 2 : index
    %c0_167 = arith.constant 0 : index
    %c448_168 = arith.constant 448 : index
    %241 = vector.load %arg13[%c2_166, %c0_167, %c448_168] : memref<8x2x512xf32, #tpu.memory_space<vmem>>, vector<1x2x64xf32>
    %242 = vector.shape_cast %241 : vector<1x2x64xf32> to vector<2x64xf32>
    %243 = vector.shape_cast %240 : vector<2x64xf32> to vector<1x2x64xf32>
    tpu.vector_store %arg13[%c2_166, %c0_167, %c448_168], %243 {strides = array<i32>} : memref<8x2x512xf32, #tpu.memory_space<vmem>>, vector<1x2x64xf32>,
    %244 = vector.extract_strided_slice %7 {offsets = [118, 0], sizes = [2, 64], strides = [1, 1]} : vector<128x64xf32> to vector<2x64xf32>
    %c3_169 = arith.constant 3 : index
    %c0_170 = arith.constant 0 : index
    %c448_171 = arith.constant 448 : index
    %245 = vector.load %arg13[%c3_169, %c0_170, %c448_171] : memref<8x2x512xf32, #tpu.memory_space<vmem>>, vector<1x2x64xf32>
    %246 = vector.shape_cast %245 : vector<1x2x64xf32> to vector<2x64xf32>
    %247 = vector.shape_cast %244 : vector<2x64xf32> to vector<1x2x64xf32>
    tpu.vector_store %arg13[%c3_169, %c0_170, %c448_171], %247 {strides = array<i32>} : memref<8x2x512xf32, #tpu.memory_space<vmem>>, vector<1x2x64xf32>,
    %248 = vector.extract_strided_slice %7 {offsets = [120, 0], sizes = [2, 64], strides = [1, 1]} : vector<128x64xf32> to vector<2x64xf32>
    %c4_172 = arith.constant 4 : index
    %c0_173 = arith.constant 0 : index
    %c448_174 = arith.constant 448 : index
    %249 = vector.load %arg13[%c4_172, %c0_173, %c448_174] : memref<8x2x512xf32, #tpu.memory_space<vmem>>, vector<1x2x64xf32>
    %250 = vector.shape_cast %249 : vector<1x2x64xf32> to vector<2x64xf32>
    %251 = vector.shape_cast %248 : vector<2x64xf32> to vector<1x2x64xf32>
    tpu.vector_store %arg13[%c4_172, %c0_173, %c448_174], %251 {strides = array<i32>} : memref<8x2x512xf32, #tpu.memory_space<vmem>>, vector<1x2x64xf32>,
    %252 = vector.extract_strided_slice %7 {offsets = [122, 0], sizes = [2, 64], strides = [1, 1]} : vector<128x64xf32> to vector<2x64xf32>
    %c5_175 = arith.constant 5 : index
    %c0_176 = arith.constant 0 : index
    %c448_177 = arith.constant 448 : index
    %253 = vector.load %arg13[%c5_175, %c0_176, %c448_177] : memref<8x2x512xf32, #tpu.memory_space<vmem>>, vector<1x2x64xf32>
    %254 = vector.shape_cast %253 : vector<1x2x64xf32> to vector<2x64xf32>
    %255 = vector.shape_cast %252 : vector<2x64xf32> to vector<1x2x64xf32>
    tpu.vector_store %arg13[%c5_175, %c0_176, %c448_177], %255 {strides = array<i32>} : memref<8x2x512xf32, #tpu.memory_space<vmem>>, vector<1x2x64xf32>,
    %256 = vector.extract_strided_slice %7 {offsets = [124, 0], sizes = [2, 64], strides = [1, 1]} : vector<128x64xf32> to vector<2x64xf32>
    %c6_178 = arith.constant 6 : index
    %c0_179 = arith.constant 0 : index
    %c448_180 = arith.constant 448 : index
    %257 = vector.load %arg13[%c6_178, %c0_179, %c448_180] : memref<8x2x512xf32, #tpu.memory_space<vmem>>, vector<1x2x64xf32>
    %258 = vector.shape_cast %257 : vector<1x2x64xf32> to vector<2x64xf32>
    %259 = vector.shape_cast %256 : vector<2x64xf32> to vector<1x2x64xf32>
    tpu.vector_store %arg13[%c6_178, %c0_179, %c448_180], %259 {strides = array<i32>} : memref<8x2x512xf32, #tpu.memory_space<vmem>>, vector<1x2x64xf32>,
    %260 = vector.extract_strided_slice %7 {offsets = [126, 0], sizes = [2, 64], strides = [1, 1]} : vector<128x64xf32> to vector<2x64xf32>
    %c7_181 = arith.constant 7 : index
    %c0_182 = arith.constant 0 : index
    %c448_183 = arith.constant 448 : index
    %261 = vector.load %arg13[%c7_181, %c0_182, %c448_183] : memref<8x2x512xf32, #tpu.memory_space<vmem>>, vector<1x2x64xf32>
    %262 = vector.shape_cast %261 : vector<1x2x64xf32> to vector<2x64xf32>
    %263 = vector.shape_cast %260 : vector<2x64xf32> to vector<1x2x64xf32>
    tpu.vector_store %arg13[%c7_181, %c0_182, %c448_183], %263 {strides = array<i32>} : memref<8x2x512xf32, #tpu.memory_space<vmem>>, vector<1x2x64xf32>,
    %c0_184 = arith.constant 0 : index
    %c0_185 = arith.constant 0 : index
    %c0_186 = arith.constant 0 : index
    %264 = vector.load %arg4[%c0_184, %c0_185, %c0_186] : memref<4x256x64xbf16, #tpu.memory_space<vmem>>, vector<1x256x64xbf16>
    %265 = vector.shape_cast %264 : vector<1x256x64xbf16> to vector<256x64xbf16>
    %c1_187 = arith.constant 1 : index
    %c0_188 = arith.constant 0 : index
    %c0_189 = arith.constant 0 : index
    %266 = vector.load %arg4[%c1_187, %c0_188, %c0_189] : memref<4x256x64xbf16, #tpu.memory_space<vmem>>, vector<1x256x64xbf16>
    %267 = vector.shape_cast %266 : vector<1x256x64xbf16> to vector<256x64xbf16>
    %c2_190 = arith.constant 2 : index
    %c0_191 = arith.constant 0 : index
    %c0_192 = arith.constant 0 : index
    %268 = vector.load %arg4[%c2_190, %c0_191, %c0_192] : memref<4x256x64xbf16, #tpu.memory_space<vmem>>, vector<1x256x64xbf16>
    %269 = vector.shape_cast %268 : vector<1x256x64xbf16> to vector<256x64xbf16>
    %c3_193 = arith.constant 3 : index
    %c0_194 = arith.constant 0 : index
    %c0_195 = arith.constant 0 : index
    %270 = vector.load %arg4[%c3_193, %c0_194, %c0_195] : memref<4x256x64xbf16, #tpu.memory_space<vmem>>, vector<1x256x64xbf16>
    %271 = vector.shape_cast %270 : vector<1x256x64xbf16> to vector<256x64xbf16>
    %c0_196 = arith.constant 0 : index
    %c0_197 = arith.constant 0 : index
    %272 = vector.load %arg5[%c0_196, %c0_197] : memref<1x64xf32, #tpu.memory_space<vmem>>, vector<1x64xf32>
    %c0_198 = arith.constant 0 : index
    %c0_199 = arith.constant 0 : index
    %c0_200 = arith.constant 0 : index
    %273 = vector.load %arg13[%c0_198, %c0_199, %c0_200] : memref<8x2x512xf32, #tpu.memory_space<vmem>>, vector<1x2x256xf32>
    %274 = vector.shape_cast %273 : vector<1x2x256xf32> to vector<2x256xf32>
    %275 = arith.truncf %274 : vector<2x256xf32> to vector<2x256xbf16>
    %cst_201 = arith.constant dense<0.000000e+00> : vector<2x64xf32>
    %276 = tpu.matmul %275, %265, %cst_201 {dimension_numbers = #tpu.dot_dimension_numbers<[1], [0], [0], [1], [0, 0, 1, 1], [], []>} : vector<2x256xbf16>, vector<256x64xbf16>, vector<2x64xf32> -> vector<2x64xf32>
    %c1_202 = arith.constant 1 : index
    %c0_203 = arith.constant 0 : index
    %c0_204 = arith.constant 0 : index
    %277 = vector.load %arg13[%c1_202, %c0_203, %c0_204] : memref<8x2x512xf32, #tpu.memory_space<vmem>>, vector<1x2x256xf32>
    %278 = vector.shape_cast %277 : vector<1x2x256xf32> to vector<2x256xf32>
    %279 = arith.truncf %278 : vector<2x256xf32> to vector<2x256xbf16>
    %cst_205 = arith.constant dense<0.000000e+00> : vector<2x64xf32>
    %280 = tpu.matmul %279, %267, %cst_205 {dimension_numbers = #tpu.dot_dimension_numbers<[1], [0], [0], [1], [0, 0, 1, 1], [], []>} : vector<2x256xbf16>, vector<256x64xbf16>, vector<2x64xf32> -> vector<2x64xf32>
    %281 = arith.addf %276, %280 : vector<2x64xf32>
    %c2_206 = arith.constant 2 : index
    %c0_207 = arith.constant 0 : index
    %c0_208 = arith.constant 0 : index
    %282 = vector.load %arg13[%c2_206, %c0_207, %c0_208] : memref<8x2x512xf32, #tpu.memory_space<vmem>>, vector<1x2x256xf32>
    %283 = vector.shape_cast %282 : vector<1x2x256xf32> to vector<2x256xf32>
    %284 = arith.truncf %283 : vector<2x256xf32> to vector<2x256xbf16>
    %cst_209 = arith.constant dense<0.000000e+00> : vector<2x64xf32>
    %285 = tpu.matmul %284, %269, %cst_209 {dimension_numbers = #tpu.dot_dimension_numbers<[1], [0], [0], [1], [0, 0, 1, 1], [], []>} : vector<2x256xbf16>, vector<256x64xbf16>, vector<2x64xf32> -> vector<2x64xf32>
    %286 = arith.addf %281, %285 : vector<2x64xf32>
    %c3_210 = arith.constant 3 : index
    %c0_211 = arith.constant 0 : index
    %c0_212 = arith.constant 0 : index
    %287 = vector.load %arg13[%c3_210, %c0_211, %c0_212] : memref<8x2x512xf32, #tpu.memory_space<vmem>>, vector<1x2x256xf32>
    %288 = vector.shape_cast %287 : vector<1x2x256xf32> to vector<2x256xf32>
    %289 = arith.truncf %288 : vector<2x256xf32> to vector<2x256xbf16>
    %cst_213 = arith.constant dense<0.000000e+00> : vector<2x64xf32>
    %290 = tpu.matmul %289, %271, %cst_213 {dimension_numbers = #tpu.dot_dimension_numbers<[1], [0], [0], [1], [0, 0, 1, 1], [], []>} : vector<2x256xbf16>, vector<256x64xbf16>, vector<2x64xf32> -> vector<2x64xf32>
    %291 = arith.addf %286, %290 : vector<2x64xf32>
    %292 = vector.broadcast %272 : vector<1x64xf32> to vector<2x64xf32>
    %293 = arith.addf %291, %292 : vector<2x64xf32>
    %cst_214 = arith.constant 0.000000e+00 : f32
    %294 = vector.broadcast %cst_214 : f32 to vector<2x64xf32>
    %295 = arith.maximumf %293, %294 : vector<2x64xf32>
    %c0_215 = arith.constant 0 : index
    %c0_216 = arith.constant 0 : index
    %c0_217 = arith.constant 0 : index
    %296 = vector.load %arg14[%c0_215, %c0_216, %c0_217] : memref<3x2x192xf32, #tpu.memory_space<vmem>>, vector<1x2x64xf32>
    %297 = vector.shape_cast %296 : vector<1x2x64xf32> to vector<2x64xf32>
    %298 = vector.shape_cast %295 : vector<2x64xf32> to vector<1x2x64xf32>
    tpu.vector_store %arg14[%c0_215, %c0_216, %c0_217], %298 {strides = array<i32>} : memref<3x2x192xf32, #tpu.memory_space<vmem>>, vector<1x2x64xf32>,
    %c0_218 = arith.constant 0 : index
    %c0_219 = arith.constant 0 : index
    %c128_220 = arith.constant 128 : index
    %299 = vector.load %arg13[%c0_218, %c0_219, %c128_220] : memref<8x2x512xf32, #tpu.memory_space<vmem>>, vector<1x2x256xf32>
    %300 = vector.shape_cast %299 : vector<1x2x256xf32> to vector<2x256xf32>
    %301 = arith.truncf %300 : vector<2x256xf32> to vector<2x256xbf16>
    %cst_221 = arith.constant dense<0.000000e+00> : vector<2x64xf32>
    %302 = tpu.matmul %301, %265, %cst_221 {dimension_numbers = #tpu.dot_dimension_numbers<[1], [0], [0], [1], [0, 0, 1, 1], [], []>} : vector<2x256xbf16>, vector<256x64xbf16>, vector<2x64xf32> -> vector<2x64xf32>
    %c1_222 = arith.constant 1 : index
    %c0_223 = arith.constant 0 : index
    %c128_224 = arith.constant 128 : index
    %303 = vector.load %arg13[%c1_222, %c0_223, %c128_224] : memref<8x2x512xf32, #tpu.memory_space<vmem>>, vector<1x2x256xf32>
    %304 = vector.shape_cast %303 : vector<1x2x256xf32> to vector<2x256xf32>
    %305 = arith.truncf %304 : vector<2x256xf32> to vector<2x256xbf16>
    %cst_225 = arith.constant dense<0.000000e+00> : vector<2x64xf32>
    %306 = tpu.matmul %305, %267, %cst_225 {dimension_numbers = #tpu.dot_dimension_numbers<[1], [0], [0], [1], [0, 0, 1, 1], [], []>} : vector<2x256xbf16>, vector<256x64xbf16>, vector<2x64xf32> -> vector<2x64xf32>
    %307 = arith.addf %302, %306 : vector<2x64xf32>
    %c2_226 = arith.constant 2 : index
    %c0_227 = arith.constant 0 : index
    %c128_228 = arith.constant 128 : index
    %308 = vector.load %arg13[%c2_226, %c0_227, %c128_228] : memref<8x2x512xf32, #tpu.memory_space<vmem>>, vector<1x2x256xf32>
    %309 = vector.shape_cast %308 : vector<1x2x256xf32> to vector<2x256xf32>
    %310 = arith.truncf %309 : vector<2x256xf32> to vector<2x256xbf16>
    %cst_229 = arith.constant dense<0.000000e+00> : vector<2x64xf32>
    %311 = tpu.matmul %310, %269, %cst_229 {dimension_numbers = #tpu.dot_dimension_numbers<[1], [0], [0], [1], [0, 0, 1, 1], [], []>} : vector<2x256xbf16>, vector<256x64xbf16>, vector<2x64xf32> -> vector<2x64xf32>
    %312 = arith.addf %307, %311 : vector<2x64xf32>
    %c3_230 = arith.constant 3 : index
    %c0_231 = arith.constant 0 : index
    %c128_232 = arith.constant 128 : index
    %313 = vector.load %arg13[%c3_230, %c0_231, %c128_232] : memref<8x2x512xf32, #tpu.memory_space<vmem>>, vector<1x2x256xf32>
    %314 = vector.shape_cast %313 : vector<1x2x256xf32> to vector<2x256xf32>
    %315 = arith.truncf %314 : vector<2x256xf32> to vector<2x256xbf16>
    %cst_233 = arith.constant dense<0.000000e+00> : vector<2x64xf32>
    %316 = tpu.matmul %315, %271, %cst_233 {dimension_numbers = #tpu.dot_dimension_numbers<[1], [0], [0], [1], [0, 0, 1, 1], [], []>} : vector<2x256xbf16>, vector<256x64xbf16>, vector<2x64xf32> -> vector<2x64xf32>
    %317 = arith.addf %312, %316 : vector<2x64xf32>
    %318 = vector.broadcast %272 : vector<1x64xf32> to vector<2x64xf32>
    %319 = arith.addf %317, %318 : vector<2x64xf32>
    %cst_234 = arith.constant 0.000000e+00 : f32
    %320 = vector.broadcast %cst_234 : f32 to vector<2x64xf32>
    %321 = arith.maximumf %319, %320 : vector<2x64xf32>
    %c0_235 = arith.constant 0 : index
    %c0_236 = arith.constant 0 : index
    %c64_237 = arith.constant 64 : index
    %322 = vector.load %arg14[%c0_235, %c0_236, %c64_237] : memref<3x2x192xf32, #tpu.memory_space<vmem>>, vector<1x2x64xf32>
    %323 = vector.shape_cast %322 : vector<1x2x64xf32> to vector<2x64xf32>
    %324 = vector.shape_cast %321 : vector<2x64xf32> to vector<1x2x64xf32>
    tpu.vector_store %arg14[%c0_235, %c0_236, %c64_237], %324 {strides = array<i32>} : memref<3x2x192xf32, #tpu.memory_space<vmem>>, vector<1x2x64xf32>,
    %c0_238 = arith.constant 0 : index
    %c0_239 = arith.constant 0 : index
    %c256_240 = arith.constant 256 : index
    %325 = vector.load %arg13[%c0_238, %c0_239, %c256_240] : memref<8x2x512xf32, #tpu.memory_space<vmem>>, vector<1x2x256xf32>
    %326 = vector.shape_cast %325 : vector<1x2x256xf32> to vector<2x256xf32>
    %327 = arith.truncf %326 : vector<2x256xf32> to vector<2x256xbf16>
    %cst_241 = arith.constant dense<0.000000e+00> : vector<2x64xf32>
    %328 = tpu.matmul %327, %265, %cst_241 {dimension_numbers = #tpu.dot_dimension_numbers<[1], [0], [0], [1], [0, 0, 1, 1], [], []>} : vector<2x256xbf16>, vector<256x64xbf16>, vector<2x64xf32> -> vector<2x64xf32>
    %c1_242 = arith.constant 1 : index
    %c0_243 = arith.constant 0 : index
    %c256_244 = arith.constant 256 : index
    %329 = vector.load %arg13[%c1_242, %c0_243, %c256_244] : memref<8x2x512xf32, #tpu.memory_space<vmem>>, vector<1x2x256xf32>
    %330 = vector.shape_cast %329 : vector<1x2x256xf32> to vector<2x256xf32>
    %331 = arith.truncf %330 : vector<2x256xf32> to vector<2x256xbf16>
    %cst_245 = arith.constant dense<0.000000e+00> : vector<2x64xf32>
    %332 = tpu.matmul %331, %267, %cst_245 {dimension_numbers = #tpu.dot_dimension_numbers<[1], [0], [0], [1], [0, 0, 1, 1], [], []>} : vector<2x256xbf16>, vector<256x64xbf16>, vector<2x64xf32> -> vector<2x64xf32>
    %333 = arith.addf %328, %332 : vector<2x64xf32>
    %c2_246 = arith.constant 2 : index
    %c0_247 = arith.constant 0 : index
    %c256_248 = arith.constant 256 : index
    %334 = vector.load %arg13[%c2_246, %c0_247, %c256_248] : memref<8x2x512xf32, #tpu.memory_space<vmem>>, vector<1x2x256xf32>
    %335 = vector.shape_cast %334 : vector<1x2x256xf32> to vector<2x256xf32>
    %336 = arith.truncf %335 : vector<2x256xf32> to vector<2x256xbf16>
    %cst_249 = arith.constant dense<0.000000e+00> : vector<2x64xf32>
    %337 = tpu.matmul %336, %269, %cst_249 {dimension_numbers = #tpu.dot_dimension_numbers<[1], [0], [0], [1], [0, 0, 1, 1], [], []>} : vector<2x256xbf16>, vector<256x64xbf16>, vector<2x64xf32> -> vector<2x64xf32>
    %338 = arith.addf %333, %337 : vector<2x64xf32>
    %c3_250 = arith.constant 3 : index
    %c0_251 = arith.constant 0 : index
    %c256_252 = arith.constant 256 : index
    %339 = vector.load %arg13[%c3_250, %c0_251, %c256_252] : memref<8x2x512xf32, #tpu.memory_space<vmem>>, vector<1x2x256xf32>
    %340 = vector.shape_cast %339 : vector<1x2x256xf32> to vector<2x256xf32>
    %341 = arith.truncf %340 : vector<2x256xf32> to vector<2x256xbf16>
    %cst_253 = arith.constant dense<0.000000e+00> : vector<2x64xf32>
    %342 = tpu.matmul %341, %271, %cst_253 {dimension_numbers = #tpu.dot_dimension_numbers<[1], [0], [0], [1], [0, 0, 1, 1], [], []>} : vector<2x256xbf16>, vector<256x64xbf16>, vector<2x64xf32> -> vector<2x64xf32>
    %343 = arith.addf %338, %342 : vector<2x64xf32>
    %344 = vector.broadcast %272 : vector<1x64xf32> to vector<2x64xf32>
    %345 = arith.addf %343, %344 : vector<2x64xf32>
    %cst_254 = arith.constant 0.000000e+00 : f32
    %346 = vector.broadcast %cst_254 : f32 to vector<2x64xf32>
    %347 = arith.maximumf %345, %346 : vector<2x64xf32>
    %c0_255 = arith.constant 0 : index
    %c0_256 = arith.constant 0 : index
    %c128_257 = arith.constant 128 : index
    %348 = vector.load %arg14[%c0_255, %c0_256, %c128_257] : memref<3x2x192xf32, #tpu.memory_space<vmem>>, vector<1x2x64xf32>
    %349 = vector.shape_cast %348 : vector<1x2x64xf32> to vector<2x64xf32>
    %350 = vector.shape_cast %347 : vector<2x64xf32> to vector<1x2x64xf32>
    tpu.vector_store %arg14[%c0_255, %c0_256, %c128_257], %350 {strides = array<i32>} : memref<3x2x192xf32, #tpu.memory_space<vmem>>, vector<1x2x64xf32>,
    %c2_258 = arith.constant 2 : index
    %c0_259 = arith.constant 0 : index
    %c0_260 = arith.constant 0 : index
    %351 = vector.load %arg13[%c2_258, %c0_259, %c0_260] : memref<8x2x512xf32, #tpu.memory_space<vmem>>, vector<1x2x256xf32>
    %352 = vector.shape_cast %351 : vector<1x2x256xf32> to vector<2x256xf32>
    %353 = arith.truncf %352 : vector<2x256xf32> to vector<2x256xbf16>
    %cst_261 = arith.constant dense<0.000000e+00> : vector<2x64xf32>
    %354 = tpu.matmul %353, %265, %cst_261 {dimension_numbers = #tpu.dot_dimension_numbers<[1], [0], [0], [1], [0, 0, 1, 1], [], []>} : vector<2x256xbf16>, vector<256x64xbf16>, vector<2x64xf32> -> vector<2x64xf32>
    %c3_262 = arith.constant 3 : index
    %c0_263 = arith.constant 0 : index
    %c0_264 = arith.constant 0 : index
    %355 = vector.load %arg13[%c3_262, %c0_263, %c0_264] : memref<8x2x512xf32, #tpu.memory_space<vmem>>, vector<1x2x256xf32>
    %356 = vector.shape_cast %355 : vector<1x2x256xf32> to vector<2x256xf32>
    %357 = arith.truncf %356 : vector<2x256xf32> to vector<2x256xbf16>
    %cst_265 = arith.constant dense<0.000000e+00> : vector<2x64xf32>
    %358 = tpu.matmul %357, %267, %cst_265 {dimension_numbers = #tpu.dot_dimension_numbers<[1], [0], [0], [1], [0, 0, 1, 1], [], []>} : vector<2x256xbf16>, vector<256x64xbf16>, vector<2x64xf32> -> vector<2x64xf32>
    %359 = arith.addf %354, %358 : vector<2x64xf32>
    %c4_266 = arith.constant 4 : index
    %c0_267 = arith.constant 0 : index
    %c0_268 = arith.constant 0 : index
    %360 = vector.load %arg13[%c4_266, %c0_267, %c0_268] : memref<8x2x512xf32, #tpu.memory_space<vmem>>, vector<1x2x256xf32>
    %361 = vector.shape_cast %360 : vector<1x2x256xf32> to vector<2x256xf32>
    %362 = arith.truncf %361 : vector<2x256xf32> to vector<2x256xbf16>
    %cst_269 = arith.constant dense<0.000000e+00> : vector<2x64xf32>
    %363 = tpu.matmul %362, %269, %cst_269 {dimension_numbers = #tpu.dot_dimension_numbers<[1], [0], [0], [1], [0, 0, 1, 1], [], []>} : vector<2x256xbf16>, vector<256x64xbf16>, vector<2x64xf32> -> vector<2x64xf32>
    %364 = arith.addf %359, %363 : vector<2x64xf32>
    %c5_270 = arith.constant 5 : index
    %c0_271 = arith.constant 0 : index
    %c0_272 = arith.constant 0 : index
    %365 = vector.load %arg13[%c5_270, %c0_271, %c0_272] : memref<8x2x512xf32, #tpu.memory_space<vmem>>, vector<1x2x256xf32>
    %366 = vector.shape_cast %365 : vector<1x2x256xf32> to vector<2x256xf32>
    %367 = arith.truncf %366 : vector<2x256xf32> to vector<2x256xbf16>
    %cst_273 = arith.constant dense<0.000000e+00> : vector<2x64xf32>
    %368 = tpu.matmul %367, %271, %cst_273 {dimension_numbers = #tpu.dot_dimension_numbers<[1], [0], [0], [1], [0, 0, 1, 1], [], []>} : vector<2x256xbf16>, vector<256x64xbf16>, vector<2x64xf32> -> vector<2x64xf32>
    %369 = arith.addf %364, %368 : vector<2x64xf32>
    %370 = vector.broadcast %272 : vector<1x64xf32> to vector<2x64xf32>
    %371 = arith.addf %369, %370 : vector<2x64xf32>
    %cst_274 = arith.constant 0.000000e+00 : f32
    %372 = vector.broadcast %cst_274 : f32 to vector<2x64xf32>
    %373 = arith.maximumf %371, %372 : vector<2x64xf32>
    %c1_275 = arith.constant 1 : index
    %c0_276 = arith.constant 0 : index
    %c0_277 = arith.constant 0 : index
    %374 = vector.load %arg14[%c1_275, %c0_276, %c0_277] : memref<3x2x192xf32, #tpu.memory_space<vmem>>, vector<1x2x64xf32>
    %375 = vector.shape_cast %374 : vector<1x2x64xf32> to vector<2x64xf32>
    %376 = vector.shape_cast %373 : vector<2x64xf32> to vector<1x2x64xf32>
    tpu.vector_store %arg14[%c1_275, %c0_276, %c0_277], %376 {strides = array<i32>} : memref<3x2x192xf32, #tpu.memory_space<vmem>>, vector<1x2x64xf32>,
    %c2_278 = arith.constant 2 : index
    %c0_279 = arith.constant 0 : index
    %c128_280 = arith.constant 128 : index
    %377 = vector.load %arg13[%c2_278, %c0_279, %c128_280] : memref<8x2x512xf32, #tpu.memory_space<vmem>>, vector<1x2x256xf32>
    %378 = vector.shape_cast %377 : vector<1x2x256xf32> to vector<2x256xf32>
    %379 = arith.truncf %378 : vector<2x256xf32> to vector<2x256xbf16>
    %cst_281 = arith.constant dense<0.000000e+00> : vector<2x64xf32>
    %380 = tpu.matmul %379, %265, %cst_281 {dimension_numbers = #tpu.dot_dimension_numbers<[1], [0], [0], [1], [0, 0, 1, 1], [], []>} : vector<2x256xbf16>, vector<256x64xbf16>, vector<2x64xf32> -> vector<2x64xf32>
    %c3_282 = arith.constant 3 : index
    %c0_283 = arith.constant 0 : index
    %c128_284 = arith.constant 128 : index
    %381 = vector.load %arg13[%c3_282, %c0_283, %c128_284] : memref<8x2x512xf32, #tpu.memory_space<vmem>>, vector<1x2x256xf32>
    %382 = vector.shape_cast %381 : vector<1x2x256xf32> to vector<2x256xf32>
    %383 = arith.truncf %382 : vector<2x256xf32> to vector<2x256xbf16>
    %cst_285 = arith.constant dense<0.000000e+00> : vector<2x64xf32>
    %384 = tpu.matmul %383, %267, %cst_285 {dimension_numbers = #tpu.dot_dimension_numbers<[1], [0], [0], [1], [0, 0, 1, 1], [], []>} : vector<2x256xbf16>, vector<256x64xbf16>, vector<2x64xf32> -> vector<2x64xf32>
    %385 = arith.addf %380, %384 : vector<2x64xf32>
    %c4_286 = arith.constant 4 : index
    %c0_287 = arith.constant 0 : index
    %c128_288 = arith.constant 128 : index
    %386 = vector.load %arg13[%c4_286, %c0_287, %c128_288] : memref<8x2x512xf32, #tpu.memory_space<vmem>>, vector<1x2x256xf32>
    %387 = vector.shape_cast %386 : vector<1x2x256xf32> to vector<2x256xf32>
    %388 = arith.truncf %387 : vector<2x256xf32> to vector<2x256xbf16>
    %cst_289 = arith.constant dense<0.000000e+00> : vector<2x64xf32>
    %389 = tpu.matmul %388, %269, %cst_289 {dimension_numbers = #tpu.dot_dimension_numbers<[1], [0], [0], [1], [0, 0, 1, 1], [], []>} : vector<2x256xbf16>, vector<256x64xbf16>, vector<2x64xf32> -> vector<2x64xf32>
    %390 = arith.addf %385, %389 : vector<2x64xf32>
    %c5_290 = arith.constant 5 : index
    %c0_291 = arith.constant 0 : index
    %c128_292 = arith.constant 128 : index
    %391 = vector.load %arg13[%c5_290, %c0_291, %c128_292] : memref<8x2x512xf32, #tpu.memory_space<vmem>>, vector<1x2x256xf32>
    %392 = vector.shape_cast %391 : vector<1x2x256xf32> to vector<2x256xf32>
    %393 = arith.truncf %392 : vector<2x256xf32> to vector<2x256xbf16>
    %cst_293 = arith.constant dense<0.000000e+00> : vector<2x64xf32>
    %394 = tpu.matmul %393, %271, %cst_293 {dimension_numbers = #tpu.dot_dimension_numbers<[1], [0], [0], [1], [0, 0, 1, 1], [], []>} : vector<2x256xbf16>, vector<256x64xbf16>, vector<2x64xf32> -> vector<2x64xf32>
    %395 = arith.addf %390, %394 : vector<2x64xf32>
    %396 = vector.broadcast %272 : vector<1x64xf32> to vector<2x64xf32>
    %397 = arith.addf %395, %396 : vector<2x64xf32>
    %cst_294 = arith.constant 0.000000e+00 : f32
    %398 = vector.broadcast %cst_294 : f32 to vector<2x64xf32>
    %399 = arith.maximumf %397, %398 : vector<2x64xf32>
    %c1_295 = arith.constant 1 : index
    %c0_296 = arith.constant 0 : index
    %c64_297 = arith.constant 64 : index
    %400 = vector.load %arg14[%c1_295, %c0_296, %c64_297] : memref<3x2x192xf32, #tpu.memory_space<vmem>>, vector<1x2x64xf32>
    %401 = vector.shape_cast %400 : vector<1x2x64xf32> to vector<2x64xf32>
    %402 = vector.shape_cast %399 : vector<2x64xf32> to vector<1x2x64xf32>
    tpu.vector_store %arg14[%c1_295, %c0_296, %c64_297], %402 {strides = array<i32>} : memref<3x2x192xf32, #tpu.memory_space<vmem>>, vector<1x2x64xf32>,
    %c2_298 = arith.constant 2 : index
    %c0_299 = arith.constant 0 : index
    %c256_300 = arith.constant 256 : index
    %403 = vector.load %arg13[%c2_298, %c0_299, %c256_300] : memref<8x2x512xf32, #tpu.memory_space<vmem>>, vector<1x2x256xf32>
    %404 = vector.shape_cast %403 : vector<1x2x256xf32> to vector<2x256xf32>
    %405 = arith.truncf %404 : vector<2x256xf32> to vector<2x256xbf16>
    %cst_301 = arith.constant dense<0.000000e+00> : vector<2x64xf32>
    %406 = tpu.matmul %405, %265, %cst_301 {dimension_numbers = #tpu.dot_dimension_numbers<[1], [0], [0], [1], [0, 0, 1, 1], [], []>} : vector<2x256xbf16>, vector<256x64xbf16>, vector<2x64xf32> -> vector<2x64xf32>
    %c3_302 = arith.constant 3 : index
    %c0_303 = arith.constant 0 : index
    %c256_304 = arith.constant 256 : index
    %407 = vector.load %arg13[%c3_302, %c0_303, %c256_304] : memref<8x2x512xf32, #tpu.memory_space<vmem>>, vector<1x2x256xf32>
    %408 = vector.shape_cast %407 : vector<1x2x256xf32> to vector<2x256xf32>
    %409 = arith.truncf %408 : vector<2x256xf32> to vector<2x256xbf16>
    %cst_305 = arith.constant dense<0.000000e+00> : vector<2x64xf32>
    %410 = tpu.matmul %409, %267, %cst_305 {dimension_numbers = #tpu.dot_dimension_numbers<[1], [0], [0], [1], [0, 0, 1, 1], [], []>} : vector<2x256xbf16>, vector<256x64xbf16>, vector<2x64xf32> -> vector<2x64xf32>
    %411 = arith.addf %406, %410 : vector<2x64xf32>
    %c4_306 = arith.constant 4 : index
    %c0_307 = arith.constant 0 : index
    %c256_308 = arith.constant 256 : index
    %412 = vector.load %arg13[%c4_306, %c0_307, %c256_308] : memref<8x2x512xf32, #tpu.memory_space<vmem>>, vector<1x2x256xf32>
    %413 = vector.shape_cast %412 : vector<1x2x256xf32> to vector<2x256xf32>
    %414 = arith.truncf %413 : vector<2x256xf32> to vector<2x256xbf16>
    %cst_309 = arith.constant dense<0.000000e+00> : vector<2x64xf32>
    %415 = tpu.matmul %414, %269, %cst_309 {dimension_numbers = #tpu.dot_dimension_numbers<[1], [0], [0], [1], [0, 0, 1, 1], [], []>} : vector<2x256xbf16>, vector<256x64xbf16>, vector<2x64xf32> -> vector<2x64xf32>
    %416 = arith.addf %411, %415 : vector<2x64xf32>
    %c5_310 = arith.constant 5 : index
    %c0_311 = arith.constant 0 : index
    %c256_312 = arith.constant 256 : index
    %417 = vector.load %arg13[%c5_310, %c0_311, %c256_312] : memref<8x2x512xf32, #tpu.memory_space<vmem>>, vector<1x2x256xf32>
    %418 = vector.shape_cast %417 : vector<1x2x256xf32> to vector<2x256xf32>
    %419 = arith.truncf %418 : vector<2x256xf32> to vector<2x256xbf16>
    %cst_313 = arith.constant dense<0.000000e+00> : vector<2x64xf32>
    %420 = tpu.matmul %419, %271, %cst_313 {dimension_numbers = #tpu.dot_dimension_numbers<[1], [0], [0], [1], [0, 0, 1, 1], [], []>} : vector<2x256xbf16>, vector<256x64xbf16>, vector<2x64xf32> -> vector<2x64xf32>
    %421 = arith.addf %416, %420 : vector<2x64xf32>
    %422 = vector.broadcast %272 : vector<1x64xf32> to vector<2x64xf32>
    %423 = arith.addf %421, %422 : vector<2x64xf32>
    %cst_314 = arith.constant 0.000000e+00 : f32
    %424 = vector.broadcast %cst_314 : f32 to vector<2x64xf32>
    %425 = arith.maximumf %423, %424 : vector<2x64xf32>
    %c1_315 = arith.constant 1 : index
    %c0_316 = arith.constant 0 : index
    %c128_317 = arith.constant 128 : index
    %426 = vector.load %arg14[%c1_315, %c0_316, %c128_317] : memref<3x2x192xf32, #tpu.memory_space<vmem>>, vector<1x2x64xf32>
    %427 = vector.shape_cast %426 : vector<1x2x64xf32> to vector<2x64xf32>
    %428 = vector.shape_cast %425 : vector<2x64xf32> to vector<1x2x64xf32>
    tpu.vector_store %arg14[%c1_315, %c0_316, %c128_317], %428 {strides = array<i32>} : memref<3x2x192xf32, #tpu.memory_space<vmem>>, vector<1x2x64xf32>,
    %c4_318 = arith.constant 4 : index
    %c0_319 = arith.constant 0 : index
    %c0_320 = arith.constant 0 : index
    %429 = vector.load %arg13[%c4_318, %c0_319, %c0_320] : memref<8x2x512xf32, #tpu.memory_space<vmem>>, vector<1x2x256xf32>
    %430 = vector.shape_cast %429 : vector<1x2x256xf32> to vector<2x256xf32>
    %431 = arith.truncf %430 : vector<2x256xf32> to vector<2x256xbf16>
    %cst_321 = arith.constant dense<0.000000e+00> : vector<2x64xf32>
    %432 = tpu.matmul %431, %265, %cst_321 {dimension_numbers = #tpu.dot_dimension_numbers<[1], [0], [0], [1], [0, 0, 1, 1], [], []>} : vector<2x256xbf16>, vector<256x64xbf16>, vector<2x64xf32> -> vector<2x64xf32>
    %c5_322 = arith.constant 5 : index
    %c0_323 = arith.constant 0 : index
    %c0_324 = arith.constant 0 : index
    %433 = vector.load %arg13[%c5_322, %c0_323, %c0_324] : memref<8x2x512xf32, #tpu.memory_space<vmem>>, vector<1x2x256xf32>
    %434 = vector.shape_cast %433 : vector<1x2x256xf32> to vector<2x256xf32>
    %435 = arith.truncf %434 : vector<2x256xf32> to vector<2x256xbf16>
    %cst_325 = arith.constant dense<0.000000e+00> : vector<2x64xf32>
    %436 = tpu.matmul %435, %267, %cst_325 {dimension_numbers = #tpu.dot_dimension_numbers<[1], [0], [0], [1], [0, 0, 1, 1], [], []>} : vector<2x256xbf16>, vector<256x64xbf16>, vector<2x64xf32> -> vector<2x64xf32>
    %437 = arith.addf %432, %436 : vector<2x64xf32>
    %c6_326 = arith.constant 6 : index
    %c0_327 = arith.constant 0 : index
    %c0_328 = arith.constant 0 : index
    %438 = vector.load %arg13[%c6_326, %c0_327, %c0_328] : memref<8x2x512xf32, #tpu.memory_space<vmem>>, vector<1x2x256xf32>
    %439 = vector.shape_cast %438 : vector<1x2x256xf32> to vector<2x256xf32>
    %440 = arith.truncf %439 : vector<2x256xf32> to vector<2x256xbf16>
    %cst_329 = arith.constant dense<0.000000e+00> : vector<2x64xf32>
    %441 = tpu.matmul %440, %269, %cst_329 {dimension_numbers = #tpu.dot_dimension_numbers<[1], [0], [0], [1], [0, 0, 1, 1], [], []>} : vector<2x256xbf16>, vector<256x64xbf16>, vector<2x64xf32> -> vector<2x64xf32>
    %442 = arith.addf %437, %441 : vector<2x64xf32>
    %c7_330 = arith.constant 7 : index
    %c0_331 = arith.constant 0 : index
    %c0_332 = arith.constant 0 : index
    %443 = vector.load %arg13[%c7_330, %c0_331, %c0_332] : memref<8x2x512xf32, #tpu.memory_space<vmem>>, vector<1x2x256xf32>
    %444 = vector.shape_cast %443 : vector<1x2x256xf32> to vector<2x256xf32>
    %445 = arith.truncf %444 : vector<2x256xf32> to vector<2x256xbf16>
    %cst_333 = arith.constant dense<0.000000e+00> : vector<2x64xf32>
    %446 = tpu.matmul %445, %271, %cst_333 {dimension_numbers = #tpu.dot_dimension_numbers<[1], [0], [0], [1], [0, 0, 1, 1], [], []>} : vector<2x256xbf16>, vector<256x64xbf16>, vector<2x64xf32> -> vector<2x64xf32>
    %447 = arith.addf %442, %446 : vector<2x64xf32>
    %448 = vector.broadcast %272 : vector<1x64xf32> to vector<2x64xf32>
    %449 = arith.addf %447, %448 : vector<2x64xf32>
    %cst_334 = arith.constant 0.000000e+00 : f32
    %450 = vector.broadcast %cst_334 : f32 to vector<2x64xf32>
    %451 = arith.maximumf %449, %450 : vector<2x64xf32>
    %c2_335 = arith.constant 2 : index
    %c0_336 = arith.constant 0 : index
    %c0_337 = arith.constant 0 : index
    %452 = vector.load %arg14[%c2_335, %c0_336, %c0_337] : memref<3x2x192xf32, #tpu.memory_space<vmem>>, vector<1x2x64xf32>
    %453 = vector.shape_cast %452 : vector<1x2x64xf32> to vector<2x64xf32>
    %454 = vector.shape_cast %451 : vector<2x64xf32> to vector<1x2x64xf32>
    tpu.vector_store %arg14[%c2_335, %c0_336, %c0_337], %454 {strides = array<i32>} : memref<3x2x192xf32, #tpu.memory_space<vmem>>, vector<1x2x64xf32>,
    %c4_338 = arith.constant 4 : index
    %c0_339 = arith.constant 0 : index
    %c128_340 = arith.constant 128 : index
    %455 = vector.load %arg13[%c4_338, %c0_339, %c128_340] : memref<8x2x512xf32, #tpu.memory_space<vmem>>, vector<1x2x256xf32>
    %456 = vector.shape_cast %455 : vector<1x2x256xf32> to vector<2x256xf32>
    %457 = arith.truncf %456 : vector<2x256xf32> to vector<2x256xbf16>
    %cst_341 = arith.constant dense<0.000000e+00> : vector<2x64xf32>
    %458 = tpu.matmul %457, %265, %cst_341 {dimension_numbers = #tpu.dot_dimension_numbers<[1], [0], [0], [1], [0, 0, 1, 1], [], []>} : vector<2x256xbf16>, vector<256x64xbf16>, vector<2x64xf32> -> vector<2x64xf32>
    %c5_342 = arith.constant 5 : index
    %c0_343 = arith.constant 0 : index
    %c128_344 = arith.constant 128 : index
    %459 = vector.load %arg13[%c5_342, %c0_343, %c128_344] : memref<8x2x512xf32, #tpu.memory_space<vmem>>, vector<1x2x256xf32>
    %460 = vector.shape_cast %459 : vector<1x2x256xf32> to vector<2x256xf32>
    %461 = arith.truncf %460 : vector<2x256xf32> to vector<2x256xbf16>
    %cst_345 = arith.constant dense<0.000000e+00> : vector<2x64xf32>
    %462 = tpu.matmul %461, %267, %cst_345 {dimension_numbers = #tpu.dot_dimension_numbers<[1], [0], [0], [1], [0, 0, 1, 1], [], []>} : vector<2x256xbf16>, vector<256x64xbf16>, vector<2x64xf32> -> vector<2x64xf32>
    %463 = arith.addf %458, %462 : vector<2x64xf32>
    %c6_346 = arith.constant 6 : index
    %c0_347 = arith.constant 0 : index
    %c128_348 = arith.constant 128 : index
    %464 = vector.load %arg13[%c6_346, %c0_347, %c128_348] : memref<8x2x512xf32, #tpu.memory_space<vmem>>, vector<1x2x256xf32>
    %465 = vector.shape_cast %464 : vector<1x2x256xf32> to vector<2x256xf32>
    %466 = arith.truncf %465 : vector<2x256xf32> to vector<2x256xbf16>
    %cst_349 = arith.constant dense<0.000000e+00> : vector<2x64xf32>
    %467 = tpu.matmul %466, %269, %cst_349 {dimension_numbers = #tpu.dot_dimension_numbers<[1], [0], [0], [1], [0, 0, 1, 1], [], []>} : vector<2x256xbf16>, vector<256x64xbf16>, vector<2x64xf32> -> vector<2x64xf32>
    %468 = arith.addf %463, %467 : vector<2x64xf32>
    %c7_350 = arith.constant 7 : index
    %c0_351 = arith.constant 0 : index
    %c128_352 = arith.constant 128 : index
    %469 = vector.load %arg13[%c7_350, %c0_351, %c128_352] : memref<8x2x512xf32, #tpu.memory_space<vmem>>, vector<1x2x256xf32>
    %470 = vector.shape_cast %469 : vector<1x2x256xf32> to vector<2x256xf32>
    %471 = arith.truncf %470 : vector<2x256xf32> to vector<2x256xbf16>
    %cst_353 = arith.constant dense<0.000000e+00> : vector<2x64xf32>
    %472 = tpu.matmul %471, %271, %cst_353 {dimension_numbers = #tpu.dot_dimension_numbers<[1], [0], [0], [1], [0, 0, 1, 1], [], []>} : vector<2x256xbf16>, vector<256x64xbf16>, vector<2x64xf32> -> vector<2x64xf32>
    %473 = arith.addf %468, %472 : vector<2x64xf32>
    %474 = vector.broadcast %272 : vector<1x64xf32> to vector<2x64xf32>
    %475 = arith.addf %473, %474 : vector<2x64xf32>
    %cst_354 = arith.constant 0.000000e+00 : f32
    %476 = vector.broadcast %cst_354 : f32 to vector<2x64xf32>
    %477 = arith.maximumf %475, %476 : vector<2x64xf32>
    %c2_355 = arith.constant 2 : index
    %c0_356 = arith.constant 0 : index
    %c64_357 = arith.constant 64 : index
    %478 = vector.load %arg14[%c2_355, %c0_356, %c64_357] : memref<3x2x192xf32, #tpu.memory_space<vmem>>, vector<1x2x64xf32>
    %479 = vector.shape_cast %478 : vector<1x2x64xf32> to vector<2x64xf32>
    %480 = vector.shape_cast %477 : vector<2x64xf32> to vector<1x2x64xf32>
    tpu.vector_store %arg14[%c2_355, %c0_356, %c64_357], %480 {strides = array<i32>} : memref<3x2x192xf32, #tpu.memory_space<vmem>>, vector<1x2x64xf32>,
    %c4_358 = arith.constant 4 : index
    %c0_359 = arith.constant 0 : index
    %c256_360 = arith.constant 256 : index
    %481 = vector.load %arg13[%c4_358, %c0_359, %c256_360] : memref<8x2x512xf32, #tpu.memory_space<vmem>>, vector<1x2x256xf32>
    %482 = vector.shape_cast %481 : vector<1x2x256xf32> to vector<2x256xf32>
    %483 = arith.truncf %482 : vector<2x256xf32> to vector<2x256xbf16>
    %cst_361 = arith.constant dense<0.000000e+00> : vector<2x64xf32>
    %484 = tpu.matmul %483, %265, %cst_361 {dimension_numbers = #tpu.dot_dimension_numbers<[1], [0], [0], [1], [0, 0, 1, 1], [], []>} : vector<2x256xbf16>, vector<256x64xbf16>, vector<2x64xf32> -> vector<2x64xf32>
    %c5_362 = arith.constant 5 : index
    %c0_363 = arith.constant 0 : index
    %c256_364 = arith.constant 256 : index
    %485 = vector.load %arg13[%c5_362, %c0_363, %c256_364] : memref<8x2x512xf32, #tpu.memory_space<vmem>>, vector<1x2x256xf32>
    %486 = vector.shape_cast %485 : vector<1x2x256xf32> to vector<2x256xf32>
    %487 = arith.truncf %486 : vector<2x256xf32> to vector<2x256xbf16>
    %cst_365 = arith.constant dense<0.000000e+00> : vector<2x64xf32>
    %488 = tpu.matmul %487, %267, %cst_365 {dimension_numbers = #tpu.dot_dimension_numbers<[1], [0], [0], [1], [0, 0, 1, 1], [], []>} : vector<2x256xbf16>, vector<256x64xbf16>, vector<2x64xf32> -> vector<2x64xf32>
    %489 = arith.addf %484, %488 : vector<2x64xf32>
    %c6_366 = arith.constant 6 : index
    %c0_367 = arith.constant 0 : index
    %c256_368 = arith.constant 256 : index
    %490 = vector.load %arg13[%c6_366, %c0_367, %c256_368] : memref<8x2x512xf32, #tpu.memory_space<vmem>>, vector<1x2x256xf32>
    %491 = vector.shape_cast %490 : vector<1x2x256xf32> to vector<2x256xf32>
    %492 = arith.truncf %491 : vector<2x256xf32> to vector<2x256xbf16>
    %cst_369 = arith.constant dense<0.000000e+00> : vector<2x64xf32>
    %493 = tpu.matmul %492, %269, %cst_369 {dimension_numbers = #tpu.dot_dimension_numbers<[1], [0], [0], [1], [0, 0, 1, 1], [], []>} : vector<2x256xbf16>, vector<256x64xbf16>, vector<2x64xf32> -> vector<2x64xf32>
    %494 = arith.addf %489, %493 : vector<2x64xf32>
    %c7_370 = arith.constant 7 : index
    %c0_371 = arith.constant 0 : index
    %c256_372 = arith.constant 256 : index
    %495 = vector.load %arg13[%c7_370, %c0_371, %c256_372] : memref<8x2x512xf32, #tpu.memory_space<vmem>>, vector<1x2x256xf32>
    %496 = vector.shape_cast %495 : vector<1x2x256xf32> to vector<2x256xf32>
    %497 = arith.truncf %496 : vector<2x256xf32> to vector<2x256xbf16>
    %cst_373 = arith.constant dense<0.000000e+00> : vector<2x64xf32>
    %498 = tpu.matmul %497, %271, %cst_373 {dimension_numbers = #tpu.dot_dimension_numbers<[1], [0], [0], [1], [0, 0, 1, 1], [], []>} : vector<2x256xbf16>, vector<256x64xbf16>, vector<2x64xf32> -> vector<2x64xf32>
    %499 = arith.addf %494, %498 : vector<2x64xf32>
    %500 = vector.broadcast %272 : vector<1x64xf32> to vector<2x64xf32>
    %501 = arith.addf %499, %500 : vector<2x64xf32>
    %cst_374 = arith.constant 0.000000e+00 : f32
    %502 = vector.broadcast %cst_374 : f32 to vector<2x64xf32>
    %503 = arith.maximumf %501, %502 : vector<2x64xf32>
    %c2_375 = arith.constant 2 : index
    %c0_376 = arith.constant 0 : index
    %c128_377 = arith.constant 128 : index
    %504 = vector.load %arg14[%c2_375, %c0_376, %c128_377] : memref<3x2x192xf32, #tpu.memory_space<vmem>>, vector<1x2x64xf32>
    %505 = vector.shape_cast %504 : vector<1x2x64xf32> to vector<2x64xf32>
    %506 = vector.shape_cast %503 : vector<2x64xf32> to vector<1x2x64xf32>
    tpu.vector_store %arg14[%c2_375, %c0_376, %c128_377], %506 {strides = array<i32>} : memref<3x2x192xf32, #tpu.memory_space<vmem>>, vector<1x2x64xf32>,
    %c0_378 = arith.constant 0 : index
    %c0_379 = arith.constant 0 : index
    %c0_380 = arith.constant 0 : index
    %507 = vector.load %arg6[%c0_378, %c0_379, %c0_380] : memref<3x192x64xbf16, #tpu.memory_space<vmem>>, vector<1x192x64xbf16>
    %508 = vector.shape_cast %507 : vector<1x192x64xbf16> to vector<192x64xbf16>
    %c1_381 = arith.constant 1 : index
    %c0_382 = arith.constant 0 : index
    %c0_383 = arith.constant 0 : index
    %509 = vector.load %arg6[%c1_381, %c0_382, %c0_383] : memref<3x192x64xbf16, #tpu.memory_space<vmem>>, vector<1x192x64xbf16>
    %510 = vector.shape_cast %509 : vector<1x192x64xbf16> to vector<192x64xbf16>
    %c2_384 = arith.constant 2 : index
    %c0_385 = arith.constant 0 : index
    %c0_386 = arith.constant 0 : index
    %511 = vector.load %arg6[%c2_384, %c0_385, %c0_386] : memref<3x192x64xbf16, #tpu.memory_space<vmem>>, vector<1x192x64xbf16>
    %512 = vector.shape_cast %511 : vector<1x192x64xbf16> to vector<192x64xbf16>
    %c0_387 = arith.constant 0 : index
    %c0_388 = arith.constant 0 : index
    %513 = vector.load %arg7[%c0_387, %c0_388] : memref<1x64xf32, #tpu.memory_space<vmem>>, vector<1x64xf32>
    %c0_389 = arith.constant 0 : index
    %c0_390 = arith.constant 0 : index
    %c0_391 = arith.constant 0 : index
    %514 = vector.load %arg14[%c0_389, %c0_390, %c0_391] : memref<3x2x192xf32, #tpu.memory_space<vmem>>, vector<1x2x192xf32>
    %515 = vector.shape_cast %514 : vector<1x2x192xf32> to vector<2x192xf32>
    %516 = arith.truncf %515 : vector<2x192xf32> to vector<2x192xbf16>
    %cst_392 = arith.constant dense<0.000000e+00> : vector<2x64xf32>
    %517 = tpu.matmul %516, %508, %cst_392 {dimension_numbers = #tpu.dot_dimension_numbers<[1], [0], [0], [1], [0, 0, 1, 1], [], []>} : vector<2x192xbf16>, vector<192x64xbf16>, vector<2x64xf32> -> vector<2x64xf32>
    %c1_393 = arith.constant 1 : index
    %c0_394 = arith.constant 0 : index
    %c0_395 = arith.constant 0 : index
    %518 = vector.load %arg14[%c1_393, %c0_394, %c0_395] : memref<3x2x192xf32, #tpu.memory_space<vmem>>, vector<1x2x192xf32>
    %519 = vector.shape_cast %518 : vector<1x2x192xf32> to vector<2x192xf32>
    %520 = arith.truncf %519 : vector<2x192xf32> to vector<2x192xbf16>
    %cst_396 = arith.constant dense<0.000000e+00> : vector<2x64xf32>
    %521 = tpu.matmul %520, %510, %cst_396 {dimension_numbers = #tpu.dot_dimension_numbers<[1], [0], [0], [1], [0, 0, 1, 1], [], []>} : vector<2x192xbf16>, vector<192x64xbf16>, vector<2x64xf32> -> vector<2x64xf32>
    %522 = arith.addf %517, %521 : vector<2x64xf32>
    %c2_397 = arith.constant 2 : index
    %c0_398 = arith.constant 0 : index
    %c0_399 = arith.constant 0 : index
    %523 = vector.load %arg14[%c2_397, %c0_398, %c0_399] : memref<3x2x192xf32, #tpu.memory_space<vmem>>, vector<1x2x192xf32>
    %524 = vector.shape_cast %523 : vector<1x2x192xf32> to vector<2x192xf32>
    %525 = arith.truncf %524 : vector<2x192xf32> to vector<2x192xbf16>
    %cst_400 = arith.constant dense<0.000000e+00> : vector<2x64xf32>
    %526 = tpu.matmul %525, %512, %cst_400 {dimension_numbers = #tpu.dot_dimension_numbers<[1], [0], [0], [1], [0, 0, 1, 1], [], []>} : vector<2x192xbf16>, vector<192x64xbf16>, vector<2x64xf32> -> vector<2x64xf32>
    %527 = arith.addf %522, %526 : vector<2x64xf32>
    %528 = vector.broadcast %513 : vector<1x64xf32> to vector<2x64xf32>
    %529 = arith.addf %527, %528 : vector<2x64xf32>
    %cst_401 = arith.constant 0.000000e+00 : f32
    %530 = vector.broadcast %cst_401 : f32 to vector<2x64xf32>
    %531 = arith.maximumf %529, %530 : vector<2x64xf32>
    %c0_402 = arith.constant 0 : index
    %c0_403 = arith.constant 0 : index
    %c0_404 = arith.constant 0 : index
    %532 = vector.load %arg15[%c0_402, %c0_403, %c0_404] : memref<1x2x64xf32, #tpu.memory_space<vmem>>, vector<1x2x64xf32>
    %533 = vector.shape_cast %532 : vector<1x2x64xf32> to vector<2x64xf32>
    %534 = vector.shape_cast %531 : vector<2x64xf32> to vector<1x2x64xf32>
    tpu.vector_store %arg15[%c0_402, %c0_403, %c0_404], %534 {strides = array<i32>} : memref<1x2x64xf32, #tpu.memory_space<vmem>>, vector<1x2x64xf32>,
    %c0_405 = arith.constant 0 : index
    %c0_406 = arith.constant 0 : index
    %c0_407 = arith.constant 0 : index
    %535 = vector.load %arg15[%c0_405, %c0_406, %c0_407] : memref<1x2x64xf32, #tpu.memory_space<vmem>>, vector<1x2x64xf32>
    %536 = vector.shape_cast %535 : vector<1x2x64xf32> to vector<2x64xf32>
    %537 = arith.truncf %536 : vector<2x64xf32> to vector<2x64xbf16>
    %c0_408 = arith.constant 0 : index
    %c0_409 = arith.constant 0 : index
    %538 = vector.load %arg8[%c0_408, %c0_409] : memref<64x512xbf16, #tpu.memory_space<vmem>>, vector<64x512xbf16>
    %cst_410 = arith.constant dense<0.000000e+00> : vector<2x512xf32>
    %539 = tpu.matmul %537, %538, %cst_410 {dimension_numbers = #tpu.dot_dimension_numbers<[1], [0], [0], [1], [0, 0, 1, 1], [], []>} : vector<2x64xbf16>, vector<64x512xbf16>, vector<2x512xf32> -> vector<2x512xf32>
    %c0_411 = arith.constant 0 : index
    %c0_412 = arith.constant 0 : index
    %540 = vector.load %arg9[%c0_411, %c0_412] : memref<1x512xf32, #tpu.memory_space<vmem>>, vector<1x512xf32>
    %541 = vector.broadcast %540 : vector<1x512xf32> to vector<2x512xf32>
    %542 = arith.addf %539, %541 : vector<2x512xf32>
    %cst_413 = arith.constant 0.000000e+00 : f32
    %543 = vector.broadcast %cst_413 : f32 to vector<2x512xf32>
    %544 = arith.maximumf %542, %543 : vector<2x512xf32>
    %545 = arith.truncf %544 : vector<2x512xf32> to vector<2x512xbf16>
    %c0_414 = arith.constant 0 : index
    %c0_415 = arith.constant 0 : index
    %546 = vector.load %arg10[%c0_414, %c0_415] : memref<512x128xbf16, #tpu.memory_space<vmem>>, vector<512x128xbf16>
    %cst_416 = arith.constant dense<0.000000e+00> : vector<2x128xf32>
    %547 = tpu.matmul %545, %546, %cst_416 {dimension_numbers = #tpu.dot_dimension_numbers<[1], [0], [0], [1], [0, 0, 1, 1], [], []>} : vector<2x512xbf16>, vector<512x128xbf16>, vector<2x128xf32> -> vector<2x128xf32>
    %c0_417 = arith.constant 0 : index
    %c0_418 = arith.constant 0 : index
    %548 = vector.load %arg11[%c0_417, %c0_418] : memref<1x128xf32, #tpu.memory_space<vmem>>, vector<1x128xf32>
    %549 = vector.broadcast %548 : vector<1x128xf32> to vector<2x128xf32>
    %550 = arith.addf %547, %549 : vector<2x128xf32>
    %c0_419 = arith.constant 0 : index
    %c0_420 = arith.constant 0 : index
    %551 = vector.load %arg12[%c0_419, %c0_420] : memref<2x128xf32, #tpu.memory_space<vmem>>, vector<2x128xf32>
    tpu.vector_store %arg12[%c0_419, %c0_420], %550 {strides = array<i32>} : memref<2x128xf32, #tpu.memory_space<vmem>>, vector<2x128xf32>,
    return
  }
  func.func @transform_0(%arg0: i32) -> (i32, i32) {
    %c0_i32 = arith.constant 0 : i32
    %c0_i32_0 = arith.constant 0 : i32
    %c0_i32_1 = arith.constant 0 : i32
    return %c0_i32, %c0_i32_0 : i32, i32
  }
  func.func @transform_1(%arg0: i32) -> (i32, i32) {
    %c0_i32 = arith.constant 0 : i32
    %c0_i32_0 = arith.constant 0 : i32
    %c0_i32_1 = arith.constant 0 : i32
    return %c0_i32, %c0_i32_0 : i32, i32
  }
  func.func @transform_2(%arg0: i32) -> (i32, i32) {
    %c0_i32 = arith.constant 0 : i32
    %c0_i32_0 = arith.constant 0 : i32
    %c0_i32_1 = arith.constant 0 : i32
    return %c0_i32, %c0_i32_0 : i32, i32
  }
  func.func @transform_3(%arg0: i32) -> (i32, i32, i32) {
    %c0_i32 = arith.constant 0 : i32
    %c0_i32_0 = arith.constant 0 : i32
    %c0_i32_1 = arith.constant 0 : i32
    %c0_i32_2 = arith.constant 0 : i32
    return %c0_i32, %c0_i32_0, %c0_i32_1 : i32, i32, i32
  }
  func.func @transform_4(%arg0: i32) -> (i32, i32) {
    %c0_i32 = arith.constant 0 : i32
    %c0_i32_0 = arith.constant 0 : i32
    %c0_i32_1 = arith.constant 0 : i32
    return %c0_i32, %c0_i32_0 : i32, i32
  }
  func.func @transform_5(%arg0: i32) -> (i32, i32, i32) {
    %c0_i32 = arith.constant 0 : i32
    %c0_i32_0 = arith.constant 0 : i32
    %c0_i32_1 = arith.constant 0 : i32
    %c0_i32_2 = arith.constant 0 : i32
    return %c0_i32, %c0_i32_0, %c0_i32_1 : i32, i32, i32
  }
  func.func @transform_6(%arg0: i32) -> (i32, i32) {
    %c0_i32 = arith.constant 0 : i32
    %c0_i32_0 = arith.constant 0 : i32
    %c0_i32_1 = arith.constant 0 : i32
    return %c0_i32, %c0_i32_0 : i32, i32
  }
  func.func @transform_7(%arg0: i32) -> (i32, i32) {
    %c0_i32 = arith.constant 0 : i32
    %c0_i32_0 = arith.constant 0 : i32
    %c0_i32_1 = arith.constant 0 : i32
    return %c0_i32, %c0_i32_0 : i32, i32
  }
  func.func @transform_8(%arg0: i32) -> (i32, i32) {
    %c0_i32 = arith.constant 0 : i32
    %c0_i32_0 = arith.constant 0 : i32
    %c0_i32_1 = arith.constant 0 : i32
    return %c0_i32, %c0_i32_0 : i32, i32
  }
  func.func @transform_9(%arg0: i32) -> (i32, i32) {
    %c0_i32 = arith.constant 0 : i32
    %c0_i32_0 = arith.constant 0 : i32
    %c0_i32_1 = arith.constant 0 : i32
    return %c0_i32, %c0_i32_0 : i32, i32
  }
  func.func @transform_10(%arg0: i32) -> (i32, i32) {
    %c0_i32 = arith.constant 0 : i32
    %c0_i32_0 = arith.constant 0 : i32
    %c0_i32_1 = arith.constant 0 : i32
    return %c0_i32, %c0_i32_0 : i32, i32
  }
  func.func @transform_11(%arg0: i32) -> (i32, i32) {
    %c0_i32 = arith.constant 0 : i32
    %c0_i32_0 = arith.constant 0 : i32
    %c0_i32_1 = arith.constant 0 : i32
    return %c0_i32, %c0_i32_0 : i32, i32
  }
}

</mosaic_0001>

<bundles_post_ra>
// kernel: dqn_cnn_forward.1
= control target key start
LH: loop header
LB: loop body
LE: loop exit
PB: predicated region body
PF: predicated region fallthrough
CT: control target
= control target key end

     0   :  { %s8173_s0 = inlined_call_operand.vmem [shape: bf16[128,256], index: 0, kind: input, shape index: {}]   ;;  %s8174_s1 = inlined_call_operand.vmem [shape: bf16[256,64], index: 1, kind: input, shape index: {}]   ;;  %s8175_s2 = inlined_call_operand.vmem [shape: f32[1,64], index: 2, kind: input, shape index: {}]   ;;  %s8176_s3 = inlined_call_operand.vmem [shape: bf16[4,256,64], index: 3, kind: input, shape index: {}]   ;;  %s8177_s4 = inlined_call_operand.vmem [shape: f32[1,64], index: 4, kind: input, shape index: {}]   ;;  %s8178_s5 = inlined_call_operand.vmem [shape: bf16[3,192,64], index: 5, kind: input, shape index: {}]   ;;  %s8179_s6 = inlined_call_operand.vmem [shape: f32[1,64], index: 6, kind: input, shape index: {}]   ;;  %s8180_s7 = inlined_call_operand.vmem [shape: bf16[64,512], index: 7, kind: input, shape index: {}]   ;;  %s8181_s8 = inlined_call_operand.vmem [shape: f32[1,512], index: 8, kind: input, shape index: {}]   ;;  %s8182_s9 = inlined_call_operand.vmem [shape: bf16[512,128], index: 9, kind: input, shape index: {}]   ;;  %s8183_s10 = inlined_call_operand.vmem [shape: f32[1,128], index: 10, kind: input, shape index: {}]   ;;  %s8184_s11 = inlined_call_operand.hbm [shape: f32[2,128], index: 11, kind: output, shape index: {}]  }
   0x1   :  { %v5731_v0 = vld [vmem:[%s8174_s1 + $0x40] sm:$0xff]   ;;  %v5733_v2 = vld [vmem:[%s8174_s1 + $0x48] sm:$0xff]   ;;  %v5735_v4 = vld [vmem:[%s8174_s1 + $0x50] sm:$0xff]  }
   0x2   :  { %v5732_v1 = vld [vmem:[%s8174_s1] sm:$0xff]   ;;  %4827 = vmatprep.subr.bf16.mxu0 %v5731_v0  ;;  %v5734_v3 = vld [vmem:[%s8174_s1 + $0x8] sm:$0xff]   ;;  %v5736_v5 = vld [vmem:[%s8174_s1 + $0x10] sm:$0xff]  }
   0x3   :  { %4828 = vmatpush3.bf16.msra.mxu0 %v5732_v1  ;;  %v5737_v6 = vld [vmem:[%s8174_s1 + $0x58] sm:$0xff]   ;;  %v5739_v8 = vld [vmem:[%s8174_s1 + $0x60] sm:$0xff]   ;;  %v5741_v10 = vld [vmem:[%s8174_s1 + $0x68] sm:$0xff]  }
   0x4   :  { %4829 = vmatprep.subr.bf16.mxu0 %v5733_v2  ;;  %v5738_v7 = vld [vmem:[%s8174_s1 + $0x18] sm:$0xff]   ;;  %v5740_v9 = vld [vmem:[%s8174_s1 + $0x20] sm:$0xff]   ;;  %v5742_v12 = vld [vmem:[%s8174_s1 + $0x28] sm:$0xff]  }
   0x5   :  { %v5749_v11 = vld [vmem:[%s8173_s0 + $0x4] ss:$8 sps:$4 sm:$0xff]   ;;  %v5743_v13 = vld [vmem:[%s8174_s1 + $0x70] sm:$0xff]   ;;  %v5745_v15 = vld [vmem:[%s8174_s1 + $0x78] sm:$0xff]  }
   0x6   :  { %303 = vmatprep.mubr.bf16.mxu0 %v5749_v11  ;;  %v5744_v14 = vld [vmem:[%s8174_s1 + $0x30] sm:$0xff]   ;;  %v5746_v16 = vld [vmem:[%s8174_s1 + $0x38] sm:$0xff]   ;;  %v5747_v17 = vld [vmem:[%s8173_s0] ss:$8 sps:$4 sm:$0xff]  }
   0x7   :  { %4830 = vmatpush3.bf16.msra.mxu0 %v5734_v3  ;;  %v5750_v18 = vld [vmem:[%s8173_s0 + $0x14] ss:$8 sps:$4 sm:$0xff]   ;;  %v5752_v19 = vld [vmem:[%s8173_s0 + $0x10] ss:$8 sps:$4 sm:$0xff]   ;;  %v5753_v20 = vld [vmem:[%s8173_s0 + $0x24] ss:$8 sps:$4 sm:$0xff]  }
   0x8   :  { %4831 = vmatprep.subr.bf16.mxu0 %v5735_v4  ;;  %v5755_v21 = vld [vmem:[%s8173_s0 + $0x20] ss:$8 sps:$4 sm:$0xff]   ;;  %v5756_v22 = vld [vmem:[%s8173_s0 + $0x34] ss:$8 sps:$4 sm:$0xff]   ;;  %v5758_v23 = vld [vmem:[%s8173_s0 + $0x30] ss:$8 sps:$4 sm:$0xff]  }
   0x9   :  { %v5759_v24 = vld [vmem:[%s8173_s0 + $0x44] ss:$8 sps:$4 sm:$0xff]   ;;  %v5761_v25 = vld [vmem:[%s8173_s0 + $0x40] ss:$8 sps:$4 sm:$0xff]   ;;  %v5762_v26 = vld [vmem:[%s8173_s0 + $0x54] ss:$8 sps:$4 sm:$0xff]  }
   0xa   :  { %v5764_v27 = vld [vmem:[%s8173_s0 + $0x50] ss:$8 sps:$4 sm:$0xff]   ;;  %v5765_v28 = vld [vmem:[%s8173_s0 + $0x64] ss:$8 sps:$4 sm:$0xff]   ;;  %v5767_v29 = vld [vmem:[%s8173_s0 + $0x60] ss:$8 sps:$4 sm:$0xff]  }
   0xb   :  { %4832 = vmatpush3.bf16.msra.mxu0 %v5736_v5  ;;  %v5768_v30 = vld [vmem:[%s8173_s0 + $0x74] ss:$8 sps:$4 sm:$0xff]   ;;  %v5770_v31 = vld [vmem:[%s8173_s0 + $0x70] ss:$8 sps:$4 sm:$0xff]  }
   0xc   :  { %4833 = vmatprep.subr.bf16.mxu0 %v5737_v6 }
   0xf   :  { %4834 = vmatpush3.bf16.msra.mxu0 %v5738_v7 }
  0x10   :  { %4835 = vmatprep.subr.bf16.mxu0 %v5739_v8 }
  0x13   :  { %4836 = vmatpush3.bf16.msra.mxu0 %v5740_v9 }
  0x14   :  { %4837 = vmatprep.subr.bf16.mxu0 %v5741_v10 }
  0x17   :  { %4838 = vmatpush3.bf16.msra.mxu0 %v5742_v12 }
  0x18   :  { %4839 = vmatprep.subr.bf16.mxu0 %v5743_v13 }
  0x1b   :  { %4840 = vmatpush3.bf16.msra.mxu0 %v5744_v14 }
  0x1c   :  { %4841 = vmatprep.subr.bf16.mxu0 %v5745_v15 }
  0x1f   :  { %4842 = vmatpush3.bf16.msra.mxu0 %v5746_v16 }
  0x22   :  { %304 = vmatmul.mubr.bf16.vlgmr.msra.gmra.mrb[0].mxu0 %v5747_v17 }
  0x23   :  { %311 = vmatprep.mubr.bf16.mxu0 %v5750_v18 }
  0x2a   :  { %312 = vmatmul.mubr.bf16.gmra.mrb[4].mxu0 %v5752_v19 }
  0x2b   :  { %319 = vmatprep.mubr.bf16.mxu0 %v5753_v20 }
  0x32   :  { %320 = vmatmul.mubr.bf16.gmra.mrb[8].mxu0 %v5755_v21 }
  0x33   :  { %327 = vmatprep.mubr.bf16.mxu0 %v5756_v22 }
  0x3a   :  { %328 = vmatmul.mubr.bf16.gmra.mrb[12].mxu0 %v5758_v23 }
  0x3b   :  { %335 = vmatprep.mubr.bf16.mxu0 %v5759_v24 }
  0x42   :  { %336 = vmatmul.mubr.bf16.gmra.mrb[16].mxu0 %v5761_v25 }
  0x43   :  { %343 = vmatprep.mubr.bf16.mxu0 %v5762_v26 }
  0x4a   :  { %344 = vmatmul.mubr.bf16.gmra.mrb[20].mxu0 %v5764_v27 }
  0x4b   :  { %351 = vmatprep.mubr.bf16.mxu0 %v5765_v28 }
  0x52   :  { %352 = vmatmul.mubr.bf16.gmra.mrb[24].mxu0 %v5767_v29 }
  0x53   :  { %359 = vmatprep.mubr.bf16.mxu0 %v5768_v30 }
  0x5a   :  { %360 = vmatmul.mubr.bf16.gmra.mrb[28].mxu0 %v5770_v31 }
  0x5b   :  { %16 = vsyncpa [#allocation6], 0  ;;  %v6194_v32 = vld [vmem:[%s8176_s3 + $0xc0] sm:$0xff]   ;;  %v6031_v34 = vmov 1983009808   ;;  %v390_v36 = vlaneseq  ;;  %vm384_vm0 = vcmask 517120  }
  0x5c   :  { %v6199_v33 = vld [vmem:[%s8176_s3 + $0x80] sm:$0xff]   ;;  %4891 = vmatprep.subr.bf16.mxu1 %v6194_v32  ;;  %v388_v35 = vunpack.c.l.s4 %v6031_v34  ;;  %v6218_v50 = vld [vmem:[%s8176_s3 + $0xc8] sm:$0xff]   ;;  %v6238_v54 = vld [vmem:[%s8176_s3 + $0xd0] sm:$0xff]   ;;  %s6032_s17 = smov 64   ;;  %vm453_vm1 = vcmask 1041920   ;;  %vm3586_vm2 = vcmask 523264  }
  0x5d   :  { %4892 = vmatpush3.bf16.msra.mxu1 %v6199_v33  ;;  %v6203_v39 = vshrl.u32 %v390_v36, 7  ;;  %v6208_v40 = vld [vmem:[%s8175_s2] ss:$0 sm:$0xff]  ;;  %v6228_v52 = vld [vmem:[%s8176_s3 + $0x88] sm:$0xff]   ;;  %v6254_v61 = vld [vmem:[%s8176_s3 + $0x90] sm:$0xff]   ;;  %s6034_s19 = smov [#allocation5]  }
  0x5e   :  { %v389_v38 = vunpack.c.0.s8 %v388_v35  ;;  %v6223_v51 = vld [vmem:[%s8176_s3 + $0x140] sm:$0xff]   ;;  %4893 = vmatprep.subr.bf16.mxu1 %v6218_v50  ;;  %v6247_v59 = vld [vmem:[%s8176_s3 + $0x148] sm:$0xff]   ;;  %v6267_v3 = vld [vmem:[%s8176_s3 + $0xd8] sm:$0xff]  }
  0x5f   :  { %8255 = vst [vmem:[#allocation8_spill] sm:$0xff] %v6203_v39  ;;  %v6233_v53 = vld [vmem:[%s8176_s3 + $0x100] sm:$0xff]   ;;  %4935 = vmatprep.subr.bf16.mxu0 %v6223_v51  ;;  %v6259_v62 = vld [vmem:[%s8176_s3 + $0x108] sm:$0xff]   ;;  %v6272_v4 = vld [vmem:[%s8176_s3 + $0x150] sm:$0xff]  }
  0x60   :  { %v6212_v47 = vsub.s32 %v389_v38, %v6203_v39  ;;  %4936 = vmatpush3.bf16.msra.mxu0 %v6233_v53  ;;  %v6284_v11 = vld [vmem:[%s8176_s3 + $0x98] sm:$0xff]   ;;  %v6289_v12 = vld [vmem:[%s8176_s3 + $0x110] sm:$0xff]   ;;  %v6303_v18 = vld [vmem:[%s8176_s3 + $0xe0] sm:$0xff]  }
  0x61   :  { %4894 = vmatpush3.bf16.msra.mxu1 %v6228_v52  ;;  %4937 = vmatprep.subr.bf16.mxu0 %v6247_v59  ;;  %v6308_v19 = vld [vmem:[%s8176_s3 + $0x158] sm:$0xff]   ;;  %v6320_v23 = vld [vmem:[%s8176_s3 + $0xa0] sm:$0xff]   ;;  %v6338_v35 = vld [vmem:[%s8176_s3 + $0xe8] sm:$0xff]  }
  0x62   :  { %8256 = vst [vmem:[#allocation9_spill] sm:$0xff] %v6212_v47  ;;  %4895 = vmatprep.subr.bf16.mxu1 %v6238_v54  ;;  %v6325_v24 = vld [vmem:[%s8176_s3 + $0x118] sm:$0xff]   ;;  %v6343_v36 = vld [vmem:[%s8176_s3 + $0x160] sm:$0xff]  }
  0x63   :  { %v6353_v38 = vld [vmem:[%s8176_s3 + $0x120] sm:$0xff]  }
  0x64   :  { %4938 = vmatpush3.bf16.msra.mxu0 %v6259_v62  ;;  %8257 = vst [vmem:[#allocation10_spill] sm:$0xff] %v6353_v38 }
  0x65   :  { %4896 = vmatpush3.bf16.msra.mxu1 %v6254_v61  ;;  %4939 = vmatprep.subr.bf16.mxu0 %v6272_v4 }
  0x66   :  { %4897 = vmatprep.subr.bf16.mxu1 %v6267_v3 }
  0x68   :  { %4940 = vmatpush3.bf16.msra.mxu0 %v6289_v12 }
  0x69   :  { %4898 = vmatpush3.bf16.msra.mxu1 %v6284_v11  ;;  %4941 = vmatprep.subr.bf16.mxu0 %v6308_v19 }
  0x6a   :  { %4899 = vmatprep.subr.bf16.mxu1 %v6303_v18 }
  0x6c   :  { %4942 = vmatpush3.bf16.msra.mxu0 %v6325_v24 }
  0x6d   :  { %4900 = vmatpush3.bf16.msra.mxu1 %v6320_v23  ;;  %4943 = vmatprep.subr.bf16.mxu0 %v6343_v36 }
  0x6e   :  { %4901 = vmatprep.subr.bf16.mxu1 %v6338_v35 }
  0x70   :  { %4944 = vmatpush3.bf16.msra.mxu0 %v6353_v38 }
  0xf5   :  { %v4843_v37 = vpop.f32.mrb[0].mxu0 }
  0xf6   :  { %v4844_v41 = vpop.f32.mrb[1].mxu0 }
  0xf7   :  { %v4845_v42 = vadd.f32 %v4844_v41, %v4843_v37  ;;  %v4846_v43 = vpop.f32.mrb[2].mxu0  ;;  %v6348_v37 = vld [vmem:[%s8176_s3 + $0xa8] sm:$0xff]  }
  0xf8   :  { %v4847_v44 = vpop.f32.mrb[3].mxu0  ;;  %4902 = vmatpush3.bf16.msra.mxu1 %v6348_v37 }
  0xf9   :  { %v306_v45 = vadd.f32 %v4845_v42, %v6208_v40  ;;  %v4848_v46 = vadd.f32 %v4847_v44, %v4846_v43 }
  0xfb   :  { %v368_v48 = vmax.f32 %v306_v45, 0.0  ;;  %v309_v49 = vadd.f32 %v4848_v46, %v6208_v40 }
  0xfd   :  { %v398_v55 = vcombine.high %v368_v48, %v368_v48  ;;  %v369_v56 = vmax.f32 %v309_v49, 0.0  ;;  %v4849_v57 = vpop.f32.mrb[4].mxu0  ;;  %385 = vst.msk [vmem:[#allocation2] sm:$0x3] %vm384_vm0, %v368_v48  ;;  %v393_v58 = vrot.slane %v368_v48, %v6212_v47 }
  0xfe   :  { %v4850_v60 = vpop.f32.mrb[5].mxu0 }
  0xff   :  { %v427_v63 = vcombine.high %v369_v56, %v369_v56  ;;  %v4851_v0 = vadd.f32 %v4850_v60, %v4849_v57  ;;  %v4852_v1 = vpop.f32.mrb[6].mxu0  ;;  %414 = vst.msk [vmem:[#allocation2 + $0x20] sm:$0x3] %vm384_vm0, %v369_v56  ;;  %v394_v2 = vcombine.high %v393_v58, %v393_v58  ;;  %v405_v6 = vrot.slane %v398_v55, %v6212_v47  ;;  %v6366_v57 = vld [vmem:[%s8176_s3 + $0xf0] sm:$0xff]   ;;  %v6371_v58 = vld [vmem:[%s8176_s3 + $0x168] sm:$0xff]  }
 0x100   :  { %v4853_v5 = vpop.f32.mrb[7].mxu0  ;;  %v422_v7 = vrot.slane %v369_v56, %v6212_v47  ;;  %4903 = vmatprep.subr.bf16.mxu1 %v6366_v57  ;;  %4945 = vmatprep.subr.bf16.mxu0 %v6371_v58 }
 0x101   :  { %v314_v8 = vadd.f32 %v4851_v0, %v6208_v40  ;;  %v4854_v9 = vadd.f32 %v4853_v5, %v4852_v1  ;;  %397 = vst.msk [vmem:[#allocation2 + $0x8] sm:$0x3] %vm384_vm0, %v394_v2  ;;  %v434_v10 = vrot.slane %v427_v63, %v6212_v47  ;;  %408 = vst.msk [vmem:[#allocation2 + $0x10] sm:$0x3] %vm384_vm0, %v405_v6  ;;  %v6376_v63 = vld [vmem:[%s8176_s3 + $0xb0] sm:$0xff]   ;;  %v6381_v0 = vld [vmem:[%s8176_s3 + $0x128] sm:$0xff]  }
 0x102   :  { %v409_v13 = vcombine.high %v405_v6, %v405_v6  ;;  %v423_v14 = vcombine.high %v422_v7, %v422_v7  ;;  %8258 = vst [vmem:[#allocation11_spill] sm:$0xff] %v6381_v0  ;;  %4904 = vmatpush3.bf16.msra.mxu1 %v6376_v63  ;;  %4946 = vmatpush3.bf16.msra.mxu0 %v6381_v0 }
 0x103   :  { %v6292_v15 = vmax.f32 %v314_v8, 0.0  ;;  %v6295_v16 = vadd.f32 %v4854_v9, %v6208_v40  ;;  %437 = vst.msk [vmem:[#allocation2 + $0x30] sm:$0x3] %vm384_vm0, %v434_v10  ;;  %v438_v17 = vcombine.high %v434_v10, %v434_v10 }
 0x104   :  { %412 = vst.msk [vmem:[#allocation2 + $0x18] sm:$0x3] %vm384_vm0, %v409_v13  ;;  %426 = vst.msk [vmem:[#allocation2 + $0x28] sm:$0x3] %vm384_vm0, %v423_v14  ;;  %v6399_v13 = vld [vmem:[%s8176_s3 + $0xf8] sm:$0xff]   ;;  %v6404_v14 = vld [vmem:[%s8176_s3 + $0x170] sm:$0xff]  }
 0x105   :  { %v4855_v20 = vpop.f32.mrb[8].mxu0  ;;  %v449_v21 = vrot.slane %v6292_v15, %v6212_v47  ;;  %441 = vst.msk [vmem:[#allocation2 + $0x38] sm:$0x3] %vm384_vm0, %v438_v17  ;;  %v6409_v17 = vld [vmem:[%s8176_s3 + $0xb8] sm:$0xff]   ;;  %4905 = vmatprep.subr.bf16.mxu1 %v6399_v13  ;;  %4947 = vmatprep.subr.bf16.mxu0 %v6404_v14 }
 0x106   :  { %v4856_v22 = vpop.f32.mrb[9].mxu0  ;;  %4906 = vmatpush3.bf16.msra.mxu1 %v6409_v17 }
 0x107   :  { %v4857_v25 = vadd.f32 %v4856_v22, %v4855_v20  ;;  %v4858_v26 = vpop.f32.mrb[10].mxu0  ;;  %450 = vrot.lane.b32.xlu1 %v449_v21, %s6032_s17  ;;  %v455_v27 = vcombine.high %v449_v21, %v449_v21  ;;  %v6414_v20 = vld [vmem:[%s8176_s3 + $0x130] sm:$0xff]  }
 0x108   :  { %v4859_v28 = vpop.f32.mrb[11].mxu0  ;;  %4948 = vmatpush3.bf16.msra.mxu0 %v6414_v20 }
 0x109   :  { %v322_v29 = vadd.f32 %v4857_v25, %v6208_v40  ;;  %v4860_v30 = vadd.f32 %v4859_v28, %v4858_v26  ;;  %456 = vrot.lane.b32.xlu0 %v455_v27, %s6032_s17  ;;  %v460_v27 = vcombine.high %v6292_v15, %v6292_v15  ;;  %v6435_v15 = vld [vmem:[%s8176_s3 + $0x178] sm:$0xff]  }
 0x10a   :  { %4949 = vmatprep.subr.bf16.mxu0 %v6435_v15 }
 0x10b   :  { %v372_v31 = vmax.f32 %v322_v29, 0.0  ;;  %v325_v34 = vadd.f32 %v4860_v30, %v6208_v40 }
 0x10d   :  { %v523_v41 = vcombine.high %v372_v31, %v372_v31  ;;  %v373_v42 = vmax.f32 %v325_v34, 0.0  ;;  %v4861_v43 = vpop.f32.mrb[12].mxu0  ;;  %511 = vst.msk [vmem:[#allocation2 + $0x2] sm:$0x3] %vm384_vm0, %v372_v31  ;;  %v519_v44 = vrot.slane %v372_v31, %v6212_v47  ;;  %v6430_v34 = vld [vmem:[%s8176_s3 + $0x40] sm:$0xff]  }
 0x10e   :  { %v4862_v45 = vpop.f32.mrb[13].mxu0  ;;  %8259 = vst [vmem:[#allocation12_spill] sm:$0xff] %v6430_v34  ;;  %4913 = vmatprep.subr.bf16.mxu1 %v6430_v34 }
 0x10f   :  { %v548_v46 = vcombine.high %v373_v42, %v373_v42  ;;  %v4863_v48 = vadd.f32 %v4862_v45, %v4861_v43  ;;  %v4864_v49 = vpop.f32.mrb[14].mxu0  ;;  %536 = vst.msk [vmem:[#allocation2 + $0x22] sm:$0x3] %vm384_vm0, %v373_v42  ;;  %v520_v55 = vcombine.high %v519_v44, %v519_v44  ;;  %v530_v56 = vrot.slane %v523_v41, %v6212_v47 }
 0x110   :  { %v4865_v60 = vpop.f32.mrb[15].mxu0  ;;  %v544_v1 = vrot.slane %v373_v42, %v6212_v47  ;;  %v6440_v42 = vld [vmem:[%s8176_s3 + $0x138] sm:$0xff]  }
 0x111   :  { %v330_v2 = vadd.f32 %v4863_v48, %v6208_v40  ;;  %v4866_v5 = vadd.f32 %v4865_v60, %v4864_v49  ;;  %522 = vst.msk [vmem:[#allocation2 + $0xa] sm:$0x3] %vm384_vm0, %v520_v55  ;;  %532 = vst.msk [vmem:[#allocation2 + $0x12] sm:$0x3] %vm384_vm0, %v530_v56  ;;  %v533_v6 = vcombine.high %v530_v56, %v530_v56  ;;  %4950 = vmatpush3.bf16.msra.mxu0 %v6440_v42 }
 0x112   :  { %v545_v7 = vcombine.high %v544_v1, %v544_v1  ;;  %v555_v8 = vrot.slane %v548_v46, %v6212_v47  ;;  %v467_v46 = vrot.slane %v460_v27, %v6212_v47  ;;  %4979 = vmatprep.subr.bf16.mxu0 %v6194_v32 }
 0x113   :  { %v374_v9 = vmax.f32 %v330_v2, 0.0  ;;  %v6393_v10 = vadd.f32 %v4866_v5, %v6208_v40  ;;  %535 = vst.msk [vmem:[#allocation2 + $0x1a] sm:$0x3] %vm384_vm0, %v533_v6 }
 0x114   :  { %547 = vst.msk [vmem:[#allocation2 + $0x2a] sm:$0x3] %vm384_vm0, %v545_v7  ;;  %557 = vst.msk [vmem:[#allocation2 + $0x32] sm:$0x3] %vm384_vm0, %v555_v8  ;;  %v558_v21 = vcombine.high %v555_v8, %v555_v8  ;;  %v472_v6 = vcombine.high %v467_v46, %v467_v46 }
 0x115   :  { %v578_v22 = vcombine.high %v374_v9, %v374_v9  ;;  %v568_v25 = vrot.slane %v374_v9, %v6212_v47  ;;  %v4867_v26 = vpop.f32.mrb[16].mxu0 }
 0x116   :  { %v4868_v28 = vpop.f32.mrb[17].mxu0  ;;  %560 = vst.msk [vmem:[#allocation2 + $0x3a] sm:$0x3] %vm384_vm0, %v558_v21 }
 0x117   :  { %569 = vrot.lane.b32.xlu1 %v568_v25, %s6032_s17  ;;  %v573_v29 = vcombine.high %v568_v25, %v568_v25  ;;  %v4869_v30 = vadd.f32 %v4868_v28, %v4867_v26  ;;  %v4870_v31 = vpop.f32.mrb[18].mxu0  ;;  %v585_v44 = vrot.slane %v578_v22, %v6212_v47 }
 0x118   :  { %v4871_v41 = vpop.f32.mrb[19].mxu0 }
 0x119   :  { %574 = vrot.lane.b32.xlu0 %v573_v29, %s6032_s17  ;;  %v338_v43 = vadd.f32 %v4869_v30, %v6208_v40  ;;  %v4872_v45 = vadd.f32 %v4871_v41, %v4870_v31  ;;  %v590_v1 = vcombine.high %v585_v44, %v585_v44 }
 0x11b   :  { %v376_v48 = vmax.f32 %v338_v43, 0.0  ;;  %586 = vrot.lane.b32.xlu1 %v585_v44, %s6032_s17  ;;  %v341_v49 = vadd.f32 %v4872_v45, %v6208_v40 }
 0x11d   :  { %v641_v55 = vcombine.high %v376_v48, %v376_v48  ;;  %v377_v56 = vmax.f32 %v341_v49, 0.0  ;;  %v4873_v60 = vpop.f32.mrb[20].mxu0  ;;  %468 = vrot.lane.b32.xlu0 %v467_v46, %s6032_s17  ;;  %629 = vst.msk [vmem:[#allocation2 + $0x4] sm:$0x3] %vm384_vm0, %v376_v48  ;;  %v637_v2 = vrot.slane %v376_v48, %v6212_v47 }
 0x11e   :  { %v4874_v5 = vpop.f32.mrb[21].mxu0 }
 0x11f   :  { %v666_v7 = vcombine.high %v377_v56, %v377_v56  ;;  %v4875_v8 = vadd.f32 %v4874_v5, %v4873_v60  ;;  %591 = vrot.lane.b32.xlu1 %v590_v1, %s6032_s17  ;;  %v4876_v9 = vpop.f32.mrb[22].mxu0  ;;  %654 = vst.msk [vmem:[#allocation2 + $0x24] sm:$0x3] %vm384_vm0, %v377_v56  ;;  %v638_v21 = vcombine.high %v637_v2, %v637_v2 }
 0x120   :  { %v648_v22 = vrot.slane %v641_v55, %v6212_v47  ;;  %v4877_v25 = vpop.f32.mrb[23].mxu0  ;;  %v662_v26 = vrot.slane %v377_v56, %v6212_v47 }
 0x121   :  { %v346_v27 = vadd.f32 %v4875_v8, %v6208_v40  ;;  %473 = vrot.lane.b32.xlu0 %v472_v6, %s6032_s17  ;;  %v4878_v28 = vadd.f32 %v4877_v25, %v4876_v9  ;;  %640 = vst.msk [vmem:[#allocation2 + $0xc] sm:$0x3] %vm384_vm0, %v638_v21  ;;  %v673_v30 = vrot.slane %v666_v7, %v6212_v47 }
 0x122   :  { %v651_v29 = vcombine.high %v648_v22, %v648_v22  ;;  %650 = vst.msk [vmem:[#allocation2 + $0x14] sm:$0x3] %vm384_vm0, %v648_v22  ;;  %v663_v31 = vcombine.high %v662_v26, %v662_v26 }
 0x123   :  { %v378_v41 = vmax.f32 %v346_v27, 0.0  ;;  %v349_v43 = vadd.f32 %v4878_v28, %v6208_v40  ;;  %v676_v44 = vcombine.high %v673_v30, %v673_v30  ;;  %675 = vst.msk [vmem:[#allocation2 + $0x34] sm:$0x3] %vm384_vm0, %v673_v30 }
 0x124   :  { %653 = vst.msk [vmem:[#allocation2 + $0x1c] sm:$0x3] %vm384_vm0, %v651_v29  ;;  %665 = vst.msk [vmem:[#allocation2 + $0x2c] sm:$0x3] %vm384_vm0, %v663_v31 }
 0x125   :  { %v696_v45 = vcombine.high %v378_v41, %v378_v41  ;;  %v686_v46 = vrot.slane %v378_v41, %v6212_v47  ;;  %v4879_v48 = vpop.f32.mrb[24].mxu0  ;;  %678 = vst.msk [vmem:[#allocation2 + $0x3c] sm:$0x3] %vm384_vm0, %v676_v44 }
 0x126   :  { %v4880_v49 = vpop.f32.mrb[25].mxu0 }
 0x127   :  { %687 = vrot.lane.b32.xlu1 %v686_v46, %s6032_s17  ;;  %v691_v55 = vcombine.high %v686_v46, %v686_v46  ;;  %v4881_v56 = vadd.f32 %v4880_v49, %v4879_v48  ;;  %v4882_v60 = vpop.f32.mrb[26].mxu0  ;;  %v703_v1 = vrot.slane %v696_v45, %v6212_v47 }
 0x128   :  { %v4883_v2 = vpop.f32.mrb[27].mxu0 }
 0x129   :  { %692 = vrot.lane.b32.xlu0 %v691_v55, %s6032_s17  ;;  %v354_v5 = vadd.f32 %v4881_v56, %v6208_v40  ;;  %v4884_v6 = vadd.f32 %v4883_v2, %v4882_v60  ;;  %v708_v7 = vcombine.high %v703_v1, %v703_v1 }
 0x12b   :  { %v380_v8 = vmax.f32 %v354_v5, 0.0  ;;  %v357_v9 = vadd.f32 %v4884_v6, %v6208_v40  ;;  %709 = vrot.lane.b32.xlu1 %v708_v7, %s6032_s17 }
 0x12d   :  { %v759_v21 = vcombine.high %v380_v8, %v380_v8  ;;  %v381_v22 = vmax.f32 %v357_v9, 0.0  ;;  %v4885_v25 = vpop.f32.mrb[28].mxu0  ;;  %704 = vrot.lane.b32.xlu0 %v703_v1, %s6032_s17  ;;  %747 = vst.msk [vmem:[#allocation2 + $0x6] sm:$0x3] %vm384_vm0, %v380_v8  ;;  %v755_v26 = vrot.slane %v380_v8, %v6212_v47  ;;  %v375_v9 = vmax.f32 %v6393_v10, 0.0 }
 0x12e   :  { %v4886_v27 = vpop.f32.mrb[29].mxu0 }
 0x12f   :  { %v784_v28 = vcombine.high %v381_v22, %v381_v22  ;;  %v4887_v29 = vadd.f32 %v4886_v27, %v4885_v25  ;;  %v4888_v30 = vpop.f32.mrb[30].mxu0  ;;  %772 = vst.msk [vmem:[#allocation2 + $0x26] sm:$0x3] %vm384_vm0, %v381_v22  ;;  %v756_v31 = vcombine.high %v755_v26, %v755_v26  ;;  %v766_v41 = vrot.slane %v759_v21, %v6212_v47 }
 0x130   :  { %v4889_v44 = vpop.f32.mrb[31].mxu0  ;;  %v780_v45 = vrot.slane %v381_v22, %v6212_v47  ;;  %v371_v21 = vmax.f32 %v6295_v16, 0.0  ;;  %v379_v22 = vmax.f32 %v349_v43, 0.0  ;;  %v602_v25 = vrot.slane %v375_v9, %v6212_v47 }
 0x131   :  { %v362_v46 = vadd.f32 %v4887_v29, %v6208_v40  ;;  %v4890_v48 = vadd.f32 %v4889_v44, %v4888_v30  ;;  %758 = vst.msk [vmem:[#allocation2 + $0xe] sm:$0x3] %vm384_vm0, %v756_v31  ;;  %v769_v49 = vcombine.high %v766_v41, %v766_v41  ;;  %768 = vst.msk [vmem:[#allocation2 + $0x16] sm:$0x3] %vm384_vm0, %v766_v41 }
 0x132   :  { %v791_v55 = vrot.slane %v784_v28, %v6212_v47  ;;  %v781_v56 = vcombine.high %v780_v45, %v780_v45  ;;  %v720_v26 = vrot.slane %v379_v22, %v6212_v47  ;;  %v484_v28 = vrot.slane %v371_v21, %v6212_v47 }
 0x133   :  { %v382_v60 = vmax.f32 %v362_v46, 0.0  ;;  %v365_v1 = vadd.f32 %v4890_v48, %v6208_v40  ;;  %771 = vst.msk [vmem:[#allocation2 + $0x1e] sm:$0x3] %vm384_vm0, %v769_v49  ;;  %v607_v10 = vcombine.high %v602_v25, %v602_v25  ;;  %v612_v31 = vcombine.high %v375_v9, %v375_v9 }
 0x134   :  { %793 = vst.msk [vmem:[#allocation2 + $0x36] sm:$0x3] %vm384_vm0, %v791_v55  ;;  %v794_v2 = vcombine.high %v791_v55, %v791_v55  ;;  %783 = vst.msk [vmem:[#allocation2 + $0x2e] sm:$0x3] %vm384_vm0, %v781_v56  ;;  %v489_v16 = vcombine.high %v484_v28, %v484_v28  ;;  %v725_v43 = vcombine.high %v720_v26, %v720_v26 }
 0x135   :  { %v814_v5 = vcombine.high %v382_v60, %v382_v60  ;;  %v804_v6 = vrot.slane %v382_v60, %v6212_v47  ;;  %v383_v27 = vmax.f32 %v365_v1, 0.0  ;;  %v494_v41 = vcombine.high %v371_v21, %v371_v21 }
 0x136   :  { %796 = vst.msk [vmem:[#allocation2 + $0x3e] sm:$0x3] %vm384_vm0, %v794_v2  ;;  %v730_v44 = vcombine.high %v379_v22, %v379_v22  ;;  %v619_v45 = vrot.slane %v612_v31, %v6212_v47 }
 0x137   :  { %805 = vrot.lane.b32.xlu1 %v804_v6, %s6032_s17  ;;  %v809_v7 = vcombine.high %v804_v6, %v804_v6  ;;  %v821_v8 = vrot.slane %v814_v5, %v6212_v47  ;;  %v838_v29 = vrot.slane %v383_v27, %v6212_v47  ;;  %v848_v46 = vcombine.high %v383_v27, %v383_v27 }
 0x138   :  { %v501_v48 = vrot.slane %v494_v41, %v6212_v47  ;;  %v737_v49 = vrot.slane %v730_v44, %v6212_v47  ;;  %v624_v55 = vcombine.high %v619_v45, %v619_v45 }
 0x139   :  { %810 = vrot.lane.b32.xlu0 %v809_v7, %s6032_s17  ;;  %v826_v40 = vcombine.high %v821_v8, %v821_v8  ;;  %v843_v30 = vcombine.high %v838_v29, %v838_v29  ;;  %v855_v1 = vrot.slane %v848_v46, %v6212_v47  ;;  %v6552_v46 = vld [vmem:[%s8176_s3 + $0x8] sm:$0xff]  }
 0x13a   :  { %v506_v56 = vcombine.high %v501_v48, %v501_v48  ;;  %v742_v60 = vcombine.high %v737_v49, %v737_v49 }
 0x13b   :  { %827 = vrot.lane.b32.xlu1 %v826_v40, %s6032_s17  ;;  %v860_v2 = vcombine.high %v855_v1, %v855_v1 }
 0x13d   :  { %822 = vrot.lane.b32.xlu0 %v821_v8, %s6032_s17 }
 0x13f   :  { %603 = vrot.lane.b32.xlu1 %v602_v25, %s6032_s17 }
 0x141   :  { %485 = vrot.lane.b32.xlu0 %v484_v28, %s6032_s17 }
 0x143   :  { %608 = vrot.lane.b32.xlu1 %v607_v10, %s6032_s17 }
 0x145   :  { %490 = vrot.lane.b32.xlu0 %v489_v16, %s6032_s17 }
 0x147   :  { %726 = vrot.lane.b32.xlu1 %v725_v43, %s6032_s17  ;;  %v6543_v43 = vld [vmem:[%s8176_s3 + $0x48] sm:$0xff]  }
 0x149   :  { %721 = vrot.lane.b32.xlu0 %v720_v26, %s6032_s17 }
 0x14b   :  { %844 = vrot.lane.b32.xlu1 %v843_v30, %s6032_s17 }
 0x14d   :  { %839 = vrot.lane.b32.xlu0 %v838_v29, %s6032_s17  ;;  %v6538_v29 = vld [vmem:[%s8176_s3] sm:$0xff]  }
 0x14f   :  { %620 = vrot.lane.b32.xlu1 %v619_v45, %s6032_s17 }
 0x151   :  { %502 = vrot.lane.b32.xlu0 %v501_v48, %s6032_s17 }
 0x153   :  { %625 = vrot.lane.b32.xlu1 %v624_v55, %s6032_s17  ;;  %v6560_v55 = vld [vmem:[%s8176_s3 + $0x50] sm:$0xff]  }
 0x155   :  { %507 = vrot.lane.b32.xlu0 %v506_v56, %s6032_s17 }
 0x157   :  { %743 = vrot.lane.b32.xlu1 %v742_v60, %s6032_s17  ;;  %v6570_v60 = vld [vmem:[%s8176_s3 + $0x10] sm:$0xff]  }
 0x159   :  { %738 = vrot.lane.b32.xlu0 %v737_v49, %s6032_s17 }
 0x15b   :  { %861 = vrot.lane.b32.xlu1 %v860_v2, %s6032_s17  ;;  %v6578_v2 = vld [vmem:[%s8176_s3 + $0x58] sm:$0xff]  }
 0x15d   :  { %856 = vrot.lane.b32.xlu0 %v855_v1, %s6032_s17 }
 0x179   :  { %v451_v5 = vpop.permute.xlu1 %450 }
 0x17a   :  { %454 = vst.msk [vmem:[#allocation2] sm:$0x3] %vm453_vm1, %v451_v5  ;;  %v6586_v5 = vld [vmem:[%s8176_s3 + $0x18] sm:$0xff]  }
 0x17b   :  { %v457_v6 = vpop.permute.xlu0 %456 }
 0x17c   :  { %459 = vst.msk [vmem:[#allocation2 + $0x8] sm:$0x3] %vm453_vm1, %v457_v6  ;;  %v6593_v6 = vld [vmem:[%s8176_s3 + $0x60] sm:$0xff]  }
 0x189   :  { %v570_v7 = vpop.permute.xlu1 %569 }
 0x18a   :  { %572 = vst.msk [vmem:[#allocation2 + $0x2] sm:$0x3] %vm453_vm1, %v570_v7 }
 0x18b   :  { %v575_v8 = vpop.permute.xlu0 %574 }
 0x18c   :  { %577 = vst.msk [vmem:[#allocation2 + $0xa] sm:$0x3] %vm453_vm1, %v575_v8 }
 0x18d   :  { %v587_v9 = vpop.permute.xlu1 %586 }
 0x18e   :  { %589 = vst.msk [vmem:[#allocation2 + $0x12] sm:$0x3] %vm453_vm1, %v587_v9 }
 0x18f   :  { %v469_v40 = vpop.permute.xlu0 %468 }
 0x190   :  { %471 = vst.msk [vmem:[#allocation2 + $0x10] sm:$0x3] %vm453_vm1, %v469_v40  ;;  %v6604_v40 = vld [vmem:[%s8176_s3 + $0x20] sm:$0xff]  }
 0x191   :  { %v592_v21 = vpop.permute.xlu1 %591  ;;  %v6529_v22 = vld.sshfl [vmem:[#allocation2] sm:$0x33 pattern:$0x76325410] }
 0x192   :  { %594 = vst.msk [vmem:[#allocation2 + $0x1a] sm:$0x3] %vm453_vm1, %v592_v21  ;;  %v1006_v28 = vcombine.high %v6529_v22, %v6529_v22  ;;  %v6611_v21 = vld [vmem:[%s8176_s3 + $0x68] sm:$0xff]  }
 0x193   :  { %v474_v25 = vpop.permute.xlu0 %473  ;;  %v4585_v26 = vld.sshfl [vmem:[#allocation2 + $0x8] sm:$0x33 pattern:$0x76325410]  ;;  %8262 = vst [vmem:[#allocation15_spill] sm:$0xff] %v6611_v21 }
 0x194   :  { %476 = vst.msk [vmem:[#allocation2 + $0x18] sm:$0x3] %vm453_vm1, %v474_v25  ;;  %v1020_v27 = vcombine.high %v4585_v26, %v4585_v26  ;;  %v1023_v16 = vpack.c.bf16 %v4585_v26, %v4585_v26  ;;  %v1010_v31 = vpack.c.bf16 %v1006_v28, %v1006_v28  ;;  %v6619_v26 = vld [vmem:[%s8176_s3 + $0x28] sm:$0xff]   ;;  %v6626_v28 = vld [vmem:[%s8176_s3 + $0x70] sm:$0xff]  }
 0x196   :  { %v1024_v10 = vpack.c.bf16 %v1020_v27, %v1020_v27 }
 0x197   :  { %v4618_v30 = vld.sshfl [vmem:[#allocation2 + $0x10] sm:$0x33 pattern:$0x76325410] }
 0x198   :  { %1153 = vmatprep.mubr.bf16.mxu1 %v1024_v10  ;;  %v1306_v41 = vcombine.high %v4618_v30, %v4618_v30  ;;  %v6555_v49 = vpack.c.bf16 %v4618_v30, %v4618_v30 }
 0x199   :  { %v688_v44 = vpop.permute.xlu1 %687  ;;  %1154 = vmatmul.mubr.bf16.vlgmr.msra.gmra.mrb[0].mxu1 %v1023_v16  ;;  %v6635_v16 = vld [vmem:[%s8176_s3 + $0x30] sm:$0xff]  }
 0x19a   :  { %690 = vst.msk [vmem:[#allocation2 + $0x4] sm:$0x3] %vm453_vm1, %v688_v44  ;;  %4914 = vmatpush3.bf16.msra.mxu1 %v6538_v29  ;;  %1289 = vmatprep.mubr.bf16.mxu1 %v1010_v31  ;;  %v6547_v45 = vpack.c.bf16 %v1306_v41, %v1306_v41  ;;  %8261 = vst [vmem:[#allocation14_spill] sm:$0xff] %v6555_v49  ;;  %v6642_v31 = vld [vmem:[%s8176_s3 + $0x78] sm:$0xff]  }
 0x19b   :  { %v693_v48 = vpop.permute.xlu0 %692  ;;  %4915 = vmatprep.subr.bf16.mxu1 %v6543_v43  ;;  %v6645_v44 = vld.sshfl [vmem:[#allocation2 + $0x18] sm:$0x33 pattern:$0x76325410] }
 0x19c   :  { %8260 = vst [vmem:[#allocation13_spill] sm:$0xff] %v6547_v45  ;;  %695 = vst.msk [vmem:[#allocation2 + $0xc] sm:$0x3] %vm453_vm1, %v693_v48  ;;  %1439 = vmatprep.mubr.bf16.mxu0 %v6547_v45  ;;  %v6653_v48 = vld [vmem:[%s8176_s3 + $0x38] sm:$0xff]  }
 0x19d   :  { %1440 = vmatmul.mubr.bf16.vlgmr.msra.gmra.mrb[32].mxu0 %v6555_v49  ;;  %v710_v56 = vpop.permute.xlu1 %709  ;;  %8263 = vst [vmem:[#allocation16_spill] sm:$0xff] %v6653_v48  ;;  %v6779_v49 = vld [vmem:[%s8176_s3 + $0x1b0] sm:$0xff]  }
 0x19e   :  { %4916 = vmatpush3.bf16.msra.mxu1 %v6552_v46  ;;  %4980 = vmatpush3.bf16.msra.mxu0 %v6199_v33  ;;  %712 = vst.msk [vmem:[#allocation2 + $0x1c] sm:$0x3] %vm453_vm1, %v710_v56  ;;  %8271 = vst [vmem:[#allocation24_spill] sm:$0xff] %v6779_v49 }
 0x19f   :  { %v705_v1 = vpop.permute.xlu0 %704  ;;  %4917 = vmatprep.subr.bf16.mxu1 %v6560_v55  ;;  %4981 = vmatprep.subr.bf16.mxu0 %v6218_v50 }
 0x1a0   :  { %707 = vst.msk [vmem:[#allocation2 + $0x14] sm:$0x3] %vm453_vm1, %v705_v1  ;;  %v6660_v1 = vld [vmem:[%s8176_s3 + $0x1c0] sm:$0xff]  }
 0x1a1   :  { %8264 = vst [vmem:[#allocation17_spill] sm:$0xff] %v6660_v1 }
 0x1a2   :  { %4918 = vmatpush3.bf16.msra.mxu1 %v6570_v60  ;;  %4982 = vmatpush3.bf16.msra.mxu0 %v6228_v52 }
 0x1a3   :  { %4919 = vmatprep.subr.bf16.mxu1 %v6578_v2  ;;  %4983 = vmatprep.subr.bf16.mxu0 %v6238_v54  ;;  %v6595_v7 = vld.sshfl [vmem:[#allocation2 + $0xa] sm:$0x33 pattern:$0x76325410] }
 0x1a4   :  { %v1631_v8 = vcombine.high %v6595_v7, %v6595_v7 }
 0x1a6   :  { %4920 = vmatpush3.bf16.msra.mxu1 %v6586_v5  ;;  %4984 = vmatpush3.bf16.msra.mxu0 %v6254_v61  ;;  %v1635_v9 = vpack.c.bf16 %v1631_v8, %v1631_v8  ;;  %v1457_v8 = vcombine.high %v6645_v44, %v6645_v44 }
 0x1a7   :  { %4921 = vmatprep.subr.bf16.mxu1 %v6593_v6  ;;  %4985 = vmatprep.subr.bf16.mxu0 %v6267_v3 }
 0x1a8   :  { %1668 = vmatprep.mubr.bf16.mxu0 %v1635_v9 }
 0x1a9   :  { %v806_v25 = vpop.permute.xlu1 %805 }
 0x1aa   :  { %808 = vst.msk [vmem:[#allocation2 + $0x6] sm:$0x3] %vm453_vm1, %v806_v25  ;;  %4922 = vmatpush3.bf16.msra.mxu1 %v6604_v40  ;;  %4986 = vmatpush3.bf16.msra.mxu0 %v6284_v11  ;;  %v6671_v25 = vld [vmem:[%s8176_s3 + $0x180] sm:$0xff]  }
 0x1ab   :  { %v811_v27 = vpop.permute.xlu0 %810  ;;  %4923 = vmatprep.subr.bf16.mxu1 %v6611_v21  ;;  %4987 = vmatprep.subr.bf16.mxu0 %v6303_v18 }
 0x1ac   :  { %813 = vst.msk [vmem:[#allocation2 + $0xe] sm:$0x3] %vm453_vm1, %v811_v27  ;;  %v6673_v27 = vld.sshfl [vmem:[#allocation2 + $0x12] sm:$0x33 pattern:$0x76325410] }
 0x1ad   :  { %v828_v10 = vpop.permute.xlu1 %827  ;;  %v1725_v39 = vcombine.high %v6673_v27, %v6673_v27 }
 0x1ae   :  { %830 = vst.msk [vmem:[#allocation2 + $0x1e] sm:$0x3] %vm453_vm1, %v828_v10  ;;  %4924 = vmatpush3.bf16.msra.mxu1 %v6619_v26  ;;  %4988 = vmatpush3.bf16.msra.mxu0 %v6320_v23  ;;  %v1009_v10 = vpack.c.bf16 %v6529_v22, %v6529_v22  ;;  %v6695_v22 = vld [vmem:[%s8176_s3 + $0x188] sm:$0xff]  }
 0x1af   :  { %v823_v30 = vpop.permute.xlu0 %822  ;;  %4925 = vmatprep.subr.bf16.mxu1 %v6626_v28  ;;  %4989 = vmatprep.subr.bf16.mxu0 %v6338_v35  ;;  %v6708_v47 = vpack.c.bf16 %v1725_v39, %v1725_v39  ;;  %v6722_v39 = vld [vmem:[%s8176_s3 + $0x1d8] sm:$0xff]  }
 0x1b0   :  { %825 = vst.msk [vmem:[#allocation2 + $0x16] sm:$0x3] %vm453_vm1, %v823_v30 }
 0x1b1   :  { %v604_v41 = vpop.permute.xlu1 %603  ;;  %8266 = vst [vmem:[#allocation19_spill] sm:$0xff] %v6708_v47 }
 0x1b2   :  { %606 = vst.msk [vmem:[#allocation2 + $0x22] sm:$0x3] %vm453_vm1, %v604_v41  ;;  %4926 = vmatpush3.bf16.msra.mxu1 %v6635_v16  ;;  %4990 = vmatpush3.bf16.msra.mxu0 %v6348_v37  ;;  %v6682_v41 = vld [vmem:[%s8176_s3 + $0x1c8] sm:$0xff]  }
 0x1b3   :  { %v486_v56 = vpop.permute.xlu0 %485  ;;  %4927 = vmatprep.subr.bf16.mxu1 %v6642_v31  ;;  %4991 = vmatprep.subr.bf16.mxu0 %v6366_v57 }
 0x1b4   :  { %488 = vst.msk [vmem:[#allocation2 + $0x20] sm:$0x3] %vm453_vm1, %v486_v56  ;;  %v6685_v56 = vpack.c.bf16 %v1457_v8, %v1457_v8 }
 0x1b5   :  { %v609_v9 = vpop.permute.xlu1 %608 }
 0x1b6   :  { %611 = vst.msk [vmem:[#allocation2 + $0x2a] sm:$0x3] %vm453_vm1, %v609_v9  ;;  %4928 = vmatpush3.bf16.msra.mxu1 %v6653_v48  ;;  %4992 = vmatpush3.bf16.msra.mxu0 %v6376_v63  ;;  %8265 = vst [vmem:[#allocation18_spill] sm:$0xff] %v6685_v56 }
 0x1b7   :  { %v491_v30 = vpop.permute.xlu0 %490  ;;  %4957 = vmatprep.subr.bf16.mxu1 %v6660_v1  ;;  %4993 = vmatprep.subr.bf16.mxu0 %v6399_v13 }
 0x1b8   :  { %493 = vst.msk [vmem:[#allocation2 + $0x28] sm:$0x3] %vm453_vm1, %v491_v30  ;;  %v6706_v30 = vld [vmem:[%s8176_s3 + $0x1d0] sm:$0xff]  }
 0x1b9   :  { %1290 = vmatmul.mubr.bf16.vlgmr.msra.gmra.mrb[4].mxu1 %v1009_v10  ;;  %v727_v9 = vpop.permute.xlu1 %726  ;;  %v1634_v10 = vpack.c.bf16 %v6595_v7, %v6595_v7  ;;  %v6715_v7 = vld [vmem:[%s8176_s3 + $0x190] sm:$0xff]  }
 0x1ba   :  { %729 = vst.msk [vmem:[#allocation2 + $0x2c] sm:$0x3] %vm453_vm1, %v727_v9  ;;  %4958 = vmatpush3.bf16.msra.mxu1 %v6671_v25  ;;  %1590 = vmatprep.mubr.bf16.mxu1 %v6685_v56  ;;  %v4653_v56 = vld.sshfl [vmem:[#allocation2 + $0x2] sm:$0x33 pattern:$0x76325410] }
 0x1bb   :  { %4994 = vmatpush3.bf16.msra.mxu0 %v6409_v17  ;;  %v722_v8 = vpop.permute.xlu0 %721  ;;  %4959 = vmatprep.subr.bf16.mxu1 %v6682_v41 }
 0x1bc   :  { %724 = vst.msk [vmem:[#allocation2 + $0x24] sm:$0x3] %vm453_vm1, %v722_v8  ;;  %5023 = vmatprep.subr.bf16.mxu0 %v6223_v51 }
 0x1bd   :  { %v845_v9 = vpop.permute.xlu1 %844 }
 0x1be   :  { %1669 = vmatmul.mubr.bf16.vlgmr.msra.gmra.mrb[36].mxu0 %v1634_v10  ;;  %847 = vst.msk [vmem:[#allocation2 + $0x2e] sm:$0x3] %vm453_vm1, %v845_v9  ;;  %4960 = vmatpush3.bf16.msra.mxu1 %v6695_v22  ;;  %v6739_v9 = vld [vmem:[%s8176_s3 + $0x1e0] sm:$0xff]  }
 0x1bf   :  { %5024 = vmatpush3.bf16.msra.mxu0 %v6233_v53  ;;  %1762 = vmatprep.mubr.bf16.mxu0 %v6708_v47  ;;  %v840_v51 = vpop.permute.xlu0 %839  ;;  %v6732_v53 = vld [vmem:[%s8176_s3 + $0x198] sm:$0xff]   ;;  %8267 = vst [vmem:[#allocation20_spill] sm:$0xff] %v6739_v9 }
 0x1c0   :  { %842 = vst.msk [vmem:[#allocation2 + $0x26] sm:$0x3] %vm453_vm1, %v840_v51  ;;  %4961 = vmatprep.subr.bf16.mxu1 %v6706_v30  ;;  %5025 = vmatprep.subr.bf16.mxu0 %v6247_v59 }
 0x1c1   :  { %v621_v8 = vpop.permute.xlu1 %620 }
 0x1c2   :  { %623 = vst.msk [vmem:[#allocation2 + $0x32] sm:$0x3] %vm453_vm1, %v621_v8  ;;  %4962 = vmatpush3.bf16.msra.mxu1 %v6715_v7  ;;  %v6755_v8 = vld [vmem:[%s8176_s3 + $0x1e8] sm:$0xff]  }
 0x1c3   :  { %5026 = vmatpush3.bf16.msra.mxu0 %v6259_v62  ;;  %v503_v10 = vpop.permute.xlu0 %502  ;;  %4963 = vmatprep.subr.bf16.mxu1 %v6722_v39  ;;  %v6748_v62 = vld [vmem:[%s8176_s3 + $0x1a0] sm:$0xff]   ;;  %8269 = vst [vmem:[#allocation22_spill] sm:$0xff] %v6755_v8 }
 0x1c4   :  { %505 = vst.msk [vmem:[#allocation2 + $0x30] sm:$0x3] %vm453_vm1, %v503_v10  ;;  %5027 = vmatprep.subr.bf16.mxu0 %v6272_v4  ;;  %8268 = vst [vmem:[#allocation21_spill] sm:$0xff] %v6748_v62 }
 0x1c5   :  { %v626_v59 = vpop.permute.xlu1 %625 }
 0x1c6   :  { %628 = vst.msk [vmem:[#allocation2 + $0x3a] sm:$0x3] %vm453_vm1, %v626_v59  ;;  %4964 = vmatpush3.bf16.msra.mxu1 %v6732_v53  ;;  %v6764_v59 = vld [vmem:[%s8176_s3 + $0x1a8] sm:$0xff]  }
 0x1c7   :  { %5028 = vmatpush3.bf16.msra.mxu0 %v6289_v12  ;;  %v508_v51 = vpop.permute.xlu0 %507  ;;  %4965 = vmatprep.subr.bf16.mxu1 %v6739_v9 }
 0x1c8   :  { %510 = vst.msk [vmem:[#allocation2 + $0x38] sm:$0x3] %vm453_vm1, %v508_v51  ;;  %5029 = vmatprep.subr.bf16.mxu0 %v6308_v19  ;;  %v6771_v51 = vld [vmem:[%s8176_s3 + $0x1f0] sm:$0xff]  }
 0x1c9   :  { %v744_v10 = vpop.permute.xlu1 %743  ;;  %8270 = vst [vmem:[#allocation23_spill] sm:$0xff] %v6771_v51 }
 0x1ca   :  { %746 = vst.msk [vmem:[#allocation2 + $0x3c] sm:$0x3] %vm453_vm1, %v744_v10  ;;  %4966 = vmatpush3.bf16.msra.mxu1 %v6748_v62 }
 0x1cb   :  { %5030 = vmatpush3.bf16.msra.mxu0 %v6325_v24  ;;  %v739_v47 = vpop.permute.xlu0 %738  ;;  %4967 = vmatprep.subr.bf16.mxu1 %v6755_v8 }
 0x1cc   :  { %741 = vst.msk [vmem:[#allocation2 + $0x34] sm:$0x3] %vm453_vm1, %v739_v47  ;;  %5031 = vmatprep.subr.bf16.mxu0 %v6343_v36  ;;  %v6787_v47 = vld [vmem:[%s8176_s3 + $0x1f8] sm:$0xff]  }
 0x1cd   :  { %v862_v10 = vpop.permute.xlu1 %861 }
 0x1ce   :  { %4968 = vmatpush3.bf16.msra.mxu1 %v6764_v59  ;;  %864 = vst.msk [vmem:[#allocation2 + $0x3e] sm:$0x3] %vm453_vm1, %v862_v10  ;;  %v6795_v10 = vld [vmem:[%s8176_s3 + $0x1b8] sm:$0xff]  }
 0x1cf   :  { %5032 = vmatpush3.bf16.msra.mxu0 %v6353_v38  ;;  %4969 = vmatprep.subr.bf16.mxu1 %v6771_v51  ;;  %v857_v45 = vpop.permute.xlu0 %856  ;;  %v1617_v51 = vcombine.high %v4653_v56, %v4653_v56  ;;  %v4658_v38 = vld.sshfl [vmem:[#allocation2 + $0xc] sm:$0x33 pattern:$0x76325410] }
 0x1d0   :  { %5033 = vmatprep.subr.bf16.mxu0 %v6371_v58  ;;  %859 = vst.msk [vmem:[#allocation2 + $0x36] sm:$0x3] %vm453_vm1, %v857_v45  ;;  %v6803_v45 = vpack.c.bf16 %v6645_v44, %v6645_v44  ;;  %v6814_v44 = vpack.c.bf16 %v6673_v27, %v6673_v27  ;;  %v8280_v27 = vld [vmem:[#allocation18_spill] sm:$0xff] }
 0x1d2   :  { %4970 = vmatpush3.bf16.msra.mxu1 %v6779_v49  ;;  %v1621_v49 = vpack.c.bf16 %v1617_v51, %v1617_v51  ;;  %8272 = vst [vmem:[#allocation25_spill] sm:$0xff] %v6814_v44  ;;  %v6942_v51 = vld [vmem:[%s8176_s3 + $0x88] sm:$0xff]  }
 0x1d3   :  { %5034 = vmatpush3.bf16.msra.mxu0 %v6381_v0  ;;  %4971 = vmatprep.subr.bf16.mxu1 %v6787_v47  ;;  %v1863_v0 = vcombine.high %v4658_v38, %v4658_v38 }
 0x1d4   :  { %5035 = vmatprep.subr.bf16.mxu0 %v6404_v14 }
 0x1d6   :  { %4972 = vmatpush3.bf16.msra.mxu1 %v6795_v10 }
 0x1d7   :  { %5036 = vmatpush3.bf16.msra.mxu0 %v6414_v20  ;;  %5001 = vmatprep.subr.bf16.mxu1 %v6430_v34  ;;  %v1867_v34 = vpack.c.bf16 %v1863_v0, %v1863_v0  ;;  %v8276_v0 = vld [vmem:[#allocation24_spill] sm:$0xff] }
 0x1d8   :  { %5037 = vmatprep.subr.bf16.mxu0 %v6435_v15 }
 0x1d9   :  { %1591 = vmatmul.mubr.bf16.vlgmr.msra.gmra.mrb[8].mxu1 %v6803_v45 }
 0x1da   :  { %5002 = vmatpush3.bf16.msra.mxu1 %v6538_v29  ;;  %1708 = vmatprep.mubr.bf16.mxu1 %v1621_v49  ;;  %v6927_v49 = vld [vmem:[%s8176_s3 + $0x80] sm:$0xff]  }
 0x1db   :  { %5038 = vmatpush3.bf16.msra.mxu0 %v6440_v42  ;;  %5003 = vmatprep.subr.bf16.mxu1 %v6543_v43 }
 0x1dc   :  { %5067 = vmatprep.subr.bf16.mxu0 %v6194_v32  ;;  %v4656_v32 = vld.sshfl [vmem:[#allocation2 + $0x1a] sm:$0x33 pattern:$0x76325410] }
 0x1de   :  { %1763 = vmatmul.mubr.bf16.vlgmr.msra.gmra.mrb[40].mxu0 %v6814_v44  ;;  %5004 = vmatpush3.bf16.msra.mxu1 %v6552_v46 }
 0x1df   :  { %5068 = vmatpush3.bf16.msra.mxu0 %v6199_v33  ;;  %5005 = vmatprep.subr.bf16.mxu1 %v6560_v55  ;;  %v1780_v33 = vcombine.high %v4656_v32, %v4656_v32 }
 0x1e0   :  { %5069 = vmatprep.subr.bf16.mxu0 %v6218_v50  ;;  %1900 = vmatprep.mubr.bf16.mxu0 %v1867_v34  ;;  %v4659_v50 = vld.sshfl [vmem:[#allocation2 + $0x14] sm:$0x33 pattern:$0x76325410] }
 0x1e2   :  { %5006 = vmatpush3.bf16.msra.mxu1 %v6570_v60 }
 0x1e3   :  { %5070 = vmatpush3.bf16.msra.mxu0 %v6228_v52  ;;  %5007 = vmatprep.subr.bf16.mxu1 %v6578_v2  ;;  %v1620_v52 = vpack.c.bf16 %v4653_v56, %v4653_v56  ;;  %v6935_v56 = vld [vmem:[%s8176_s3 + $0xc8] sm:$0xff]  }
 0x1e4   :  { %5071 = vmatprep.subr.bf16.mxu0 %v6238_v54  ;;  %v6846_v54 = vpack.c.bf16 %v1780_v33, %v1780_v33  ;;  %v6956_v33 = vld [vmem:[%s8176_s3 + $0x90] sm:$0xff]  }
 0x1e6   :  { %5008 = vmatpush3.bf16.msra.mxu1 %v6586_v5 }
 0x1e7   :  { %5072 = vmatpush3.bf16.msra.mxu0 %v6254_v61  ;;  %5009 = vmatprep.subr.bf16.mxu1 %v6593_v6  ;;  %v1957_v61 = vcombine.high %v4659_v50, %v4659_v50 }
 0x1e8   :  { %5073 = vmatprep.subr.bf16.mxu0 %v6267_v3  ;;  %v1866_v3 = vpack.c.bf16 %v4658_v38, %v4658_v38  ;;  %v8274_v38 = vld [vmem:[#allocation10_spill] sm:$0xff] }
 0x1ea   :  { %5010 = vmatpush3.bf16.msra.mxu1 %v6604_v40 }
 0x1eb   :  { %5074 = vmatpush3.bf16.msra.mxu0 %v6284_v11  ;;  %5011 = vmatprep.subr.bf16.mxu1 %v6611_v21  ;;  %v6855_v11 = vld [vmem:[%s8176_s3 + $0x140] sm:$0xff]  }
 0x1ec   :  { %5075 = vmatprep.subr.bf16.mxu0 %v6303_v18  ;;  %v6858_v18 = vpack.c.bf16 %v1957_v61, %v1957_v61  ;;  %v6977_v61 = vld [vmem:[%s8176_s3 + $0xe0] sm:$0xff]  }
 0x1ee   :  { %5012 = vmatpush3.bf16.msra.mxu1 %v6619_v26  ;;  %8273 = vst [vmem:[#allocation26_spill] sm:$0xff] %v6858_v18 }
 0x1ef   :  { %5076 = vmatpush3.bf16.msra.mxu0 %v6320_v23  ;;  %5013 = vmatprep.subr.bf16.mxu1 %v6626_v28  ;;  %v6864_v23 = vld [vmem:[%s8176_s3 + $0x100] sm:$0xff]  }
 0x1f0   :  { %5077 = vmatprep.subr.bf16.mxu0 %v6338_v35  ;;  %v6872_v35 = vld [vmem:[%s8176_s3 + $0x148] sm:$0xff]  }
 0x1f2   :  { %5014 = vmatpush3.bf16.msra.mxu1 %v6635_v16 }
 0x1f3   :  { %5078 = vmatpush3.bf16.msra.mxu0 %v6348_v37  ;;  %5015 = vmatprep.subr.bf16.mxu1 %v6642_v31  ;;  %v6879_v37 = vld [vmem:[%s8176_s3 + $0x108] sm:$0xff]  }
 0x1f4   :  { %5079 = vmatprep.subr.bf16.mxu0 %v6366_v57 }
 0x1f6   :  { %5016 = vmatpush3.bf16.msra.mxu1 %v6653_v48 }
 0x1f7   :  { %5080 = vmatpush3.bf16.msra.mxu0 %v6376_v63  ;;  %5045 = vmatprep.subr.bf16.mxu1 %v6660_v1 }
 0x1f8   :  { %5081 = vmatprep.subr.bf16.mxu0 %v6399_v13 }
 0x1f9   :  { %1709 = vmatmul.mubr.bf16.vlgmr.msra.gmra.mrb[12].mxu1 %v1620_v52  ;;  %v6970_v52 = vld [vmem:[%s8176_s3 + $0x98] sm:$0xff]  }
 0x1fa   :  { %5046 = vmatpush3.bf16.msra.mxu1 %v6671_v25  ;;  %1817 = vmatprep.mubr.bf16.mxu1 %v6846_v54 }
 0x1fb   :  { %5082 = vmatpush3.bf16.msra.mxu0 %v6409_v17  ;;  %5047 = vmatprep.subr.bf16.mxu1 %v6682_v41 }
 0x1fc   :  { %5111 = vmatprep.subr.bf16.mxu0 %v6855_v11 }
 0x1fe   :  { %1901 = vmatmul.mubr.bf16.vlgmr.msra.gmra.mrb[44].mxu0 %v1866_v3  ;;  %5048 = vmatpush3.bf16.msra.mxu1 %v6695_v22  ;;  %v6984_v3 = vld [vmem:[%s8176_s3 + $0xa0] sm:$0xff]  }
 0x1ff   :  { %5112 = vmatpush3.bf16.msra.mxu0 %v6864_v23  ;;  %1994 = vmatprep.mubr.bf16.mxu0 %v6858_v18 }
 0x200   :  { %5049 = vmatprep.subr.bf16.mxu1 %v6706_v30  ;;  %5113 = vmatprep.subr.bf16.mxu0 %v6872_v35 }
 0x202   :  { %5050 = vmatpush3.bf16.msra.mxu1 %v6715_v7 }
 0x203   :  { %5114 = vmatpush3.bf16.msra.mxu0 %v6879_v37  ;;  %5051 = vmatprep.subr.bf16.mxu1 %v6722_v39 }
 0x204   :  { %5115 = vmatprep.subr.bf16.mxu0 %v6272_v4  ;;  %v8275_v4 = vld [vmem:[#allocation23_spill] sm:$0xff] }
 0x205   :  { %8281 = vst [vmem:[#allocation23_spill] sm:$0xff] %v6970_v52 }
 0x206   :  { %5052 = vmatpush3.bf16.msra.mxu1 %v6732_v53 }
 0x207   :  { %5116 = vmatpush3.bf16.msra.mxu0 %v6289_v12  ;;  %5053 = vmatprep.subr.bf16.mxu1 %v6739_v9  ;;  %v6896_v12 = vld.sshfl [vmem:[#allocation2 + $0x4] sm:$0x33 pattern:$0x76325410] }
 0x208   :  { %5117 = vmatprep.subr.bf16.mxu0 %v6308_v19  ;;  %v8277_v19 = vld [vmem:[#allocation11_spill] sm:$0xff] }
 0x209   :  { %8282 = vst [vmem:[#allocation11_spill] sm:$0xff] %v6977_v61 }
 0x20a   :  { %5054 = vmatpush3.bf16.msra.mxu1 %v6748_v62 }
 0x20b   :  { %5118 = vmatpush3.bf16.msra.mxu0 %v6325_v24  ;;  %5055 = vmatprep.subr.bf16.mxu1 %v6755_v8  ;;  %v1849_v24 = vcombine.high %v6896_v12, %v6896_v12 }
 0x20c   :  { %5119 = vmatprep.subr.bf16.mxu0 %v6343_v36  ;;  %v6905_v36 = vpack.c.bf16 %v4656_v32, %v4656_v32  ;;  %v6949_v32 = vld [vmem:[%s8176_s3 + $0xd0] sm:$0xff]  }
 0x20d   :  { %v1853_v34 = vpack.c.bf16 %v1849_v24, %v1849_v24  ;;  %v6998_v24 = vld [vmem:[%s8176_s3 + $0xa8] sm:$0xff]  }
 0x20e   :  { %5056 = vmatpush3.bf16.msra.mxu1 %v6764_v59  ;;  %8284 = vst [vmem:[#allocation18_spill] sm:$0xff] %v6998_v24 }
 0x20f   :  { %5120 = vmatpush3.bf16.msra.mxu0 %v8274_v38  ;;  %5057 = vmatprep.subr.bf16.mxu1 %v8275_v4  ;;  %v6991_v38 = vld [vmem:[%s8176_s3 + $0xe8] sm:$0xff]  }
 0x210   :  { %5121 = vmatprep.subr.bf16.mxu0 %v6371_v58  ;;  %v8278_v58 = vld [vmem:[#allocation12_spill] sm:$0xff] }
 0x211   :  { %8283 = vst [vmem:[#allocation12_spill] sm:$0xff] %v6984_v3 }
 0x212   :  { %5058 = vmatpush3.bf16.msra.mxu1 %v8276_v0 }
 0x213   :  { %5122 = vmatpush3.bf16.msra.mxu0 %v8277_v19  ;;  %5059 = vmatprep.subr.bf16.mxu1 %v6787_v47  ;;  %v4660_v19 = vld.sshfl [vmem:[#allocation2 + $0x1c] sm:$0x33 pattern:$0x76325410] }
 0x214   :  { %5123 = vmatprep.subr.bf16.mxu0 %v6404_v14  ;;  %v6914_v14 = vpack.c.bf16 %v4659_v50, %v4659_v50  ;;  %v6963_v50 = vld [vmem:[%s8176_s3 + $0xd8] sm:$0xff]  }
 0x216   :  { %5060 = vmatpush3.bf16.msra.mxu1 %v6795_v10  ;;  %8279 = vst [vmem:[#allocation10_spill] sm:$0xff] %v6914_v14 }
 0x217   :  { %5124 = vmatpush3.bf16.msra.mxu0 %v6414_v20  ;;  %5089 = vmatprep.subr.bf16.mxu1 %v8278_v58  ;;  %v6919_v20 = vld [vmem:[%s8176_s3 + $0xc0] sm:$0xff]  }
 0x218   :  { %5125 = vmatprep.subr.bf16.mxu0 %v6435_v15 }
 0x219   :  { %1818 = vmatmul.mubr.bf16.vlgmr.msra.gmra.mrb[16].mxu1 %v6905_v36 }
 0x21a   :  { %5090 = vmatpush3.bf16.msra.mxu1 %v6538_v29  ;;  %1940 = vmatprep.mubr.bf16.mxu1 %v1853_v34  ;;  %v2012_v34 = vcombine.high %v4660_v19, %v4660_v19 }
 0x21b   :  { %5126 = vmatpush3.bf16.msra.mxu0 %v6440_v42  ;;  %5091 = vmatprep.subr.bf16.mxu1 %v6543_v43 }
 0x21c   :  { %5155 = vmatprep.subr.bf16.mxu0 %v6919_v20  ;;  %v7009_v18 = vpack.c.bf16 %v2012_v34, %v2012_v34  ;;  %v7079_v34 = vld [vmem:[%s8176_s3 + $0x128] sm:$0xff]  }
 0x21e   :  { %1995 = vmatmul.mubr.bf16.vlgmr.msra.gmra.mrb[48].mxu0 %v6914_v14  ;;  %5092 = vmatpush3.bf16.msra.mxu1 %v6552_v46  ;;  %v1852_v14 = vpack.c.bf16 %v6896_v12, %v6896_v12  ;;  %8285 = vst [vmem:[#allocation27_spill] sm:$0xff] %v7009_v18  ;;  %v7065_v12 = vld [vmem:[%s8176_s3 + $0x120] sm:$0xff]  }
 0x21f   :  { %5156 = vmatpush3.bf16.msra.mxu0 %v6927_v49  ;;  %2121 = vmatprep.mubr.bf16.mxu0 %v8280_v27  ;;  %v4663_v27 = vld.sshfl [vmem:[#allocation2 + $0x20] sm:$0x33 pattern:$0x76325410] }
 0x220   :  { %5093 = vmatprep.subr.bf16.mxu1 %v6560_v55  ;;  %5157 = vmatprep.subr.bf16.mxu0 %v6935_v56  ;;  %v2178_v44 = vcombine.high %v4663_v27, %v4663_v27 }
 0x222   :  { %5094 = vmatpush3.bf16.msra.mxu1 %v6570_v60 }
 0x223   :  { %5158 = vmatpush3.bf16.msra.mxu0 %v6942_v51  ;;  %5095 = vmatprep.subr.bf16.mxu1 %v6578_v2 }
 0x224   :  { %5159 = vmatprep.subr.bf16.mxu0 %v6949_v32 }
 0x226   :  { %5096 = vmatpush3.bf16.msra.mxu1 %v6586_v5 }
 0x227   :  { %5160 = vmatpush3.bf16.msra.mxu0 %v6956_v33  ;;  %5097 = vmatprep.subr.bf16.mxu1 %v6593_v6 }
 0x228   :  { %5161 = vmatprep.subr.bf16.mxu0 %v6963_v50 }
 0x22a   :  { %5098 = vmatpush3.bf16.msra.mxu1 %v6604_v40 }
 0x22b   :  { %5162 = vmatpush3.bf16.msra.mxu0 %v6970_v52  ;;  %5099 = vmatprep.subr.bf16.mxu1 %v6611_v21 }
 0x22c   :  { %5163 = vmatprep.subr.bf16.mxu0 %v6977_v61 }
 0x22e   :  { %5100 = vmatpush3.bf16.msra.mxu1 %v6619_v26 }
 0x22f   :  { %5164 = vmatpush3.bf16.msra.mxu0 %v6984_v3  ;;  %5101 = vmatprep.subr.bf16.mxu1 %v6626_v28 }
 0x230   :  { %5165 = vmatprep.subr.bf16.mxu0 %v6991_v38 }
 0x232   :  { %5102 = vmatpush3.bf16.msra.mxu1 %v6635_v16 }
 0x233   :  { %5166 = vmatpush3.bf16.msra.mxu0 %v6998_v24  ;;  %5103 = vmatprep.subr.bf16.mxu1 %v6642_v31 }
 0x234   :  { %5167 = vmatprep.subr.bf16.mxu0 %v6366_v57  ;;  %v7016_v57 = vpack.c.bf16 %v2178_v44, %v2178_v44  ;;  %v7058_v44 = vld [vmem:[%s8176_s3 + $0x160] sm:$0xff]  }
 0x235   :  { %8290 = vst [vmem:[#allocation32_spill] sm:$0xff] %v7058_v44 }
 0x236   :  { %5104 = vmatpush3.bf16.msra.mxu1 %v6653_v48  ;;  %8286 = vst [vmem:[#allocation28_spill] sm:$0xff] %v7016_v57 }
 0x237   :  { %5168 = vmatpush3.bf16.msra.mxu0 %v6376_v63  ;;  %5133 = vmatprep.subr.bf16.mxu1 %v6660_v1  ;;  %v7030_v63 = vld [vmem:[%s8176_s3 + $0x150] sm:$0xff]  }
 0x238   :  { %5169 = vmatprep.subr.bf16.mxu0 %v6399_v13  ;;  %v7037_v13 = vld [vmem:[%s8176_s3 + $0x110] sm:$0xff]  }
 0x239   :  { %1941 = vmatmul.mubr.bf16.vlgmr.msra.gmra.mrb[20].mxu1 %v1852_v14  ;;  %8287 = vst [vmem:[#allocation29_spill] sm:$0xff] %v7037_v13  ;;  %v7072_v14 = vld [vmem:[%s8176_s3 + $0x168] sm:$0xff]  }
 0x23a   :  { %5134 = vmatpush3.bf16.msra.mxu1 %v6671_v25  ;;  %2049 = vmatprep.mubr.bf16.mxu1 %v7009_v18  ;;  %v7090_v18 = vpack.c.bf16 %v4660_v19, %v4660_v19  ;;  %v7105_v19 = vpack.c.bf16 %v4663_v27, %v4663_v27 }
 0x23b   :  { %5170 = vmatpush3.bf16.msra.mxu0 %v6409_v17  ;;  %5135 = vmatprep.subr.bf16.mxu1 %v6682_v41  ;;  %v7044_v17 = vld [vmem:[%s8176_s3 + $0x158] sm:$0xff]  }
 0x23c   :  { %5199 = vmatprep.subr.bf16.mxu0 %v6855_v11  ;;  %8288 = vst [vmem:[#allocation30_spill] sm:$0xff] %v7044_v17  ;;  %8292 = vst [vmem:[#allocation34_spill] sm:$0xff] %v7090_v18 }
 0x23e   :  { %2122 = vmatmul.mubr.bf16.vlgmr.msra.gmra.mrb[52].mxu0 %v6803_v45  ;;  %5136 = vmatpush3.bf16.msra.mxu1 %v6695_v22  ;;  %v7051_v45 = vld [vmem:[%s8176_s3 + $0x118] sm:$0xff]  }
 0x23f   :  { %5200 = vmatpush3.bf16.msra.mxu0 %v6864_v23  ;;  %2215 = vmatprep.mubr.bf16.mxu0 %v7016_v57  ;;  %8289 = vst [vmem:[#allocation31_spill] sm:$0xff] %v7051_v45  ;;  %v7086_v57 = vld [vmem:[%s8176_s3 + $0x170] sm:$0xff]  }
 0x240   :  { %5137 = vmatprep.subr.bf16.mxu1 %v6706_v30  ;;  %5201 = vmatprep.subr.bf16.mxu0 %v6872_v35  ;;  %8291 = vst [vmem:[#allocation33_spill] sm:$0xff] %v7086_v57 }
 0x242   :  { %5138 = vmatpush3.bf16.msra.mxu1 %v6715_v7 }
 0x243   :  { %5202 = vmatpush3.bf16.msra.mxu0 %v6879_v37  ;;  %5139 = vmatprep.subr.bf16.mxu1 %v6722_v39 }
 0x244   :  { %5203 = vmatprep.subr.bf16.mxu0 %v7030_v63 }
 0x246   :  { %5140 = vmatpush3.bf16.msra.mxu1 %v6732_v53 }
 0x247   :  { %5204 = vmatpush3.bf16.msra.mxu0 %v7037_v13  ;;  %5141 = vmatprep.subr.bf16.mxu1 %v6739_v9 }
 0x248   :  { %5205 = vmatprep.subr.bf16.mxu0 %v7044_v17 }
 0x24a   :  { %5142 = vmatpush3.bf16.msra.mxu1 %v6748_v62 }
 0x24b   :  { %5206 = vmatpush3.bf16.msra.mxu0 %v7051_v45  ;;  %5143 = vmatprep.subr.bf16.mxu1 %v6755_v8 }
 0x24c   :  { %5207 = vmatprep.subr.bf16.mxu0 %v7058_v44 }
 0x24e   :  { %5144 = vmatpush3.bf16.msra.mxu1 %v6764_v59 }
 0x24f   :  { %5208 = vmatpush3.bf16.msra.mxu0 %v7065_v12  ;;  %5145 = vmatprep.subr.bf16.mxu1 %v8275_v4 }
 0x250   :  { %5209 = vmatprep.subr.bf16.mxu0 %v7072_v14 }
 0x252   :  { %5146 = vmatpush3.bf16.msra.mxu1 %v8276_v0  ;;  %v7095_v0 = vld [vmem:[%s8176_s3 + $0x130] sm:$0xff]  }
 0x253   :  { %5210 = vmatpush3.bf16.msra.mxu0 %v7079_v34  ;;  %5147 = vmatprep.subr.bf16.mxu1 %v6787_v47 }
 0x254   :  { %5211 = vmatprep.subr.bf16.mxu0 %v7086_v57  ;;  %v8293_v57 = vld [vmem:[#allocation13_spill] sm:$0xff] }
 0x255   :  { %8294 = vst [vmem:[#allocation13_spill] sm:$0xff] %v7105_v19 }
 0x256   :  { %5148 = vmatpush3.bf16.msra.mxu1 %v6795_v10 }
 0x257   :  { %5212 = vmatpush3.bf16.msra.mxu0 %v7095_v0  ;;  %5177 = vmatprep.subr.bf16.mxu1 %v8278_v58 }
 0x258   :  { %5213 = vmatprep.subr.bf16.mxu0 %v6435_v15 }
 0x259   :  { %2050 = vmatmul.mubr.bf16.vlgmr.msra.gmra.mrb[24].mxu1 %v7090_v18  ;;  %v7130_v18 = vld.sshfl [vmem:[#allocation2 + $0x28] sm:$0x33 pattern:$0x76325410] }
 0x25a   :  { %5178 = vmatpush3.bf16.msra.mxu1 %v6538_v29  ;;  %2161 = vmatprep.mubr.bf16.mxu1 %v8293_v57 }
 0x25b   :  { %5214 = vmatpush3.bf16.msra.mxu0 %v6440_v42  ;;  %5179 = vmatprep.subr.bf16.mxu1 %v6543_v43 }
 0x25c   :  { %5243 = vmatprep.subr.bf16.mxu0 %v6919_v20 }
 0x25e   :  { %2216 = vmatmul.mubr.bf16.vlgmr.msra.gmra.mrb[56].mxu0 %v7105_v19  ;;  %5180 = vmatpush3.bf16.msra.mxu1 %v6552_v46 }
 0x25f   :  { %5244 = vmatpush3.bf16.msra.mxu0 %v6927_v49  ;;  %2343 = vmatprep.mubr.bf16.mxu0 %v6846_v54 }
 0x260   :  { %5181 = vmatprep.subr.bf16.mxu1 %v6560_v55  ;;  %5245 = vmatprep.subr.bf16.mxu0 %v6935_v56 }
 0x262   :  { %5182 = vmatpush3.bf16.msra.mxu1 %v6570_v60 }
 0x263   :  { %5246 = vmatpush3.bf16.msra.mxu0 %v6942_v51  ;;  %5183 = vmatprep.subr.bf16.mxu1 %v6578_v2 }
 0x264   :  { %5247 = vmatprep.subr.bf16.mxu0 %v6949_v32 }
 0x266   :  { %5184 = vmatpush3.bf16.msra.mxu1 %v6586_v5 }
 0x267   :  { %5248 = vmatpush3.bf16.msra.mxu0 %v6956_v33  ;;  %5185 = vmatprep.subr.bf16.mxu1 %v6593_v6 }
 0x268   :  { %5249 = vmatprep.subr.bf16.mxu0 %v6963_v50 }
 0x26a   :  { %5186 = vmatpush3.bf16.msra.mxu1 %v6604_v40 }
 0x26b   :  { %5250 = vmatpush3.bf16.msra.mxu0 %v6970_v52  ;;  %5187 = vmatprep.subr.bf16.mxu1 %v6611_v21 }
 0x26c   :  { %v4907_v15 = vpop.f32.mrb[0].mxu1  ;;  %5251 = vmatprep.subr.bf16.mxu0 %v6977_v61 }
 0x26d   :  { %v4908_v42 = vpop.f32.mrb[1].mxu1 }
 0x26e   :  { %v4909_v54 = vadd.f32 %v4908_v42, %v4907_v15  ;;  %5188 = vmatpush3.bf16.msra.mxu1 %v6619_v26  ;;  %v4910_v58 = vpop.f32.mrb[2].mxu1  ;;  %v7138_v42 = vld [vmem:[%s8176_s3 + $0xf0] sm:$0xff]  }
 0x26f   :  { %5252 = vmatpush3.bf16.msra.mxu0 %v6984_v3  ;;  %v4911_v27 = vpop.f32.mrb[3].mxu1  ;;  %5189 = vmatprep.subr.bf16.mxu1 %v6626_v28  ;;  %v2233_v58 = vcombine.high %v7130_v18, %v7130_v18 }
 0x270   :  { %v4951_v57 = vpop.f32.mrb[32].mxu0  ;;  %5253 = vmatprep.subr.bf16.mxu0 %v6991_v38  ;;  %v7156_v27 = vld [vmem:[%s8176_s3 + $0xf8] sm:$0xff]  }
 0x271   :  { %v4952_v19 = vpop.f32.mrb[33].mxu0 }
 0x272   :  { %v4953_v21 = vadd.f32 %v4952_v19, %v4951_v57  ;;  %5190 = vmatpush3.bf16.msra.mxu1 %v6635_v16  ;;  %v4954_v61 = vpop.f32.mrb[34].mxu0  ;;  %v7144_v19 = vld.sshfl [vmem:[#allocation2 + $0x22] sm:$0x33 pattern:$0x76325410]  ;;  %v7159_v57 = vpack.c.bf16 %v2233_v58, %v2233_v58 }
 0x273   :  { %5254 = vmatpush3.bf16.msra.mxu0 %v6998_v24  ;;  %v4955_v15 = vpop.f32.mrb[35].mxu0  ;;  %5191 = vmatprep.subr.bf16.mxu1 %v6642_v31  ;;  %v7149_v61 = vld [vmem:[%s8176_s3 + $0xb0] sm:$0xff]  }
 0x274   :  { %5255 = vmatprep.subr.bf16.mxu0 %v7138_v42  ;;  %8295 = vst [vmem:[#allocation35_spill] sm:$0xff] %v7159_v57  ;;  %v8296_v15 = vld [vmem:[#allocation14_spill] sm:$0xff] }
 0x276   :  { %5192 = vmatpush3.bf16.msra.mxu1 %v6653_v48  ;;  %v2400_v48 = vcombine.high %v7144_v19, %v7144_v19 }
 0x277   :  { %5256 = vmatpush3.bf16.msra.mxu0 %v7149_v61  ;;  %5221 = vmatprep.subr.bf16.mxu1 %v6660_v1  ;;  %v7169_v1 = vld [vmem:[%s8176_s3 + $0xb8] sm:$0xff]  }
 0x278   :  { %5257 = vmatprep.subr.bf16.mxu0 %v7156_v27  ;;  %v7174_v58 = vpack.c.bf16 %v2400_v48, %v2400_v48 }
 0x279   :  { %2162 = vmatmul.mubr.bf16.vlgmr.msra.gmra.mrb[28].mxu1 %v8296_v15 }
 0x27a   :  { %5222 = vmatpush3.bf16.msra.mxu1 %v6671_v25  ;;  %2270 = vmatprep.mubr.bf16.mxu1 %v7159_v57  ;;  %8297 = vst [vmem:[#allocation14_spill] sm:$0xff] %v7174_v58 }
 0x27b   :  { %5258 = vmatpush3.bf16.msra.mxu0 %v7169_v1  ;;  %5223 = vmatprep.subr.bf16.mxu1 %v6682_v41 }
 0x27c   :  { %5287 = vmatprep.subr.bf16.mxu0 %v6855_v11 }
 0x27e   :  { %2344 = vmatmul.mubr.bf16.vlgmr.msra.gmra.mrb[60].mxu0 %v6905_v36  ;;  %5224 = vmatpush3.bf16.msra.mxu1 %v6695_v22 }
 0x27f   :  { %5288 = vmatpush3.bf16.msra.mxu0 %v6864_v23  ;;  %2437 = vmatprep.mubr.bf16.mxu0 %v7174_v58 }
 0x280   :  { %5225 = vmatprep.subr.bf16.mxu1 %v6706_v30  ;;  %5289 = vmatprep.subr.bf16.mxu0 %v6872_v35 }
 0x282   :  { %5226 = vmatpush3.bf16.msra.mxu1 %v6715_v7 }
 0x283   :  { %5290 = vmatpush3.bf16.msra.mxu0 %v6879_v37  ;;  %5227 = vmatprep.subr.bf16.mxu1 %v6722_v39 }
 0x284   :  { %5291 = vmatprep.subr.bf16.mxu0 %v7030_v63 }
 0x286   :  { %5228 = vmatpush3.bf16.msra.mxu1 %v6732_v53 }
 0x287   :  { %5292 = vmatpush3.bf16.msra.mxu0 %v7037_v13  ;;  %5229 = vmatprep.subr.bf16.mxu1 %v6739_v9  ;;  %v8298_v9 = vld [vmem:[#allocation24_spill] sm:$0xff] }
 0x288   :  { %5293 = vmatprep.subr.bf16.mxu0 %v7044_v17 }
 0x28a   :  { %5230 = vmatpush3.bf16.msra.mxu1 %v6748_v62 }
 0x28b   :  { %5294 = vmatpush3.bf16.msra.mxu0 %v7051_v45  ;;  %5231 = vmatprep.subr.bf16.mxu1 %v6755_v8 }
 0x28c   :  { %v4929_v48 = vpop.f32.mrb[4].mxu1  ;;  %5295 = vmatprep.subr.bf16.mxu0 %v7058_v44 }
 0x28d   :  { %v4930_v36 = vpop.f32.mrb[5].mxu1 }
 0x28e   :  { %v4931_v15 = vadd.f32 %v4930_v36, %v4929_v48  ;;  %v4932_v58 = vpop.f32.mrb[6].mxu1  ;;  %5232 = vmatpush3.bf16.msra.mxu1 %v6764_v59  ;;  %v8299_v48 = vld [vmem:[#allocation33_spill] sm:$0xff] }
 0x28f   :  { %5296 = vmatpush3.bf16.msra.mxu0 %v7065_v12  ;;  %v4933_v57 = vpop.f32.mrb[7].mxu1  ;;  %5233 = vmatprep.subr.bf16.mxu1 %v8275_v4 }
 0x290   :  { %v1292_v17 = vadd.f32 %v4931_v15, %v4909_v54  ;;  %5297 = vmatprep.subr.bf16.mxu0 %v7072_v14  ;;  %v7207_v54 = vpack.c.bf16 %v7130_v18, %v7130_v18  ;;  %v8300_v18 = vld [vmem:[#allocation19_spill] sm:$0xff] }
 0x291   :  { %v4995_v62 = vpop.f32.mrb[36].mxu0  ;;  %v7264_v57 = vld.sshfl [vmem:[#allocation2 + $0x2a] sm:$0x33 pattern:$0x76325410] }
 0x292   :  { %v4996_v45 = vpop.f32.mrb[37].mxu0  ;;  %5234 = vmatpush3.bf16.msra.mxu1 %v8298_v9  ;;  %v1447_v8 = vadd.f32 %v4953_v21, %v1292_v17  ;;  %v7213_v21 = vld [vmem:[%s8176_s3 + $0x40] sm:$0xff]   ;;  %v7228_v17 = vld [vmem:[%s8176_s3 + $0x138] sm:$0xff]  }
 0x293   :  { %v7199_v13 = vadd.f32 %v4996_v45, %v4995_v62  ;;  %v4998_v44 = vpop.f32.mrb[38].mxu0  ;;  %5298 = vmatpush3.bf16.msra.mxu0 %v7079_v34  ;;  %5235 = vmatprep.subr.bf16.mxu1 %v6787_v47  ;;  %v7219_v62 = vld [vmem:[%s8176_s3 + $0x178] sm:$0xff]   ;;  %v7234_v45 = vpack.c.bf16 %v7144_v19, %v7144_v19 }
 0x294   :  { %v4999_v58 = vpop.f32.mrb[39].mxu0  ;;  %5299 = vmatprep.subr.bf16.mxu0 %v8299_v48 }
 0x295   :  { %8301 = vst [vmem:[#allocation24_spill] sm:$0xff] %v7234_v45 }
 0x296   :  { %5236 = vmatpush3.bf16.msra.mxu1 %v6795_v10 }
 0x297   :  { %5300 = vmatpush3.bf16.msra.mxu0 %v7095_v0  ;;  %5265 = vmatprep.subr.bf16.mxu1 %v7213_v21 }
 0x298   :  { %5301 = vmatprep.subr.bf16.mxu0 %v7219_v62 }
 0x299   :  { %2271 = vmatmul.mubr.bf16.vlgmr.msra.gmra.mrb[32].mxu1 %v7207_v54 }
 0x29a   :  { %5266 = vmatpush3.bf16.msra.mxu1 %v6538_v29  ;;  %2383 = vmatprep.mubr.bf16.mxu1 %v8300_v18  ;;  %v8302_v29 = vld [vmem:[#allocation27_spill] sm:$0xff] }
 0x29b   :  { %5302 = vmatpush3.bf16.msra.mxu0 %v7228_v17  ;;  %5267 = vmatprep.subr.bf16.mxu1 %v6543_v43  ;;  %v8303_v43 = vld [vmem:[#allocation15_spill] sm:$0xff] }
 0x29c   :  { %5331 = vmatprep.subr.bf16.mxu0 %v6919_v20 }
 0x29e   :  { %2438 = vmatmul.mubr.bf16.vlgmr.msra.gmra.mrb[64].mxu0 %v7234_v45  ;;  %5268 = vmatpush3.bf16.msra.mxu1 %v6552_v46 }
 0x29f   :  { %5332 = vmatpush3.bf16.msra.mxu0 %v6927_v49  ;;  %2575 = vmatprep.mubr.bf16.mxu0 %v8302_v29 }
 0x2a0   :  { %5269 = vmatprep.subr.bf16.mxu1 %v6560_v55  ;;  %5333 = vmatprep.subr.bf16.mxu0 %v6935_v56  ;;  %v8304_v55 = vld [vmem:[#allocation11_spill] sm:$0xff] }
 0x2a2   :  { %5270 = vmatpush3.bf16.msra.mxu1 %v6570_v60 }
 0x2a3   :  { %5334 = vmatpush3.bf16.msra.mxu0 %v6942_v51  ;;  %5271 = vmatprep.subr.bf16.mxu1 %v6578_v2 }
 0x2a4   :  { %5335 = vmatprep.subr.bf16.mxu0 %v6949_v32 }
 0x2a6   :  { %5272 = vmatpush3.bf16.msra.mxu1 %v6586_v5  ;;  %v7259_v5 = vld [vmem:[%s8177_s4] ss:$0 sm:$0xff] }
 0x2a7   :  { %5336 = vmatpush3.bf16.msra.mxu0 %v6956_v33  ;;  %5273 = vmatprep.subr.bf16.mxu1 %v6593_v6  ;;  %8305 = vst [vmem:[#allocation33_spill] sm:$0xff] %v7259_v5 }
 0x2a8   :  { %5337 = vmatprep.subr.bf16.mxu0 %v6963_v50 }
 0x2aa   :  { %5274 = vmatpush3.bf16.msra.mxu1 %v6604_v40 }
 0x2ab   :  { %5338 = vmatpush3.bf16.msra.mxu0 %v6970_v52  ;;  %5275 = vmatprep.subr.bf16.mxu1 %v8303_v43  ;;  %v4671_v43 = vld.sshfl [vmem:[#allocation2 + $0x24] sm:$0x33 pattern:$0x76325410] }
 0x2ac   :  { %v4973_v46 = vpop.f32.mrb[8].mxu1  ;;  %5339 = vmatprep.subr.bf16.mxu0 %v8304_v55 }
 0x2ad   :  { %v4974_v60 = vpop.f32.mrb[9].mxu1 }
 0x2ae   :  { %v4975_v2 = vadd.f32 %v4974_v60, %v4973_v46  ;;  %v4976_v44 = vpop.f32.mrb[10].mxu1  ;;  %5276 = vmatpush3.bf16.msra.mxu1 %v6619_v26  ;;  %v2632_v60 = vcombine.high %v4671_v43, %v4671_v43 }
 0x2af   :  { %5340 = vmatpush3.bf16.msra.mxu0 %v6984_v3  ;;  %v4977_v6 = vpop.f32.mrb[11].mxu1  ;;  %5277 = vmatprep.subr.bf16.mxu1 %v6626_v28  ;;  %v2455_v28 = vcombine.high %v7264_v57, %v7264_v57  ;;  %v8310_v44 = vld [vmem:[#allocation34_spill] sm:$0xff] }
 0x2b0   :  { %v1598_v40 = vadd.f32 %v4975_v2, %v1447_v8  ;;  %5341 = vmatprep.subr.bf16.mxu0 %v6991_v38  ;;  %v8306_v8 = vld [vmem:[#allocation16_spill] sm:$0xff]  ;;  %v7286_v2 = vpack.c.bf16 %v2632_v60, %v2632_v60  ;;  %v8314_v6 = vld [vmem:[#allocation21_spill] sm:$0xff] }
 0x2b1   :  { %v5039_v19 = vpop.f32.mrb[40].mxu0  ;;  %v7278_v46 = vpack.c.bf16 %v2455_v28, %v2455_v28 }
 0x2b2   :  { %v1605_v36 = vadd.f32 %v7259_v5, %v1598_v40  ;;  %v5040_v15 = vpop.f32.mrb[41].mxu0  ;;  %5278 = vmatpush3.bf16.msra.mxu1 %v6635_v16  ;;  %v8307_v16 = vld [vmem:[#allocation17_spill] sm:$0xff]  ;;  %8309 = vst [vmem:[#allocation19_spill] sm:$0xff] %v7286_v2  ;;  %v8316_v40 = vld [vmem:[#allocation22_spill] sm:$0xff] }
 0x2b3   :  { %v5041_v26 = vadd.f32 %v5040_v15, %v5039_v19  ;;  %v5042_v58 = vpop.f32.mrb[42].mxu0  ;;  %5342 = vmatpush3.bf16.msra.mxu0 %v6998_v24  ;;  %5279 = vmatprep.subr.bf16.mxu1 %v6642_v31  ;;  %v8308_v31 = vld [vmem:[#allocation25_spill] sm:$0xff] }
 0x2b4   :  { %v1606_v18 = vmax.f32 %v1605_v36, 0.0  ;;  %v5043_v29 = vpop.f32.mrb[43].mxu0  ;;  %5343 = vmatprep.subr.bf16.mxu0 %v7138_v42  ;;  %v8317_v36 = vld [vmem:[#allocation32_spill] sm:$0xff] }
 0x2b6   :  { %1607 = vst.msk [vmem:[#allocation3] sm:$0x3] %vm384_vm0, %v1606_v18  ;;  %5280 = vmatpush3.bf16.msra.mxu1 %v8306_v8 }
 0x2b7   :  { %5344 = vmatpush3.bf16.msra.mxu0 %v7149_v61  ;;  %5309 = vmatprep.subr.bf16.mxu1 %v8307_v16 }
 0x2b8   :  { %5345 = vmatprep.subr.bf16.mxu0 %v7156_v27 }
 0x2b9   :  { %2384 = vmatmul.mubr.bf16.vlgmr.msra.gmra.mrb[36].mxu1 %v8308_v31 }
 0x2ba   :  { %5310 = vmatpush3.bf16.msra.mxu1 %v6671_v25  ;;  %2492 = vmatprep.mubr.bf16.mxu1 %v7278_v46  ;;  %v8311_v25 = vld [vmem:[#allocation29_spill] sm:$0xff] }
 0x2bb   :  { %5346 = vmatpush3.bf16.msra.mxu0 %v7169_v1  ;;  %5311 = vmatprep.subr.bf16.mxu1 %v6682_v41  ;;  %v8312_v41 = vld [vmem:[#allocation20_spill] sm:$0xff] }
 0x2bc   :  { %5375 = vmatprep.subr.bf16.mxu0 %v6855_v11 }
 0x2be   :  { %2576 = vmatmul.mubr.bf16.vlgmr.msra.gmra.mrb[68].mxu0 %v8310_v44  ;;  %5312 = vmatpush3.bf16.msra.mxu1 %v6695_v22  ;;  %v8313_v22 = vld [vmem:[#allocation30_spill] sm:$0xff] }
 0x2bf   :  { %5376 = vmatpush3.bf16.msra.mxu0 %v6864_v23  ;;  %2669 = vmatprep.mubr.bf16.mxu0 %v7286_v2 }
 0x2c0   :  { %5313 = vmatprep.subr.bf16.mxu1 %v6706_v30  ;;  %5377 = vmatprep.subr.bf16.mxu0 %v6872_v35  ;;  %v8315_v30 = vld [vmem:[#allocation31_spill] sm:$0xff] }
 0x2c2   :  { %5314 = vmatpush3.bf16.msra.mxu1 %v6715_v7 }
 0x2c3   :  { %5378 = vmatpush3.bf16.msra.mxu0 %v6879_v37  ;;  %5315 = vmatprep.subr.bf16.mxu1 %v6722_v39 }
 0x2c4   :  { %5379 = vmatprep.subr.bf16.mxu0 %v7030_v63 }
 0x2c6   :  { %5316 = vmatpush3.bf16.msra.mxu1 %v6732_v53 }
 0x2c7   :  { %5380 = vmatpush3.bf16.msra.mxu0 %v8311_v25  ;;  %5317 = vmatprep.subr.bf16.mxu1 %v8312_v41 }
 0x2c8   :  { %5381 = vmatprep.subr.bf16.mxu0 %v8313_v22 }
 0x2ca   :  { %5318 = vmatpush3.bf16.msra.mxu1 %v8314_v6 }
 0x2cb   :  { %5382 = vmatpush3.bf16.msra.mxu0 %v8315_v30  ;;  %5319 = vmatprep.subr.bf16.mxu1 %v8316_v40 }
 0x2cc   :  { %v5017_v19 = vpop.f32.mrb[12].mxu1  ;;  %5383 = vmatprep.subr.bf16.mxu0 %v8317_v36 }
 0x2cd   :  { %v5018_v15 = vpop.f32.mrb[13].mxu1 }
 0x2ce   :  { %v5019_v58 = vadd.f32 %v5018_v15, %v5017_v19  ;;  %v5020_v18 = vpop.f32.mrb[14].mxu1  ;;  %5320 = vmatpush3.bf16.msra.mxu1 %v6764_v59  ;;  %v8319_v15 = vld [vmem:[#allocation26_spill] sm:$0xff] }
 0x2cf   :  { %5384 = vmatpush3.bf16.msra.mxu0 %v7065_v12  ;;  %v5021_v29 = vpop.f32.mrb[15].mxu1  ;;  %5321 = vmatprep.subr.bf16.mxu1 %v8275_v4  ;;  %v7347_v18 = vld [vmem:[%s8176_s3 + $0x8] sm:$0xff]  }
 0x2d0   :  { %v1711_v28 = vadd.f32 %v5019_v58, %v7199_v13  ;;  %5385 = vmatprep.subr.bf16.mxu0 %v7072_v14  ;;  %v7320_v13 = vpack.c.bf16 %v7264_v57, %v7264_v57  ;;  %v7337_v57 = vld [vmem:[%s8176_s3 + $0x48] sm:$0xff]   ;;  %v7340_v58 = vpack.c.bf16 %v4671_v43, %v4671_v43  ;;  %v7355_v43 = vld [vmem:[%s8176_s3 + $0x50] sm:$0xff]  }
 0x2d1   :  { %v5083_v8 = vpop.f32.mrb[44].mxu0  ;;  %v8321_v29 = vld [vmem:[#allocation35_spill] sm:$0xff] }
 0x2d2   :  { %v5084_v16 = vpop.f32.mrb[45].mxu0  ;;  %5322 = vmatpush3.bf16.msra.mxu1 %v8298_v9  ;;  %v1770_v31 = vadd.f32 %v5041_v26, %v1711_v28  ;;  %8318 = vst [vmem:[#allocation27_spill] sm:$0xff] %v7320_v13  ;;  %v7329_v26 = vld [vmem:[%s8176_s3] sm:$0xff]   ;;  %8320 = vst [vmem:[#allocation15_spill] sm:$0xff] %v7340_v58  ;;  %v7362_v28 = vld [vmem:[%s8176_s3 + $0x10] sm:$0xff]  }
 0x2d3   :  { %v7312_v60 = vadd.f32 %v5084_v16, %v5083_v8  ;;  %v5086_v44 = vpop.f32.mrb[46].mxu0  ;;  %5386 = vmatpush3.bf16.msra.mxu0 %v7079_v34  ;;  %5323 = vmatprep.subr.bf16.mxu1 %v6787_v47  ;;  %v7369_v8 = vld [vmem:[%s8176_s3 + $0x58] sm:$0xff]  }
 0x2d4   :  { %v5087_v19 = vpop.f32.mrb[47].mxu0  ;;  %5387 = vmatprep.subr.bf16.mxu0 %v8299_v48  ;;  %v7376_v16 = vld [vmem:[%s8176_s3 + $0x18] sm:$0xff]   ;;  %v7383_v44 = vld [vmem:[%s8176_s3 + $0x60] sm:$0xff]  }
 0x2d5   :  { %v7390_v19 = vld [vmem:[%s8176_s3 + $0x20] sm:$0xff]  }
 0x2d6   :  { %5324 = vmatpush3.bf16.msra.mxu1 %v6795_v10  ;;  %8322 = vst [vmem:[#allocation16_spill] sm:$0xff] %v7390_v19 }
 0x2d7   :  { %5388 = vmatpush3.bf16.msra.mxu0 %v7095_v0  ;;  %5353 = vmatprep.subr.bf16.mxu1 %v7213_v21 }
 0x2d8   :  { %5389 = vmatprep.subr.bf16.mxu0 %v7219_v62 }
 0x2d9   :  { %2493 = vmatmul.mubr.bf16.vlgmr.msra.gmra.mrb[40].mxu1 %v7320_v13  ;;  %v7404_v13 = vld [vmem:[%s8176_s3 + $0x28] sm:$0xff]  }
 0x2da   :  { %5354 = vmatpush3.bf16.msra.mxu1 %v7329_v26  ;;  %2615 = vmatprep.mubr.bf16.mxu1 %v8319_v15  ;;  %v7397_v15 = vld [vmem:[%s8176_s3 + $0x68] sm:$0xff]   ;;  %8324 = vst [vmem:[#allocation25_spill] sm:$0xff] %v7404_v13 }
 0x2db   :  { %5390 = vmatpush3.bf16.msra.mxu0 %v7228_v17  ;;  %5355 = vmatprep.subr.bf16.mxu1 %v7337_v57  ;;  %8323 = vst [vmem:[#allocation17_spill] sm:$0xff] %v7397_v15 }
 0x2dc   :  { %5419 = vmatprep.subr.bf16.mxu0 %v6919_v20 }
 0x2de   :  { %2670 = vmatmul.mubr.bf16.vlgmr.msra.gmra.mrb[72].mxu0 %v7340_v58  ;;  %5356 = vmatpush3.bf16.msra.mxu1 %v7347_v18 }
 0x2df   :  { %5420 = vmatpush3.bf16.msra.mxu0 %v6927_v49  ;;  %2796 = vmatprep.mubr.bf16.mxu0 %v8321_v29 }
 0x2e0   :  { %5357 = vmatprep.subr.bf16.mxu1 %v7355_v43  ;;  %5421 = vmatprep.subr.bf16.mxu0 %v6935_v56 }
 0x2e2   :  { %5358 = vmatpush3.bf16.msra.mxu1 %v7362_v28 }
 0x2e3   :  { %5422 = vmatpush3.bf16.msra.mxu0 %v6942_v51  ;;  %5359 = vmatprep.subr.bf16.mxu1 %v7369_v8 }
 0x2e4   :  { %5423 = vmatprep.subr.bf16.mxu0 %v6949_v32 }
 0x2e6   :  { %5360 = vmatpush3.bf16.msra.mxu1 %v7376_v16 }
 0x2e7   :  { %5424 = vmatpush3.bf16.msra.mxu0 %v6956_v33  ;;  %5361 = vmatprep.subr.bf16.mxu1 %v7383_v44 }
 0x2e8   :  { %5425 = vmatprep.subr.bf16.mxu0 %v6963_v50 }
 0x2ea   :  { %5362 = vmatpush3.bf16.msra.mxu1 %v7390_v19 }
 0x2eb   :  { %5426 = vmatpush3.bf16.msra.mxu0 %v6970_v52  ;;  %5363 = vmatprep.subr.bf16.mxu1 %v7397_v15  ;;  %v7411_v15 = vld [vmem:[%s8176_s3 + $0x70] sm:$0xff]  }
 0x2ec   :  { %v5061_v29 = vpop.f32.mrb[16].mxu1  ;;  %5427 = vmatprep.subr.bf16.mxu0 %v8304_v55 }
 0x2ed   :  { %v5062_v58 = vpop.f32.mrb[17].mxu1 }
 0x2ee   :  { %v5063_v2 = vadd.f32 %v5062_v58, %v5061_v29  ;;  %v5064_v45 = vpop.f32.mrb[18].mxu1  ;;  %5364 = vmatpush3.bf16.msra.mxu1 %v7404_v13  ;;  %v7415_v58 = vld.sshfl [vmem:[#allocation2 + $0x2c] sm:$0x33 pattern:$0x76325410] }
 0x2ef   :  { %5428 = vmatpush3.bf16.msra.mxu0 %v6984_v3  ;;  %v5065_v52 = vpop.f32.mrb[19].mxu1  ;;  %5365 = vmatprep.subr.bf16.mxu1 %v7411_v15 }
 0x2f0   :  { %v1825_v55 = vadd.f32 %v5063_v2, %v1770_v31  ;;  %5429 = vmatprep.subr.bf16.mxu0 %v6991_v38  ;;  %v7421_v52 = vld [vmem:[%s8176_s3 + $0x30] sm:$0xff]   ;;  %v7428_v2 = vld [vmem:[%s8176_s3 + $0x78] sm:$0xff]  }
 0x2f1   :  { %v5127_v45 = vpop.f32.mrb[48].mxu0 }
 0x2f2   :  { %v1826_v29 = vadd.f32 %v7259_v5, %v1825_v55  ;;  %v5128_v19 = vpop.f32.mrb[49].mxu0  ;;  %5366 = vmatpush3.bf16.msra.mxu1 %v7421_v52  ;;  %v2687_v5 = vcombine.high %v7415_v58, %v7415_v58 }
 0x2f3   :  { %v5129_v3 = vadd.f32 %v5128_v19, %v5127_v45  ;;  %v5130_v13 = vpop.f32.mrb[50].mxu0  ;;  %5430 = vmatpush3.bf16.msra.mxu0 %v6998_v24  ;;  %5367 = vmatprep.subr.bf16.mxu1 %v7428_v2  ;;  %v8326_v19 = vld [vmem:[#allocation9_spill] sm:$0xff]  ;;  %v7441_v24 = vld.sshfl [vmem:[#allocation2 + $0x30] sm:$0x33 pattern:$0x76325410] }
 0x2f4   :  { %v1827_v55 = vmax.f32 %v1826_v29, 0.0  ;;  %v5131_v31 = vpop.f32.mrb[51].mxu0  ;;  %5431 = vmatprep.subr.bf16.mxu0 %v7138_v42  ;;  %v7437_v13 = vld [vmem:[%s8176_s3 + $0x38] sm:$0xff]   ;;  %v7447_v29 = vld [vmem:[%s8176_s3 + $0x1c0] sm:$0xff]  }
 0x2f5   :  { %8325 = vst [vmem:[#allocation34_spill] sm:$0xff] %v7437_v13  ;;  %v7452_v31 = vpack.c.bf16 %v2687_v5, %v2687_v5  ;;  %v7468_v5 = vld [vmem:[%s8176_s3 + $0x1c8] sm:$0xff]  }
 0x2f6   :  { %5368 = vmatpush3.bf16.msra.mxu1 %v7437_v13  ;;  %v1835_v45 = vrot.slane %v1827_v55, %v8326_v19  ;;  %v8328_v13 = vld [vmem:[#allocation10_spill] sm:$0xff]  ;;  %v2853_v55 = vcombine.high %v7441_v24, %v7441_v24 }
 0x2f7   :  { %5432 = vmatpush3.bf16.msra.mxu0 %v7149_v61  ;;  %5397 = vmatprep.subr.bf16.mxu1 %v7447_v29  ;;  %8327 = vst [vmem:[#allocation29_spill] sm:$0xff] %v7452_v31  ;;  %v7460_v19 = vld [vmem:[%s8176_s3 + $0x180] sm:$0xff]  }
 0x2f8   :  { %1836 = vrot.lane.b32.xlu1 %v1835_v45, %s6032_s17  ;;  %5433 = vmatprep.subr.bf16.mxu0 %v7156_v27  ;;  %v7476_v45 = vld [vmem:[%s8176_s3 + $0x188] sm:$0xff]  }
 0x2f9   :  { %2616 = vmatmul.mubr.bf16.vlgmr.msra.gmra.mrb[44].mxu1 %v8328_v13  ;;  %v2857_v13 = vpack.c.bf16 %v2853_v55, %v2853_v55 }
 0x2fa   :  { %5398 = vmatpush3.bf16.msra.mxu1 %v7460_v19  ;;  %2724 = vmatprep.mubr.bf16.mxu1 %v7452_v31  ;;  %v7483_v31 = vld [vmem:[%s8176_s3 + $0x1d0] sm:$0xff]  }
 0x2fb   :  { %5434 = vmatpush3.bf16.msra.mxu0 %v7169_v1  ;;  %5399 = vmatprep.subr.bf16.mxu1 %v7468_v5 }
 0x2fc   :  { %5463 = vmatprep.subr.bf16.mxu0 %v6855_v11 }
 0x2fe   :  { %2797 = vmatmul.mubr.bf16.vlgmr.msra.gmra.mrb[76].mxu0 %v7207_v54  ;;  %5400 = vmatpush3.bf16.msra.mxu1 %v7476_v45 }
 0x2ff   :  { %5464 = vmatpush3.bf16.msra.mxu0 %v6864_v23  ;;  %2890 = vmatprep.mubr.bf16.mxu0 %v2857_v13 }
 0x300   :  { %5401 = vmatprep.subr.bf16.mxu1 %v7483_v31  ;;  %5465 = vmatprep.subr.bf16.mxu0 %v6872_v35 }
 0x302   :  { %5402 = vmatpush3.bf16.msra.mxu1 %v6715_v7 }
 0x303   :  { %5466 = vmatpush3.bf16.msra.mxu0 %v6879_v37  ;;  %5403 = vmatprep.subr.bf16.mxu1 %v6722_v39 }
 0x304   :  { %5467 = vmatprep.subr.bf16.mxu0 %v7030_v63 }
 0x306   :  { %5404 = vmatpush3.bf16.msra.mxu1 %v6732_v53 }
 0x307   :  { %5468 = vmatpush3.bf16.msra.mxu0 %v8311_v25  ;;  %5405 = vmatprep.subr.bf16.mxu1 %v8312_v41 }
 0x308   :  { %5469 = vmatprep.subr.bf16.mxu0 %v8313_v22 }
 0x30a   :  { %5406 = vmatpush3.bf16.msra.mxu1 %v8314_v6 }
 0x30b   :  { %5470 = vmatpush3.bf16.msra.mxu0 %v8315_v30  ;;  %5407 = vmatprep.subr.bf16.mxu1 %v8316_v40 }
 0x30c   :  { %v5105_v7 = vpop.f32.mrb[20].mxu1  ;;  %5471 = vmatprep.subr.bf16.mxu0 %v8317_v36 }
 0x30d   :  { %v5106_v39 = vpop.f32.mrb[21].mxu1 }
 0x30e   :  { %v5107_v54 = vadd.f32 %v5106_v39, %v5105_v7  ;;  %v5108_v55 = vpop.f32.mrb[22].mxu1  ;;  %5408 = vmatpush3.bf16.msra.mxu1 %v6764_v59 }
 0x30f   :  { %5472 = vmatpush3.bf16.msra.mxu0 %v7065_v12  ;;  %v5109_v53 = vpop.f32.mrb[23].mxu1  ;;  %5409 = vmatprep.subr.bf16.mxu1 %v8275_v4  ;;  %v7513_v4 = vpack.c.bf16 %v7415_v58, %v7415_v58  ;;  %v8335_v55 = vld [vmem:[#allocation25_spill] sm:$0xff] }
 0x310   :  { %v1943_v41 = vadd.f32 %v5107_v54, %v7312_v60  ;;  %5473 = vmatprep.subr.bf16.mxu0 %v7072_v14  ;;  %v8334_v60 = vld [vmem:[#allocation11_spill] sm:$0xff]  ;;  %v8336_v53 = vld [vmem:[#allocation12_spill] sm:$0xff] }
 0x311   :  { %v5171_v6 = vpop.f32.mrb[52].mxu0  ;;  %8329 = vst [vmem:[#allocation20_spill] sm:$0xff] %v7513_v4 }
 0x312   :  { %v5172_v13 = vpop.f32.mrb[53].mxu0  ;;  %5410 = vmatpush3.bf16.msra.mxu1 %v8298_v9  ;;  %v2002_v40 = vadd.f32 %v5129_v3, %v1943_v41  ;;  %v8330_v9 = vld [vmem:[#allocation28_spill] sm:$0xff]  ;;  %v8332_v3 = vld [vmem:[#allocation23_spill] sm:$0xff] }
 0x313   :  { %v7505_v36 = vadd.f32 %v5172_v13, %v5171_v6  ;;  %v5174_v7 = vpop.f32.mrb[54].mxu0  ;;  %5474 = vmatpush3.bf16.msra.mxu0 %v7079_v34  ;;  %5411 = vmatprep.subr.bf16.mxu1 %v6787_v47  ;;  %v2856_v47 = vpack.c.bf16 %v7441_v24, %v7441_v24  ;;  %v8333_v24 = vld [vmem:[#allocation17_spill] sm:$0xff] }
 0x314   :  { %v5175_v59 = vpop.f32.mrb[55].mxu0  ;;  %5475 = vmatprep.subr.bf16.mxu0 %v8299_v48  ;;  %v7547_v7 = vld.sshfl [vmem:[#allocation2 + $0x38] sm:$0x33 pattern:$0x76325410] }
 0x315   :  { %v8337_v59 = vld [vmem:[#allocation33_spill] sm:$0xff] }
 0x316   :  { %5412 = vmatpush3.bf16.msra.mxu1 %v6795_v10  ;;  %v8331_v10 = vld [vmem:[#allocation16_spill] sm:$0xff] }
 0x317   :  { %5476 = vmatpush3.bf16.msra.mxu0 %v7095_v0  ;;  %5441 = vmatprep.subr.bf16.mxu1 %v7213_v21 }
 0x318   :  { %5477 = vmatprep.subr.bf16.mxu0 %v7219_v62 }
 0x319   :  { %2725 = vmatmul.mubr.bf16.vlgmr.msra.gmra.mrb[48].mxu1 %v7513_v4 }
 0x31a   :  { %5442 = vmatpush3.bf16.msra.mxu1 %v7329_v26  ;;  %2836 = vmatprep.mubr.bf16.mxu1 %v8330_v9 }
 0x31b   :  { %5478 = vmatpush3.bf16.msra.mxu0 %v7228_v17  ;;  %5443 = vmatprep.subr.bf16.mxu1 %v7337_v57 }
 0x31c   :  { %5507 = vmatprep.subr.bf16.mxu0 %v6919_v20 }
 0x31e   :  { %2891 = vmatmul.mubr.bf16.vlgmr.msra.gmra.mrb[80].mxu0 %v2856_v47  ;;  %5444 = vmatpush3.bf16.msra.mxu1 %v7347_v18 }
 0x31f   :  { %5508 = vmatpush3.bf16.msra.mxu0 %v6927_v49  ;;  %3018 = vmatprep.mubr.bf16.mxu0 %v7278_v46 }
 0x320   :  { %5445 = vmatprep.subr.bf16.mxu1 %v7355_v43  ;;  %5509 = vmatprep.subr.bf16.mxu0 %v6935_v56 }
 0x322   :  { %5446 = vmatpush3.bf16.msra.mxu1 %v7362_v28 }
 0x323   :  { %5510 = vmatpush3.bf16.msra.mxu0 %v6942_v51  ;;  %5447 = vmatprep.subr.bf16.mxu1 %v7369_v8 }
 0x324   :  { %5511 = vmatprep.subr.bf16.mxu0 %v6949_v32 }
 0x326   :  { %5448 = vmatpush3.bf16.msra.mxu1 %v7376_v16 }
 0x327   :  { %5512 = vmatpush3.bf16.msra.mxu0 %v6956_v33  ;;  %5449 = vmatprep.subr.bf16.mxu1 %v7383_v44 }
 0x328   :  { %5513 = vmatprep.subr.bf16.mxu0 %v6963_v50 }
 0x32a   :  { %5450 = vmatpush3.bf16.msra.mxu1 %v8331_v10 }
 0x32b   :  { %5514 = vmatpush3.bf16.msra.mxu0 %v8332_v3  ;;  %5451 = vmatprep.subr.bf16.mxu1 %v8333_v24 }
 0x32c   :  { %v5149_v46 = vpop.f32.mrb[24].mxu1  ;;  %5515 = vmatprep.subr.bf16.mxu0 %v8334_v60 }
 0x32d   :  { %v5150_v58 = vpop.f32.mrb[25].mxu1 }
 0x32e   :  { %v5151_v39 = vadd.f32 %v5150_v58, %v5149_v46  ;;  %v5152_v54 = vpop.f32.mrb[26].mxu1  ;;  %5452 = vmatpush3.bf16.msra.mxu1 %v8335_v55 }
 0x32f   :  { %5516 = vmatpush3.bf16.msra.mxu0 %v8336_v53  ;;  %v5153_v41 = vpop.f32.mrb[27].mxu1  ;;  %5453 = vmatprep.subr.bf16.mxu1 %v7411_v15  ;;  %v8338_v54 = vld [vmem:[#allocation18_spill] sm:$0xff] }
 0x330   :  { %v2057_v6 = vadd.f32 %v5151_v39, %v2002_v40  ;;  %5517 = vmatprep.subr.bf16.mxu0 %v6991_v38  ;;  %v2908_v40 = vcombine.high %v7547_v7, %v7547_v7  ;;  %v8339_v39 = vld [vmem:[#allocation34_spill] sm:$0xff] }
 0x331   :  { %v5215_v13 = vpop.f32.mrb[56].mxu0 }
 0x332   :  { %v2058_v9 = vadd.f32 %v8337_v59, %v2057_v6  ;;  %v5216_v47 = vpop.f32.mrb[57].mxu0  ;;  %5454 = vmatpush3.bf16.msra.mxu1 %v7421_v52  ;;  %v7560_v6 = vld.sshfl [vmem:[#allocation2 + $0x32] sm:$0x33 pattern:$0x76325410] }
 0x333   :  { %v7551_v46 = vadd.f32 %v5216_v47, %v5215_v13  ;;  %v5218_v58 = vpop.f32.mrb[58].mxu0  ;;  %5518 = vmatpush3.bf16.msra.mxu0 %v8338_v54  ;;  %5455 = vmatprep.subr.bf16.mxu1 %v7428_v2  ;;  %v2912_v13 = vpack.c.bf16 %v2908_v40, %v2908_v40  ;;  %v7580_v54 = vld [vmem:[%s8176_s3 + $0x190] sm:$0xff]  }
 0x334   :  { %v2059_v41 = vmax.f32 %v2058_v9, 0.0  ;;  %v5219_v4 = vpop.f32.mrb[59].mxu0  ;;  %5519 = vmatprep.subr.bf16.mxu0 %v7138_v42  ;;  %v8340_v9 = vld [vmem:[#allocation13_spill] sm:$0xff]  ;;  %v8341_v58 = vld [vmem:[#allocation27_spill] sm:$0xff] }
 0x335   :  { %v3075_v4 = vcombine.high %v7560_v6, %v7560_v6 }
 0x336   :  { %2060 = vst.msk [vmem:[#allocation3 + $0x2] sm:$0x3] %vm384_vm0, %v2059_v41  ;;  %5456 = vmatpush3.bf16.msra.mxu1 %v8339_v39  ;;  %v8342_v41 = vld [vmem:[#allocation32_spill] sm:$0xff] }
 0x337   :  { %5520 = vmatpush3.bf16.msra.mxu0 %v7149_v61  ;;  %5485 = vmatprep.subr.bf16.mxu1 %v7447_v29  ;;  %v3079_v47 = vpack.c.bf16 %v3075_v4, %v3075_v4  ;;  %v7629_v4 = vld [vmem:[%s8176_s3 + $0x1f0] sm:$0xff]  }
 0x338   :  { %5521 = vmatprep.subr.bf16.mxu0 %v7156_v27 }
 0x339   :  { %2837 = vmatmul.mubr.bf16.vlgmr.msra.gmra.mrb[52].mxu1 %v8340_v9  ;;  %v7622_v9 = vld [vmem:[%s8176_s3 + $0x1a8] sm:$0xff]  }
 0x33a   :  { %5486 = vmatpush3.bf16.msra.mxu1 %v7460_v19  ;;  %2945 = vmatprep.mubr.bf16.mxu1 %v2912_v13 }
 0x33b   :  { %5522 = vmatpush3.bf16.msra.mxu0 %v7169_v1  ;;  %5487 = vmatprep.subr.bf16.mxu1 %v7468_v5 }
 0x33c   :  { %5551 = vmatprep.subr.bf16.mxu0 %v6855_v11  ;;  %v7587_v11 = vld [vmem:[%s8176_s3 + $0x1d8] sm:$0xff]  }
 0x33e   :  { %3019 = vmatmul.mubr.bf16.vlgmr.msra.gmra.mrb[84].mxu0 %v8341_v58  ;;  %5488 = vmatpush3.bf16.msra.mxu1 %v7476_v45 }
 0x33f   :  { %5552 = vmatpush3.bf16.msra.mxu0 %v6864_v23  ;;  %3112 = vmatprep.mubr.bf16.mxu0 %v3079_v47  ;;  %v7594_v23 = vld [vmem:[%s8176_s3 + $0x198] sm:$0xff]  }
 0x340   :  { %5489 = vmatprep.subr.bf16.mxu1 %v7483_v31  ;;  %5553 = vmatprep.subr.bf16.mxu0 %v6872_v35  ;;  %v7601_v35 = vld [vmem:[%s8176_s3 + $0x1e0] sm:$0xff]  }
 0x342   :  { %5490 = vmatpush3.bf16.msra.mxu1 %v7580_v54 }
 0x343   :  { %5554 = vmatpush3.bf16.msra.mxu0 %v6879_v37  ;;  %5491 = vmatprep.subr.bf16.mxu1 %v7587_v11  ;;  %v7608_v37 = vld [vmem:[%s8176_s3 + $0x1a0] sm:$0xff]  }
 0x344   :  { %5555 = vmatprep.subr.bf16.mxu0 %v7030_v63  ;;  %v7615_v63 = vld [vmem:[%s8176_s3 + $0x1e8] sm:$0xff]  }
 0x346   :  { %5492 = vmatpush3.bf16.msra.mxu1 %v7594_v23 }
 0x347   :  { %5556 = vmatpush3.bf16.msra.mxu0 %v8311_v25  ;;  %5493 = vmatprep.subr.bf16.mxu1 %v7601_v35 }
 0x348   :  { %5557 = vmatprep.subr.bf16.mxu0 %v8313_v22 }
 0x34a   :  { %5494 = vmatpush3.bf16.msra.mxu1 %v7608_v37 }
 0x34b   :  { %5558 = vmatpush3.bf16.msra.mxu0 %v8315_v30  ;;  %5495 = vmatprep.subr.bf16.mxu1 %v7615_v63 }
 0x34c   :  { %v5193_v25 = vpop.f32.mrb[28].mxu1  ;;  %5559 = vmatprep.subr.bf16.mxu0 %v8342_v41  ;;  %v7637_v41 = vld [vmem:[%s8176_s3 + $0x1b0] sm:$0xff]  }
 0x34d   :  { %v5194_v22 = vpop.f32.mrb[29].mxu1 }
 0x34e   :  { %v5195_v40 = vadd.f32 %v5194_v22, %v5193_v25  ;;  %v5196_v13 = vpop.f32.mrb[30].mxu1  ;;  %5496 = vmatpush3.bf16.msra.mxu1 %v7622_v9 }
 0x34f   :  { %5560 = vmatpush3.bf16.msra.mxu0 %v7065_v12  ;;  %v5197_v30 = vpop.f32.mrb[31].mxu1  ;;  %5497 = vmatprep.subr.bf16.mxu1 %v7629_v4 }
 0x350   :  { %v2164_v47 = vadd.f32 %v5195_v40, %v7505_v36  ;;  %5561 = vmatprep.subr.bf16.mxu0 %v7072_v14  ;;  %v7647_v14 = vld [vmem:[%s8176_s3 + $0x1f8] sm:$0xff]  }
 0x351   :  { %v5259_v58 = vpop.f32.mrb[60].mxu0  ;;  %v7654_v40 = vld [vmem:[%s8176_s3 + $0x1b8] sm:$0xff]  }
 0x352   :  { %v5260_v25 = vpop.f32.mrb[61].mxu0  ;;  %5498 = vmatpush3.bf16.msra.mxu1 %v7637_v41  ;;  %v2223_v12 = vadd.f32 %v7551_v46, %v2164_v47  ;;  %v3078_v46 = vpack.c.bf16 %v7560_v6, %v7560_v6 }
 0x353   :  { %v7641_v22 = vadd.f32 %v5260_v25, %v5259_v58  ;;  %v5262_v13 = vpop.f32.mrb[62].mxu0  ;;  %5562 = vmatpush3.bf16.msra.mxu0 %v7079_v34  ;;  %5499 = vmatprep.subr.bf16.mxu1 %v7647_v14  ;;  %v2911_v34 = vpack.c.bf16 %v7547_v7, %v7547_v7  ;;  %v7691_v7 = vld.sshfl [vmem:[#allocation2 + $0x3a] sm:$0x33 pattern:$0x76325410] }
 0x354   :  { %v5263_v36 = vpop.f32.mrb[63].mxu0  ;;  %5563 = vmatprep.subr.bf16.mxu0 %v8299_v48  ;;  %v8343_v48 = vld [vmem:[#allocation14_spill] sm:$0xff]  ;;  %v3130_v25 = vcombine.high %v7691_v7, %v7691_v7 }
 0x355   :  { %v8345_v36 = vld [vmem:[#allocation24_spill] sm:$0xff] }
 0x356   :  { %5500 = vmatpush3.bf16.msra.mxu1 %v7654_v40  ;;  %v3134_v13 = vpack.c.bf16 %v3130_v25, %v3130_v25 }
 0x357   :  { %5564 = vmatpush3.bf16.msra.mxu0 %v7095_v0  ;;  %5529 = vmatprep.subr.bf16.mxu1 %v7213_v21  ;;  %v8344_v0 = vld [vmem:[#allocation29_spill] sm:$0xff] }
 0x358   :  { %5565 = vmatprep.subr.bf16.mxu0 %v7219_v62 }
 0x359   :  { %2946 = vmatmul.mubr.bf16.vlgmr.msra.gmra.mrb[56].mxu1 %v2911_v34 }
 0x35a   :  { %5530 = vmatpush3.bf16.msra.mxu1 %v7329_v26  ;;  %3058 = vmatprep.mubr.bf16.mxu1 %v8343_v48  ;;  %v5993_v48 = vld [vmem:[%s8176_s3 + $0x100] sm:$0xff]  }
 0x35b   :  { %5566 = vmatpush3.bf16.msra.mxu0 %v7228_v17  ;;  %5531 = vmatprep.subr.bf16.mxu1 %v7337_v57 }
 0x35c   :  { %5595 = vmatprep.subr.bf16.mxu0 %v6919_v20 }
 0x35e   :  { %3113 = vmatmul.mubr.bf16.vlgmr.msra.gmra.mrb[88].mxu0 %v3078_v46  ;;  %5532 = vmatpush3.bf16.msra.mxu1 %v7347_v18  ;;  %v5995_v46 = vld [vmem:[%s8176_s3 + $0x108] sm:$0xff]  }
 0x35f   :  { %5596 = vmatpush3.bf16.msra.mxu0 %v6927_v49  ;;  %3250 = vmatprep.mubr.bf16.mxu0 %v8344_v0  ;;  %v5996_v0 = vld [vmem:[%s8176_s3 + $0x150] sm:$0xff]  }
 0x360   :  { %5533 = vmatprep.subr.bf16.mxu1 %v7355_v43  ;;  %5597 = vmatprep.subr.bf16.mxu0 %v6935_v56 }
 0x362   :  { %5534 = vmatpush3.bf16.msra.mxu1 %v7362_v28 }
 0x363   :  { %5598 = vmatpush3.bf16.msra.mxu0 %v6942_v51  ;;  %5535 = vmatprep.subr.bf16.mxu1 %v7369_v8 }
 0x364   :  { %5599 = vmatprep.subr.bf16.mxu0 %v6949_v32 }
 0x366   :  { %5536 = vmatpush3.bf16.msra.mxu1 %v7376_v16 }
 0x367   :  { %5600 = vmatpush3.bf16.msra.mxu0 %v6956_v33  ;;  %5537 = vmatprep.subr.bf16.mxu1 %v7383_v44 }
 0x368   :  { %5601 = vmatprep.subr.bf16.mxu0 %v6963_v50 }
 0x36a   :  { %5538 = vmatpush3.bf16.msra.mxu1 %v8331_v10  ;;  %v1837_v20 = vpop.permute.xlu1 %1836 }
 0x36b   :  { %5602 = vmatpush3.bf16.msra.mxu0 %v8332_v3  ;;  %1839 = vst.msk [vmem:[#allocation3] sm:$0x3] %vm453_vm1, %v1837_v20  ;;  %5539 = vmatprep.subr.bf16.mxu1 %v8333_v24  ;;  %v5997_v20 = vld [vmem:[%s8176_s3 + $0x110] sm:$0xff]  }
 0x36c   :  { %v5237_v49 = vpop.f32.mrb[32].mxu1  ;;  %5603 = vmatprep.subr.bf16.mxu0 %v8334_v60 }
 0x36d   :  { %v5238_v56 = vpop.f32.mrb[33].mxu1 }
 0x36e   :  { %v5239_v51 = vadd.f32 %v5238_v56, %v5237_v49  ;;  %v5240_v32 = vpop.f32.mrb[34].mxu1  ;;  %5540 = vmatpush3.bf16.msra.mxu1 %v8335_v55  ;;  %v5998_v49 = vld [vmem:[%s8176_s3 + $0x158] sm:$0xff]  }
 0x36f   :  { %5604 = vmatpush3.bf16.msra.mxu0 %v8336_v53  ;;  %v5241_v33 = vpop.f32.mrb[35].mxu1  ;;  %5541 = vmatprep.subr.bf16.mxu1 %v7411_v15  ;;  %v5991_v53 = vld [vmem:[%s8176_s3 + $0xa8] sm:$0xff]   ;;  %v5999_v56 = vld [vmem:[%s8176_s3 + $0x118] sm:$0xff]   ;;  %v6000_v32 = vld [vmem:[%s8176_s3 + $0x160] sm:$0xff]  }
 0x370   :  { %v2278_v50 = vadd.f32 %v5239_v51, %v2223_v12  ;;  %5605 = vmatprep.subr.bf16.mxu0 %v6991_v38  ;;  %v7706_v12 = vld.sshfl [vmem:[#allocation2 + $0x34] sm:$0x33 pattern:$0x76325410] }
 0x371   :  { %v5303_v3 = vpop.f32.mrb[64].mxu0 }
 0x372   :  { %v2279_v6 = vadd.f32 %v8337_v59, %v2278_v50  ;;  %v5304_v30 = vpop.f32.mrb[65].mxu0  ;;  %5542 = vmatpush3.bf16.msra.mxu1 %v7421_v52 }
 0x373   :  { %v7695_v60 = vadd.f32 %v5304_v30, %v5303_v3  ;;  %v5306_v47 = vpop.f32.mrb[66].mxu0  ;;  %5606 = vmatpush3.bf16.msra.mxu0 %v5991_v53  ;;  %5543 = vmatprep.subr.bf16.mxu1 %v7428_v2  ;;  %v6002_v53 = vld [vmem:[%s8176_s3 + $0x168] sm:$0xff]  }
 0x374   :  { %v2280_v58 = vmax.f32 %v2279_v6, 0.0  ;;  %v5307_v38 = vpop.f32.mrb[67].mxu0  ;;  %5607 = vmatprep.subr.bf16.mxu0 %v7138_v42  ;;  %v3307_v42 = vcombine.high %v7706_v12, %v7706_v12  ;;  %v6001_v6 = vld [vmem:[%s8176_s3 + $0x120] sm:$0xff]  }
 0x376   :  { %2282 = vst.msk [vmem:[#allocation3 + $0x4] sm:$0x3] %vm384_vm0, %v2280_v58  ;;  %5544 = vmatpush3.bf16.msra.mxu1 %v8339_v39  ;;  %v3311_v34 = vpack.c.bf16 %v3307_v42, %v3307_v42  ;;  %v6003_v42 = vld [vmem:[%s8176_s3 + $0x128] sm:$0xff]  }
 0x377   :  { %5608 = vmatpush3.bf16.msra.mxu0 %v7149_v61  ;;  %5573 = vmatprep.subr.bf16.mxu1 %v7447_v29  ;;  %v5992_v61 = vld [vmem:[%s8176_s3 + $0x140] sm:$0xff]  }
 0x378   :  { %5609 = vmatprep.subr.bf16.mxu0 %v7156_v27  ;;  %v8346_v27 = vld [vmem:[#allocation20_spill] sm:$0xff] }
 0x379   :  { %3059 = vmatmul.mubr.bf16.vlgmr.msra.gmra.mrb[60].mxu1 %v8345_v36 }
 0x37a   :  { %5574 = vmatpush3.bf16.msra.mxu1 %v7460_v19  ;;  %3167 = vmatprep.mubr.bf16.mxu1 %v3134_v13 }
 0x37b   :  { %5610 = vmatpush3.bf16.msra.mxu0 %v7169_v1  ;;  %5575 = vmatprep.subr.bf16.mxu1 %v7468_v5  ;;  %v5994_v1 = vld [vmem:[%s8176_s3 + $0x148] sm:$0xff]  }
 0x37c   :  { %5639 = vmatprep.subr.bf16.mxu0 %v5992_v61  ;;  %v6004_v61 = vld [vmem:[%s8176_s3 + $0x170] sm:$0xff]  }
 0x37e   :  { %3251 = vmatmul.mubr.bf16.vlgmr.msra.gmra.mrb[92].mxu0 %v8346_v27  ;;  %5576 = vmatpush3.bf16.msra.mxu1 %v7476_v45  ;;  %v8347_v27 = vld [vmem:[#allocation19_spill] sm:$0xff] }
 0x37f   :  { %5640 = vmatpush3.bf16.msra.mxu0 %v5993_v48  ;;  %3344 = vmatprep.mubr.bf16.mxu0 %v3311_v34  ;;  %v6005_v34 = vld [vmem:[%s8176_s3 + $0x130] sm:$0xff]   ;;  %v3310_v48 = vpack.c.bf16 %v7706_v12, %v7706_v12  ;;  %s4447_s3 = sshll.u32 %s6034_s19, 4  ;;  %s4448_s3 = int_to_ptr.vmem [resolvable:$true] %s4447_s3 }
 0x380   :  { %5577 = vmatprep.subr.bf16.mxu1 %v7483_v31  ;;  %5641 = vmatprep.subr.bf16.mxu0 %v5994_v1  ;;  %v6033_v1 = vmov 0   ;;  %s6007_s20 = scalar_lea.vmem %s4448_s3, 32  ;;  %p6012_p1 = scmp.lt.s32.totalorder %s4448_s3, %s4448_s3 }
 0x381   :  { %p6008_p0 = scmp.ne.s32.totalorder %s4448_s3, %s6007_s20  ;;  %p6013_p2 = scmp.lt.s32.totalorder %s6007_s20, %s6007_s20 }
 0x382   :  { %5578 = vmatpush3.bf16.msra.mxu1 %v7580_v54 }
 0x383   :  { %5642 = vmatpush3.bf16.msra.mxu0 %v5995_v46  ;;  %5579 = vmatprep.subr.bf16.mxu1 %v7587_v11  ;;  %p6014_p3 = por %p6013_p2, %p6012_p1 }
 0x384   :  { %5643 = vmatprep.subr.bf16.mxu0 %v5996_v0 }
 0x385   :  { %p6015_p4 = pnand %p6014_p3, %p6008_p0 }
 0x386   :  { %5580 = vmatpush3.bf16.msra.mxu1 %v7594_v23 }
 0x387   :  { %5644 = vmatpush3.bf16.msra.mxu0 %v5997_v20  ;;  %5581 = vmatprep.subr.bf16.mxu1 %v7601_v35 }
 0x388   :  { %5645 = vmatprep.subr.bf16.mxu0 %v5998_v49 }
 0x38a   :  { %5582 = vmatpush3.bf16.msra.mxu1 %v7608_v37 }
 0x38b   :  { %5646 = vmatpush3.bf16.msra.mxu0 %v5999_v56  ;;  %5583 = vmatprep.subr.bf16.mxu1 %v7615_v63 }
 0x38c   :  { %v5281_v51 = vpop.f32.mrb[36].mxu1  ;;  %5647 = vmatprep.subr.bf16.mxu0 %v6000_v32  ;;  %v8349_v32 = vld [vmem:[#allocation15_spill] sm:$0xff] }
 0x38d   :  { %v5282_v33 = vpop.f32.mrb[37].mxu1 }
 0x38e   :  { %v5283_v50 = vadd.f32 %v5282_v33, %v5281_v51  ;;  %v5284_v3 = vpop.f32.mrb[38].mxu1  ;;  %5584 = vmatpush3.bf16.msra.mxu1 %v7622_v9 }
 0x38f   :  { %5648 = vmatpush3.bf16.msra.mxu0 %v6001_v6  ;;  %v5285_v30 = vpop.f32.mrb[39].mxu1  ;;  %5585 = vmatprep.subr.bf16.mxu1 %v7629_v4 }
 0x390   :  { %v2386_v47 = vadd.f32 %v5283_v50, %v7641_v22  ;;  %5649 = vmatprep.subr.bf16.mxu0 %v6002_v53  ;;  %v7871_v50 = vld.sshfl [vmem:[#allocation3] sm:$0x33 pattern:$0x76325410]  ;;  %v5838_v53 = vld [vmem:[%s8178_s5 + $0x18] sm:$0xff]  }
 0x391   :  { %v5347_v58 = vpop.f32.mrb[68].mxu0 }
 0x392   :  { %v5348_v38 = vpop.f32.mrb[69].mxu0  ;;  %5586 = vmatpush3.bf16.msra.mxu1 %v7637_v41  ;;  %v2445_v25 = vadd.f32 %v7695_v60, %v2386_v47  ;;  %v3133_v60 = vpack.c.bf16 %v7691_v7, %v7691_v7  ;;  %v5847_v7 = vld [vmem:[%s8178_s5 + $0x60] sm:$0xff]  }
 0x393   :  { %v7764_v13 = vadd.f32 %v5348_v38, %v5347_v58  ;;  %v5350_v36 = vpop.f32.mrb[70].mxu0  ;;  %5650 = vmatpush3.bf16.msra.mxu0 %v6003_v42  ;;  %5587 = vmatprep.subr.bf16.mxu1 %v7647_v14  ;;  %v5839_v58 = vld [vmem:[%s8178_s5 + $0x20] sm:$0xff]   ;;  %v5840_v38 = vld [vmem:[%s8178_s5 + $0x28] sm:$0xff]  }
 0x394   :  { %v5351_v22 = vpop.f32.mrb[71].mxu0  ;;  %5651 = vmatprep.subr.bf16.mxu0 %v6004_v61 }
 0x395   :  { %v5841_v22 = vld [vmem:[%s8178_s5 + $0x30] sm:$0xff]  }
 0x396   :  { %5588 = vmatpush3.bf16.msra.mxu1 %v7654_v40 }
 0x397   :  { %5652 = vmatpush3.bf16.msra.mxu0 %v6005_v34  ;;  %5617 = vmatprep.subr.bf16.mxu1 %v7213_v21  ;;  %v5848_v21 = vld [vmem:[%s8178_s5 + $0x68] sm:$0xff]  }
 0x398   :  { %5653 = vmatprep.subr.bf16.mxu0 %v7219_v62  ;;  %v5849_v62 = vld [vmem:[%s8178_s5 + $0x70] sm:$0xff]  }
 0x399   :  { %3168 = vmatmul.mubr.bf16.vlgmr.msra.gmra.mrb[64].mxu1 %v3133_v60 }
 0x39a   :  { %5618 = vmatpush3.bf16.msra.mxu1 %v7329_v26  ;;  %3290 = vmatprep.mubr.bf16.mxu1 %v8347_v27  ;;  %v5851_v26 = vld [vmem:[%s8178_s5 + $0x80] sm:$0xff]  }
 0x39b   :  { %5654 = vmatpush3.bf16.msra.mxu0 %v7228_v17  ;;  %5619 = vmatprep.subr.bf16.mxu1 %v7337_v57  ;;  %v5850_v17 = vld [vmem:[%s8178_s5 + $0x78] sm:$0xff]   ;;  %v7914_v27 = vld [vmem:[%s8177_s4] ss:$0 sm:$0xff] }
 0x39c   :  { %3590 = vmatprep.subr.bf16.mxu0 %v6033_v1 }
 0x39e   :  { %3345 = vmatmul.mubr.bf16.vlgmr.msra.gmra.mrb[96].mxu0 %v3310_v48  ;;  %5620 = vmatpush3.bf16.msra.mxu1 %v7347_v18 }
 0x39f   :  { %5621 = vmatprep.subr.bf16.mxu1 %v7355_v43  ;;  %3591 = vmatpush1.bf16.msra.mxu0 %v5847_v7 }
 0x3a0   :  { %3592 = vmatprep.subr.bf16.mxu0 %v6033_v1 }
 0x3a2   :  { %5622 = vmatpush3.bf16.msra.mxu1 %v7362_v28 }
 0x3a3   :  { %5623 = vmatprep.subr.bf16.mxu1 %v7369_v8  ;;  %3593 = vmatpush1.bf16.msra.mxu0 %v5848_v21  ;;  %v5842_v21 = vld [vmem:[%s8178_s5 + $0x38] sm:$0xff]  }
 0x3a4   :  { %3594 = vmatprep.subr.bf16.mxu0 %v6033_v1 }
 0x3a6   :  { %5624 = vmatpush3.bf16.msra.mxu1 %v7376_v16  ;;  %v5852_v16 = vld [vmem:[%s8178_s5 + $0x88] sm:$0xff]  }
 0x3a7   :  { %5625 = vmatprep.subr.bf16.mxu1 %v7383_v44  ;;  %3595 = vmatpush1.bf16.msra.mxu0 %v5849_v62 }
 0x3a8   :  { %3596 = vmatprep.subr.bf16.mxu0 %v6033_v1 }
 0x3aa   :  { %5626 = vmatpush3.bf16.msra.mxu1 %v8331_v10 }
 0x3ab   :  { %5627 = vmatprep.subr.bf16.mxu1 %v8333_v24  ;;  %3597 = vmatpush1.bf16.msra.mxu0 %v5850_v17  ;;  %v7821_v24 = vld.sshfl [vmem:[#allocation2 + $0x3c] sm:$0x33 pattern:$0x76325410] }
 0x3ac   :  { %v5325_v57 = vpop.f32.mrb[40].mxu1  ;;  %3598 = vmatprep.subr.bf16.mxu0 %v6033_v1  ;;  %v3362_v56 = vcombine.high %v7821_v24, %v7821_v24  ;;  %v3365_v47 = vpack.c.bf16 %v7821_v24, %v7821_v24 }
 0x3ad   :  { %v5326_v18 = vpop.f32.mrb[41].mxu1 }
 0x3ae   :  { %v5327_v43 = vadd.f32 %v5326_v18, %v5325_v57  ;;  %v5328_v28 = vpop.f32.mrb[42].mxu1  ;;  %5628 = vmatpush3.bf16.msra.mxu1 %v8335_v55  ;;  %v3366_v51 = vpack.c.bf16 %v3362_v56, %v3362_v56  ;;  %v5843_v18 = vld [vmem:[%s8178_s5 + $0x40] sm:$0xff]  }
 0x3af   :  { %v5329_v8 = vpop.f32.mrb[43].mxu1  ;;  %5629 = vmatprep.subr.bf16.mxu1 %v7411_v15  ;;  %3599 = vmatpush1.bf16.msra.mxu0 %v5851_v26  ;;  %v5853_v15 = vld [vmem:[%s8178_s5 + $0x90] sm:$0xff]  }
 0x3b0   :  { %v2500_v44 = vadd.f32 %v5327_v43, %v2445_v25  ;;  %3600 = vmatprep.subr.bf16.mxu0 %v6033_v1  ;;  %v5844_v43 = vld [vmem:[%s8178_s5 + $0x48] sm:$0xff]   ;;  %v5845_v28 = vld [vmem:[%s8178_s5 + $0x50] sm:$0xff]   ;;  %v5846_v8 = vld [vmem:[%s8178_s5 + $0x58] sm:$0xff]  }
 0x3b1   :  { %v5391_v10 = vpop.f32.mrb[72].mxu0 }
 0x3b2   :  { %v2501_v12 = vadd.f32 %v8337_v59, %v2500_v44  ;;  %v5392_v46 = vpop.f32.mrb[73].mxu0  ;;  %5630 = vmatpush3.bf16.msra.mxu1 %v7421_v52  ;;  %v8348_v59 = vld [vmem:[#allocation9_spill] sm:$0xff] }
 0x3b3   :  { %v5393_v55 = vadd.f32 %v5392_v46, %v5391_v10  ;;  %v5394_v0 = vpop.f32.mrb[74].mxu0  ;;  %5631 = vmatprep.subr.bf16.mxu1 %v7428_v2  ;;  %3601 = vmatpush1.bf16.msra.mxu0 %v5852_v16  ;;  %v5854_v2 = vld [vmem:[%s8178_s5 + $0x98] sm:$0xff]   ;;  %v3498_v16 = vpack.c.bf16 %v7871_v50, %v7871_v50 }
 0x3b4   :  { %v2502_v20 = vmax.f32 %v2501_v12, 0.0  ;;  %v5395_v49 = vpop.f32.mrb[75].mxu0  ;;  %3602 = vmatprep.subr.bf16.mxu0 %v6033_v1 }
 0x3b6   :  { %5632 = vmatpush3.bf16.msra.mxu1 %v8339_v39  ;;  %v2510_v52 = vrot.slane %v2502_v20, %v8348_v59  ;;  %v5856_v39 = vld [vmem:[%s8178_s5 + $0xa8] sm:$0xff]  }
 0x3b7   :  { %5661 = vmatprep.subr.bf16.mxu1 %v7447_v29  ;;  %3603 = vmatpush1.bf16.msra.mxu0 %v5853_v15  ;;  %v5855_v29 = vld [vmem:[%s8178_s5 + $0xa0] sm:$0xff]  }
 0x3b8   :  { %2511 = vrot.lane.b32.xlu0 %v2510_v52, %s6032_s17  ;;  %3604 = vmatprep.subr.bf16.mxu0 %v6033_v1 }
 0x3b9   :  { %3291 = vmatmul.mubr.bf16.vlgmr.msra.gmra.mrb[68].mxu1 %v8349_v32 }
 0x3ba   :  { %5662 = vmatpush3.bf16.msra.mxu1 %v7460_v19  ;;  %3399 = vmatprep.mubr.bf16.mxu1 %v3366_v51  ;;  %v5857_v19 = vld [vmem:[%s8178_s5 + $0xb0] sm:$0xff]  }
 0x3bb   :  { %5663 = vmatprep.subr.bf16.mxu1 %v7468_v5  ;;  %3605 = vmatpush1.bf16.msra.mxu0 %v5854_v2 }
 0x3bc   :  { %3606 = vmatprep.subr.bf16.mxu0 %v6033_v1 }
 0x3be   :  { %5664 = vmatpush3.bf16.msra.mxu1 %v7476_v45 }
 0x3bf   :  { %5665 = vmatprep.subr.bf16.mxu1 %v7483_v31  ;;  %3607 = vmatpush1.bf16.msra.mxu0 %v5855_v29  ;;  %v5858_v31 = vld [vmem:[%s8178_s5 + $0xb8] sm:$0xff]  }
 0x3c0   :  { %3608 = vmatprep.subr.bf16.mxu0 %v6033_v1 }
 0x3c2   :  { %5666 = vmatpush3.bf16.msra.mxu1 %v7580_v54 }
 0x3c3   :  { %5667 = vmatprep.subr.bf16.mxu1 %v7587_v11  ;;  %3609 = vmatpush1.bf16.msra.mxu0 %v5856_v39 }
 0x3c4   :  { %3610 = vmatprep.subr.bf16.mxu0 %v6033_v1 }
 0x3c6   :  { %5668 = vmatpush3.bf16.msra.mxu1 %v7594_v23 }
 0x3c7   :  { %5669 = vmatprep.subr.bf16.mxu1 %v7601_v35  ;;  %3611 = vmatpush1.bf16.msra.mxu0 %v5857_v19 }
 0x3c8   :  { %3612 = vmatprep.subr.bf16.mxu0 %v6033_v1 }
 0x3ca   :  { %5670 = vmatpush3.bf16.msra.mxu1 %v7608_v37 }
 0x3cb   :  { %5671 = vmatprep.subr.bf16.mxu1 %v7615_v63  ;;  %3613 = vmatpush1.bf16.msra.mxu0 %v5858_v31 }
 0x3cc   :  { %v5369_v5 = vpop.f32.mrb[44].mxu1  ;;  %3834 = vmatprep.subr.bf16.mxu0 %v6033_v1 }
 0x3cd   :  { %v5370_v45 = vpop.f32.mrb[45].mxu1 }
 0x3ce   :  { %v5371_v54 = vadd.f32 %v5370_v45, %v5369_v5  ;;  %v5372_v11 = vpop.f32.mrb[46].mxu1  ;;  %5672 = vmatpush3.bf16.msra.mxu1 %v7622_v9  ;;  %v3495_v9 = vcombine.high %v7871_v50, %v7871_v50 }
 0x3cf   :  { %v5373_v23 = vpop.f32.mrb[47].mxu1  ;;  %5673 = vmatprep.subr.bf16.mxu1 %v7629_v4  ;;  %v5835_v4 = vld [vmem:[%s8178_s5] sm:$0xff]  }
 0x3d0   :  { %v2618_v35 = vadd.f32 %v5371_v54, %v7764_v13 }
 0x3d1   :  { %v5435_v33 = vpop.f32.mrb[76].mxu0 }
 0x3d2   :  { %v5436_v37 = vpop.f32.mrb[77].mxu0  ;;  %5674 = vmatpush3.bf16.msra.mxu1 %v7637_v41  ;;  %v2677_v63 = vadd.f32 %v5393_v55, %v2618_v35  ;;  %v3499_v41 = vpack.c.bf16 %v3495_v9, %v3495_v9  ;;  %v5861_v9 = vld [vmem:[%s8178_s5 + $0xd0] sm:$0xff]  }
 0x3d3   :  { %v7874_v3 = vadd.f32 %v5436_v37, %v5435_v33  ;;  %v5438_v6 = vpop.f32.mrb[78].mxu0  ;;  %5675 = vmatprep.subr.bf16.mxu1 %v7647_v14  ;;  %v5836_v14 = vld [vmem:[%s8178_s5 + $0x8] sm:$0xff]  }
 0x3d4   :  { %v5439_v30 = vpop.f32.mrb[79].mxu0  ;;  %v5859_v6 = vld [vmem:[%s8178_s5 + $0xc0] sm:$0xff]  }
 0x3d5   :  { %v5860_v30 = vld [vmem:[%s8178_s5 + $0xc8] sm:$0xff]  }
 0x3d6   :  { %5676 = vmatpush3.bf16.msra.mxu1 %v7654_v40  ;;  %v5837_v40 = vld [vmem:[%s8178_s5 + $0x10] sm:$0xff]  }
 0x3d7   :  { %3705 = vmatprep.subr.bf16.mxu1 %v6033_v1 }
 0x3d9   :  { %3400 = vmatmul.mubr.bf16.vlgmr.msra.gmra.mrb[72].mxu1 %v3365_v47  ;;  %v5863_v47 = vld [vmem:[%s8178_s5 + $0xe0] sm:$0xff]  }
 0x3da   :  { %3706 = vmatpush1.bf16.msra.mxu1 %v5835_v4  ;;  %4760 = vmatprep.mubr.msk.bf16.mxu1 %vm3586_vm2, %v3499_v41  ;;  %v5862_v4 = vld [vmem:[%s8178_s5 + $0xd8] sm:$0xff]  }
 0x3db   :  { %3707 = vmatprep.subr.bf16.mxu1 %v6033_v1 }
 0x3de   :  { %3708 = vmatpush1.bf16.msra.mxu1 %v5836_v14 }
 0x3df   :  { %3709 = vmatprep.subr.bf16.mxu1 %v6033_v1 }
 0x3e2   :  { %3710 = vmatpush1.bf16.msra.mxu1 %v5837_v40 }
 0x3e3   :  { %3711 = vmatprep.subr.bf16.mxu1 %v6033_v1 }
 0x3e6   :  { %3712 = vmatpush1.bf16.msra.mxu1 %v5838_v53 }
 0x3e7   :  { %3713 = vmatprep.subr.bf16.mxu1 %v6033_v1 }
 0x3ea   :  { %3714 = vmatpush1.bf16.msra.mxu1 %v5839_v58 }
 0x3eb   :  { %3715 = vmatprep.subr.bf16.mxu1 %v6033_v1 }
 0x3ec   :  { %v5413_v25 = vpop.f32.mrb[48].mxu1 }
 0x3ed   :  { %v5414_v13 = vpop.f32.mrb[49].mxu1 }
 0x3ee   :  { %v5415_v36 = vadd.f32 %v5414_v13, %v5413_v25  ;;  %v5416_v42 = vpop.f32.mrb[50].mxu1  ;;  %3716 = vmatpush1.bf16.msra.mxu1 %v5840_v38 }
 0x3ef   :  { %v5417_v61 = vpop.f32.mrb[51].mxu1  ;;  %3717 = vmatprep.subr.bf16.mxu1 %v6033_v1 }
 0x3f0   :  { %v2732_v60 = vadd.f32 %v5415_v36, %v2677_v63 }
 0x3f1   :  { %v5479_v34 = vpop.f32.mrb[80].mxu0 }
 0x3f2   :  { %v2733_v7 = vadd.f32 %v7914_v27, %v2732_v60  ;;  %v5480_v48 = vpop.f32.mrb[81].mxu0  ;;  %3718 = vmatpush1.bf16.msra.mxu1 %v5841_v22  ;;  %v5864_v60 = vld [vmem:[%s8178_s5 + $0xe8] sm:$0xff]  }
 0x3f3   :  { %v5481_v62 = vadd.f32 %v5480_v48, %v5479_v34  ;;  %v5482_v17 = vpop.f32.mrb[82].mxu0  ;;  %3719 = vmatprep.subr.bf16.mxu1 %v6033_v1  ;;  %v5865_v34 = vld [vmem:[%s8178_s5 + $0xf0] sm:$0xff]   ;;  %v5867_v48 = vld [vmem:[%s8178_s5 + $0x100] sm:$0xff]  }
 0x3f4   :  { %v2734_v26 = vmax.f32 %v2733_v7, 0.0  ;;  %v5483_v57 = vpop.f32.mrb[83].mxu0  ;;  %v5866_v7 = vld [vmem:[%s8178_s5 + $0xf8] sm:$0xff]  }
 0x3f6   :  { %2735 = vst.msk [vmem:[#allocation3 + $0x6] sm:$0x3] %vm384_vm0, %v2734_v26  ;;  %3720 = vmatpush1.bf16.msra.mxu1 %v5842_v21  ;;  %v5868_v21 = vld [vmem:[%s8178_s5 + $0x108] sm:$0xff]  }
 0x3f7   :  { %3721 = vmatprep.subr.bf16.mxu1 %v6033_v1 }
 0x3fa   :  { %3722 = vmatpush1.bf16.msra.mxu1 %v5843_v18  ;;  %v5869_v18 = vld [vmem:[%s8178_s5 + $0x110] sm:$0xff]  }
 0x3fb   :  { %3723 = vmatprep.subr.bf16.mxu1 %v6033_v1 }
 0x3fe   :  { %3724 = vmatpush1.bf16.msra.mxu1 %v5844_v43 }
 0x3ff   :  { %3725 = vmatprep.subr.bf16.mxu1 %v6033_v1 }
 0x402   :  { %3726 = vmatpush1.bf16.msra.mxu1 %v5845_v28 }
 0x403   :  { %3727 = vmatprep.subr.bf16.mxu1 %v6033_v1 }
 0x406   :  { %3728 = vmatpush1.bf16.msra.mxu1 %v5846_v8 }
 0x409   :  { %3738 = vmatmul.mubr.bf16.vlgmr.msra.gmra.mrb[76].mxu1 %v3498_v16 }
 0x40a   :  { %4039 = vmatprep.mubr.bf16.mxu1 %v6033_v1 }
 0x40c   :  { %v5457_v44 = vpop.f32.mrb[52].mxu1 }
 0x40d   :  { %v5458_v10 = vpop.f32.mrb[53].mxu1 }
 0x40e   :  { %v5459_v24 = vadd.f32 %v5458_v10, %v5457_v44  ;;  %v5460_v12 = vpop.f32.mrb[54].mxu1  ;;  %v5870_v10 = vld [vmem:[%s8178_s5 + $0x118] sm:$0xff]  }
 0x40f   :  { %v5461_v46 = vpop.f32.mrb[55].mxu1 }
 0x410   :  { %v2839_v55 = vadd.f32 %v5459_v24, %v7874_v3 }
 0x411   :  { %v5523_v0 = vpop.f32.mrb[84].mxu0 }
 0x412   :  { %v5524_v15 = vpop.f32.mrb[85].mxu0  ;;  %v2898_v20 = vadd.f32 %v5481_v62, %v2839_v55 }
 0x413   :  { %v5525_v49 = vadd.f32 %v5524_v15, %v5523_v0  ;;  %v5526_v56 = vpop.f32.mrb[86].mxu0 }
 0x414   :  { %v5527_v52 = vpop.f32.mrb[87].mxu0 }
 0x42a   :  { %v2512_v2 = vpop.permute.xlu0 %2511 }
 0x42b   :  { %2514 = vst.msk [vmem:[#allocation3 + $0x4] sm:$0x3] %vm453_vm1, %v2512_v2 }
 0x42c   :  { %v5501_v51 = vpop.f32.mrb[56].mxu1 }
 0x42d   :  { %v5502_v32 = vpop.f32.mrb[57].mxu1 }
 0x42e   :  { %v5503_v29 = vadd.f32 %v5502_v32, %v5501_v51  ;;  %v5504_v39 = vpop.f32.mrb[58].mxu1 }
 0x42f   :  { %v5505_v19 = vpop.f32.mrb[59].mxu1 }
 0x430   :  { %v2953_v31 = vadd.f32 %v5503_v29, %v2898_v20 }
 0x431   :  { %v5567_v5 = vpop.f32.mrb[88].mxu0 }
 0x432   :  { %v2954_v45 = vadd.f32 %v7914_v27, %v2953_v31  ;;  %v5568_v54 = vpop.f32.mrb[89].mxu0  ;;  %v4734_v11 = vld.sshfl [vmem:[#allocation3 + $0x4] sm:$0x33 pattern:$0x76325410] }
 0x433   :  { %v5569_v23 = vadd.f32 %v5568_v54, %v5567_v5  ;;  %v5570_v35 = vpop.f32.mrb[90].mxu0  ;;  %v3509_v33 = vcombine.high %v4734_v11, %v4734_v11  ;;  %v3512_v3 = vpack.c.bf16 %v4734_v11, %v4734_v11 }
 0x434   :  { %v2955_v50 = vmax.f32 %v2954_v45, 0.0  ;;  %v5571_v37 = vpop.f32.mrb[91].mxu0 }
 0x435   :  { %v3513_v63 = vpack.c.bf16 %v3509_v33, %v3509_v33 }
 0x436   :  { %2957 = vst.msk [vmem:[#allocation3 + $0x8] sm:$0x3] %vm384_vm0, %v2955_v50 }
 0x437   :  { %4747 = vmatprep.mubr.msk.bf16.mxu0 %vm3586_vm2, %v3513_v63 }
 0x438   :  { %3623 = vmatmul.mubr.bf16.vlgmr.msra.gmra.mrb[100].mxu0 %v3512_v3 }
 0x439   :  { %3835 = vmatpush1.bf16.msra.mxu0 %v5859_v6 }
 0x43a   :  { %3836 = vmatprep.subr.bf16.mxu0 %v6033_v1 }
 0x43d   :  { %3837 = vmatpush1.bf16.msra.mxu0 %v5860_v30 }
 0x43e   :  { %3838 = vmatprep.subr.bf16.mxu0 %v6033_v1 }
 0x441   :  { %3839 = vmatpush1.bf16.msra.mxu0 %v5861_v9 }
 0x442   :  { %3840 = vmatprep.subr.bf16.mxu0 %v6033_v1 }
 0x445   :  { %3841 = vmatpush1.bf16.msra.mxu0 %v5862_v4 }
 0x446   :  { %3842 = vmatprep.subr.bf16.mxu0 %v6033_v1 }
 0x449   :  { %3843 = vmatpush1.bf16.msra.mxu0 %v5863_v47  ;;  %v5873_v47 = vld [vmem:[%s8180_s7 + $0x4] ss:$16 sps:$4 sm:$0xff]  }
 0x44a   :  { %3844 = vmatprep.subr.bf16.mxu0 %v6033_v1  ;;  %4007 = vmatprep.subr.bf16.mxu1 %v5873_v47 }
 0x44c   :  { %v5545_v41 = vpop.f32.mrb[60].mxu1 }
 0x44d   :  { %v5546_v14 = vpop.f32.mrb[61].mxu1  ;;  %3845 = vmatpush1.bf16.msra.mxu0 %v5864_v60  ;;  %v4775_v60 = vld [vmem:[%s8179_s6] ss:$0 sm:$0xff] }
 0x44e   :  { %v5547_v40 = vadd.f32 %v5546_v14, %v5545_v41  ;;  %v5548_v53 = vpop.f32.mrb[62].mxu1  ;;  %3846 = vmatprep.subr.bf16.mxu0 %v6033_v1  ;;  %v5871_v41 = vld [vmem:[%s8180_s7] ss:$16 sps:$4 sm:$0xff]   ;;  %v5876_v14 = vld [vmem:[%s8180_s7 + $0x24] ss:$16 sps:$4 sm:$0xff]  }
 0x44f   :  { %v5549_v58 = vpop.f32.mrb[63].mxu1  ;;  %4008 = vmatpush1.bf16.msra.mxu1 %v5871_v41  ;;  %v5877_v53 = vld [vmem:[%s8180_s7 + $0x40] ss:$16 sps:$4 sm:$0xff]  }
 0x450   :  { %v3061_v38 = vadd.f32 %v5547_v40, %v5525_v49  ;;  %v5874_v40 = vld [vmem:[%s8180_s7 + $0x20] ss:$16 sps:$4 sm:$0xff]   ;;  %4009 = vmatprep.subr.bf16.mxu1 %v5876_v14  ;;  %v5879_v58 = vld [vmem:[%s8180_s7 + $0x44] ss:$16 sps:$4 sm:$0xff]  }
 0x451   :  { %v5611_v25 = vpop.f32.mrb[92].mxu0  ;;  %3847 = vmatpush1.bf16.msra.mxu0 %v5865_v34 }
 0x452   :  { %v5612_v13 = vpop.f32.mrb[93].mxu0  ;;  %v3120_v36 = vadd.f32 %v5569_v23, %v3061_v38  ;;  %3848 = vmatprep.subr.bf16.mxu0 %v6033_v1  ;;  %v5882_v38 = vld [vmem:[%s8180_s7 + $0x64] ss:$16 sps:$4 sm:$0xff]  }
 0x453   :  { %v5613_v42 = vadd.f32 %v5612_v13, %v5611_v25  ;;  %v5614_v22 = vpop.f32.mrb[94].mxu0  ;;  %4010 = vmatpush1.bf16.msra.mxu1 %v5874_v40  ;;  %v5880_v25 = vld [vmem:[%s8180_s7 + $0x60] ss:$16 sps:$4 sm:$0xff]   ;;  %v5885_v13 = vld [vmem:[%s8180_s7 + $0xc] ss:$16 sps:$4 sm:$0xff]  }
 0x454   :  { %v5615_v61 = vpop.f32.mrb[95].mxu0  ;;  %4011 = vmatprep.subr.bf16.mxu1 %v5879_v58  ;;  %v5907_v22 = vld [vmem:[%s8182_s9 + $0xc8] sm:$0xff]  }
 0x455   :  { %3849 = vmatpush1.bf16.msra.mxu0 %v5866_v7  ;;  %v5909_v61 = vld [vmem:[%s8182_s9 + $0x88] sm:$0xff]  }
 0x456   :  { %3850 = vmatprep.subr.bf16.mxu0 %v6033_v1 }
 0x457   :  { %4012 = vmatpush1.bf16.msra.mxu1 %v5877_v53 }
 0x458   :  { %4013 = vmatprep.subr.bf16.mxu1 %v5882_v38 }
 0x459   :  { %3851 = vmatpush1.bf16.msra.mxu0 %v5867_v48 }
 0x45a   :  { %3852 = vmatprep.subr.bf16.mxu0 %v6033_v1 }
 0x45b   :  { %4014 = vmatpush1.bf16.msra.mxu1 %v5880_v25 }
 0x45c   :  { %4048 = vmatprep.subr.bf16.mxu1 %v5885_v13 }
 0x45d   :  { %3853 = vmatpush1.bf16.msra.mxu0 %v5868_v21 }
 0x45e   :  { %3854 = vmatprep.subr.bf16.mxu0 %v6033_v1 }
 0x461   :  { %3855 = vmatpush1.bf16.msra.mxu0 %v5869_v18 }
 0x462   :  { %3856 = vmatprep.subr.bf16.mxu0 %v6033_v1 }
 0x465   :  { %3857 = vmatpush1.bf16.msra.mxu0 %v5870_v10  ;;  %v5894_v10 = vld [vmem:[%s8180_s7 + $0x6c] ss:$16 sps:$4 sm:$0xff]  }
 0x46c   :  { %v5589_v62 = vpop.f32.mrb[64].mxu1 }
 0x46d   :  { %v5590_v17 = vpop.f32.mrb[65].mxu1 }
 0x46e   :  { %v5591_v26 = vadd.f32 %v5590_v17, %v5589_v62  ;;  %v5592_v57 = vpop.f32.mrb[66].mxu1 }
 0x46f   :  { %v5593_v43 = vpop.f32.mrb[67].mxu1  ;;  %v5883_v57 = vld [vmem:[%s8180_s7 + $0x8] ss:$16 sps:$4 sm:$0xff]  }
 0x470   :  { %v3175_v28 = vadd.f32 %v5591_v26, %v3120_v36  ;;  %v5903_v36 = vld [vmem:[%s8182_s9 + $0xc0] sm:$0xff]  }
 0x471   :  { %v5655_v8 = vpop.f32.mrb[96].mxu0  ;;  %5705 = vmatprep.subr.bf16.mxu0 %v5903_v36 }
 0x472   :  { %v3176_v16 = vadd.f32 %v7914_v27, %v3175_v28  ;;  %v5656_v44 = vpop.f32.mrb[97].mxu0  ;;  %v5888_v28 = vld [vmem:[%s8180_s7 + $0x2c] ss:$16 sps:$4 sm:$0xff]  }
 0x473   :  { %v5657_v24 = vadd.f32 %v5656_v44, %v5655_v8  ;;  %v5658_v12 = vpop.f32.mrb[98].mxu0  ;;  %v5886_v8 = vld [vmem:[%s8180_s7 + $0x28] ss:$16 sps:$4 sm:$0xff]  }
 0x474   :  { %v3177_v46 = vmax.f32 %v3176_v16, 0.0  ;;  %v5659_v55 = vpop.f32.mrb[99].mxu0  ;;  %v5891_v16 = vld [vmem:[%s8180_s7 + $0x4c] ss:$16 sps:$4 sm:$0xff]   ;;  %v5889_v44 = vld [vmem:[%s8180_s7 + $0x48] ss:$16 sps:$4 sm:$0xff]  }
 0x475   :  { %v5896_v12 = vld [vmem:[%s8182_s9] sm:$0xff]   ;;  %v5898_v55 = vld [vmem:[%s8182_s9 + $0x8] sm:$0xff]  }
 0x476   :  { %v3185_v0 = vrot.slane %v3177_v46, %v8348_v59  ;;  %v5897_v46 = vld [vmem:[%s8182_s9 + $0x48] sm:$0xff]  }
 0x478   :  { %3186 = vrot.lane.b32.xlu0 %v3185_v0, %s6032_s17  ;;  %v5899_v0 = vld [vmem:[%s8182_s9 + $0x50] sm:$0xff]  }
 0x48c   :  { %v5633_v15 = vpop.f32.mrb[68].mxu1 }
 0x48d   :  { %v5634_v20 = vpop.f32.mrb[69].mxu1 }
 0x48e   :  { %v5635_v49 = vadd.f32 %v5634_v20, %v5633_v15  ;;  %v5636_v56 = vpop.f32.mrb[70].mxu1  ;;  %v5900_v15 = vld [vmem:[%s8182_s9 + $0x10] sm:$0xff]   ;;  %v5901_v20 = vld [vmem:[%s8182_s9 + $0x58] sm:$0xff]  }
 0x48f   :  { %v5637_v52 = vpop.f32.mrb[71].mxu1  ;;  %v5904_v56 = vld [vmem:[%s8182_s9 + $0x60] sm:$0xff]  }
 0x490   :  { %v3293_v2 = vadd.f32 %v5635_v49, %v5613_v42  ;;  %v5905_v42 = vld [vmem:[%s8182_s9 + $0x80] sm:$0xff]   ;;  %v5902_v49 = vld [vmem:[%s8182_s9 + $0x18] sm:$0xff]  }
 0x491   :  { %v5906_v52 = vld [vmem:[%s8182_s9 + $0x20] sm:$0xff]  }
 0x492   :  { %v3352_v51 = vadd.f32 %v5657_v24, %v3293_v2  ;;  %v5895_v24 = vld [vmem:[%s8182_s9 + $0x40] sm:$0xff]   ;;  %v5908_v2 = vld [vmem:[%s8182_s9 + $0x68] sm:$0xff]  }
 0x4ac   :  { %v5677_v32 = vpop.f32.mrb[72].mxu1 }
 0x4ad   :  { %v5678_v29 = vpop.f32.mrb[73].mxu1 }
 0x4ae   :  { %v5679_v39 = vadd.f32 %v5678_v29, %v5677_v32  ;;  %v5680_v19 = vpop.f32.mrb[74].mxu1  ;;  %v5911_v32 = vld [vmem:[%s8182_s9 + $0xd0] sm:$0xff]  }
 0x4af   :  { %v5681_v31 = vpop.f32.mrb[75].mxu1  ;;  %v5912_v29 = vld [vmem:[%s8182_s9 + $0x70] sm:$0xff]  }
 0x4b0   :  { %v3407_v5 = vadd.f32 %v5679_v39, %v3352_v51  ;;  %v5910_v51 = vld [vmem:[%s8182_s9 + $0x28] sm:$0xff]   ;;  %v5913_v39 = vld [vmem:[%s8182_s9 + $0x90] sm:$0xff]   ;;  %v5915_v31 = vld [vmem:[%s8182_s9 + $0xd8] sm:$0xff]  }
 0x4b1   :  { %v5914_v19 = vld [vmem:[%s8182_s9 + $0x30] sm:$0xff]  }
 0x4b2   :  { %v3408_v45 = vadd.f32 %v7914_v27, %v3407_v5  ;;  %v5916_v5 = vld [vmem:[%s8182_s9 + $0x78] sm:$0xff]  }
 0x4b4   :  { %v3409_v54 = vmax.f32 %v3408_v45, 0.0  ;;  %v5917_v45 = vld [vmem:[%s8182_s9 + $0x98] sm:$0xff]  }
 0x4b6   :  { %3410 = vst.msk [vmem:[#allocation3 + $0xa] sm:$0x3] %vm384_vm0, %v3409_v54  ;;  %v5918_v54 = vld [vmem:[%s8182_s9 + $0x38] sm:$0xff]  }
 0x4dc   :  { %v3739_v59 = vpop.f32.mrb[76].mxu1 }
 0x4dd   :  { %v3741_v11 = vpop.f32.mrb[77].mxu1 }
 0x4de   :  { %v3742_v23 = vpop.f32.mrb[78].mxu1  ;;  %v5920_v11 = vld [vmem:[%s8182_s9 + $0xa0] sm:$0xff]  }
 0x4df   :  { %v3743_v35 = vpop.f32.mrb[79].mxu1  ;;  %v5921_v23 = vld [vmem:[%s8182_s9 + $0xe8] sm:$0xff]  }
 0x4e0   :  { %v5922_v35 = vld [vmem:[%s8182_s9 + $0xa8] sm:$0xff]  }
 0x4ea   :  { %v3187_v33 = vpop.permute.xlu0 %3186 }
 0x4eb   :  { %3189 = vst.msk [vmem:[#allocation3 + $0x8] sm:$0x3] %vm453_vm1, %v3187_v33  ;;  %v5923_v33 = vld [vmem:[%s8182_s9 + $0xf0] sm:$0xff]  }
 0x4f2   :  { %v4761_v50 = vld.sshfl [vmem:[#allocation3 + $0x8] sm:$0x33 pattern:$0x76325410] }
 0x4f3   :  { %v3754_v37 = vcombine.high %v4761_v50, %v4761_v50  ;;  %v3757_v3 = vpack.c.bf16 %v4761_v50, %v4761_v50  ;;  %v5924_v50 = vld [vmem:[%s8182_s9 + $0xb0] sm:$0xff]  }
 0x4f5   :  { %v3758_v63 = vpack.c.bf16 %v3754_v37, %v3754_v37  ;;  %v5925_v37 = vld [vmem:[%s8182_s9 + $0xf8] sm:$0xff]  }
 0x4f7   :  { %4774 = vmatprep.mubr.msk.bf16.mxu0 %vm3586_vm2, %v3758_v63  ;;  %v5926_v63 = vld [vmem:[%s8182_s9 + $0xb8] sm:$0xff]  }
 0x4f8   :  { %3867 = vmatmul.mubr.bf16.vlgmr.msra.gmra.mrb[104].mxu0 %v3757_v3  ;;  %v8350_v3 = vld [vmem:[#allocation8_spill] sm:$0xff] }
 0x4f9   :  { %5706 = vmatpush3.bf16.msra.mxu0 %v5905_v42  ;;  %v3914_v42 = vsub.s32 2, %v8350_v3 }
 0x4fa   :  { %5707 = vmatprep.subr.bf16.mxu0 %v5907_v22  ;;  %v3918_v22 = vsub.s32 3, %v8350_v3 }
 0x4fd   :  { %5708 = vmatpush3.bf16.msra.mxu0 %v5909_v61 }
 0x4fe   :  { %5709 = vmatprep.subr.bf16.mxu0 %v5911_v32 }
 0x501   :  { %5710 = vmatpush3.bf16.msra.mxu0 %v5913_v39 }
 0x502   :  { %5711 = vmatprep.subr.bf16.mxu0 %v5915_v31 }
 0x505   :  { %5712 = vmatpush3.bf16.msra.mxu0 %v5917_v45 }
 0x50b   :  { %v3624_v6 = vpop.f32.mrb[100].mxu0 }
 0x50c   :  { %v3740_v30 = vadd.f32 %v3739_v59, %v3624_v6  ;;  %v3626_v27 = vpop.f32.mrb[101].mxu0  ;;  %v5919_v59 = vld [vmem:[%s8182_s9 + $0xe0] sm:$0xff]   ;;  %v3906_v6 = vsub.s32 0, %v8350_v3 }
 0x50d   :  { %v3627_v9 = vpop.f32.mrb[102].mxu0  ;;  %5713 = vmatprep.subr.bf16.mxu0 %v5919_v59  ;;  %v3910_v27 = vsub.s32 1, %v8350_v3 }
 0x50e   :  { %v3628_v4 = vpop.f32.mrb[103].mxu0  ;;  %5714 = vmatpush3.bf16.msra.mxu0 %v5920_v11 }
 0x50f   :  { %5715 = vmatprep.subr.bf16.mxu0 %v5921_v23 }
 0x512   :  { %5716 = vmatpush3.bf16.msra.mxu0 %v5922_v35 }
 0x513   :  { %5717 = vmatprep.subr.bf16.mxu0 %v5923_v33 }
 0x516   :  { %5718 = vmatpush3.bf16.msra.mxu0 %v5924_v50 }
 0x517   :  { %5719 = vmatprep.subr.bf16.mxu0 %v5925_v37 }
 0x51a   :  { %5720 = vmatpush3.bf16.msra.mxu0 %v5926_v63 }
 0x5cb   :  { %v3868_v34 = vpop.f32.mrb[104].mxu0 }
 0x5cc   :  { %v3874_v7 = vadd.f32 %v3868_v34, %v3740_v30  ;;  %v3870_v48 = vpop.f32.mrb[105].mxu0  ;;  %v3902_v30 = vld [vmem:[%s8181_s8] sm:$0xf] }
 0x5cd   :  { %v3871_v21 = vpop.f32.mrb[106].mxu0  ;;  %v3907_v9 = vrot.slane %v3902_v30, %v3906_v6  ;;  %v3911_v4 = vrot.slane %v3902_v30, %v3910_v27  ;;  %v3915_v61 = vrot.slane %v3902_v30, %v3914_v42 }
 0x5ce   :  { %v3881_v62 = vadd.f32 %v4775_v60, %v3874_v7  ;;  %v3872_v17 = vpop.f32.mrb[107].mxu0  ;;  %v3919_v60 = vrot.slane %v3902_v30, %v3918_v22 }
 0x5d0   :  { %v3882_v26 = vmax.f32 %v3881_v62, 0.0 }
 0x5d2   :  { %3883 = vst.msk [vmem:[#allocation4] sm:$0x3] %vm384_vm0, %v3882_v26 }
 0x5d9   :  { %v3884_v18 = vld [vmem:[#allocation4] sm:$0x3] }
 0x5da   :  { %v3885_v43 = vpack.c.bf16 %v3884_v18, %v3884_v18 }
 0x5dc   :  { %4792 = vmatmul.mubr.msk.bf16.vlgmr.msra.gmra.mrb[80].mxu1 %vm3586_vm2, %v3885_v43 }
 0x5dd   :  { %4049 = vmatpush1.bf16.msra.mxu1 %v5883_v57  ;;  %4080 = vmatprep.mubr.bf16.mxu1 %v6033_v1  ;;  %v5892_v1 = vld [vmem:[%s8180_s7 + $0x68] ss:$16 sps:$4 sm:$0xff]  }
 0x5de   :  { %4050 = vmatprep.subr.bf16.mxu1 %v5888_v28 }
 0x5e1   :  { %4051 = vmatpush1.bf16.msra.mxu1 %v5886_v8 }
 0x5e2   :  { %4052 = vmatprep.subr.bf16.mxu1 %v5891_v16 }
 0x5e5   :  { %4053 = vmatpush1.bf16.msra.mxu1 %v5889_v44 }
 0x5e6   :  { %4054 = vmatprep.subr.bf16.mxu1 %v5894_v10 }
 0x5e9   :  { %4055 = vmatpush1.bf16.msra.mxu1 %v5892_v1  ;;  %v4794_v1 = vld [vmem:[%s8183_s10] ss:$0 sm:$0xff] }
 0x5ea   :  { %5683 = vmatprep.subr.bf16.mxu1 %v5895_v24 }
 0x5ec   :  { %4793 = vmatmul.mubr.msk.bf16.vlgmr.msra.gmra.mrb[84].mxu1 %vm3586_vm2, %v3885_v43 }
 0x5ed   :  { %5684 = vmatpush3.bf16.msra.mxu1 %v5896_v12 }
 0x5ee   :  { %5685 = vmatprep.subr.bf16.mxu1 %v5897_v46 }
 0x5f1   :  { %5686 = vmatpush3.bf16.msra.mxu1 %v5898_v55 }
 0x5f2   :  { %5687 = vmatprep.subr.bf16.mxu1 %v5899_v0 }
 0x5f5   :  { %5688 = vmatpush3.bf16.msra.mxu1 %v5900_v15 }
 0x5f6   :  { %5689 = vmatprep.subr.bf16.mxu1 %v5901_v20 }
 0x5f9   :  { %5690 = vmatpush3.bf16.msra.mxu1 %v5902_v49 }
 0x5fa   :  { %5691 = vmatprep.subr.bf16.mxu1 %v5904_v56 }
 0x5fd   :  { %5692 = vmatpush3.bf16.msra.mxu1 %v5906_v52 }
 0x5fe   :  { %5693 = vmatprep.subr.bf16.mxu1 %v5908_v2 }
 0x601   :  { %5694 = vmatpush3.bf16.msra.mxu1 %v5910_v51 }
 0x602   :  { %5695 = vmatprep.subr.bf16.mxu1 %v5912_v29 }
 0x605   :  { %5696 = vmatpush3.bf16.msra.mxu1 %v5914_v19 }
 0x606   :  { %5697 = vmatprep.subr.bf16.mxu1 %v5916_v5 }
 0x609   :  { %5698 = vmatpush3.bf16.msra.mxu1 %v5918_v54 }
 0x6af   :  { %v4041_v47 = vpop.f32.mrb[80].mxu1 }
 0x6b0   :  { %v4042_v41 = vadd.f32 %v4041_v47, %v3907_v9  ;;  %v4043_v14 = vpop.f32.mrb[81].mxu1 }
 0x6b1   :  { %v4044_v40 = vadd.f32 %v4043_v14, %v3911_v4  ;;  %v4045_v53 = vpop.f32.mrb[82].mxu1 }
 0x6b2   :  { %v4089_v58 = vmax.f32 %v4042_v41, 0.0  ;;  %v4046_v38 = vpop.f32.mrb[83].mxu1 }
 0x6b3   :  { %v4090_v25 = vmax.f32 %v4044_v40, 0.0 }
 0x6b4   :  { %v4093_v36 = vpack.c.bf16 %v4089_v58, %v4089_v58 }
 0x6b5   :  { %v4094_v13 = vpack.c.bf16 %v4090_v25, %v4090_v25 }
 0x6b7   :  { %4392 = vmatprep.mubr.bf16.mxu1 %v4094_v13 }
 0x6b8   :  { %4393 = vmatmul.mubr.bf16.vlgmr.msra.gmra.mrb[88].mxu1 %v4093_v36 }
 0x6bf   :  { %v4082_v34 = vpop.f32.mrb[84].mxu1 }
 0x6c0   :  { %v4083_v7 = vadd.f32 %v4082_v34, %v3915_v61  ;;  %v4084_v48 = vpop.f32.mrb[85].mxu1 }
 0x6c1   :  { %v4085_v21 = vadd.f32 %v4084_v48, %v3919_v60  ;;  %v4086_v62 = vpop.f32.mrb[86].mxu1 }
 0x6c2   :  { %v4091_v17 = vmax.f32 %v4083_v7, 0.0  ;;  %v4087_v26 = vpop.f32.mrb[87].mxu1 }
 0x6c3   :  { %v4092_v57 = vmax.f32 %v4085_v21, 0.0 }
 0x6c4   :  { %v4095_v43 = vpack.c.bf16 %v4091_v17, %v4091_v17 }
 0x6c5   :  { %v4096_v18 = vpack.c.bf16 %v4092_v57, %v4092_v57 }
 0x6c7   :  { %4432 = vmatprep.mubr.bf16.mxu0 %v4096_v18 }
 0x6c8   :  { %4433 = vmatmul.mubr.bf16.vlgmr.msra.gmra.mrb[108].mxu0 %v4095_v43 }
 0x78b   :  { %v5699_v28 = vpop.f32.mrb[88].mxu1 }
 0x78c   :  { %v5700_v8 = vpop.f32.mrb[89].mxu1 }
 0x78d   :  { %v5701_v16 = vadd.f32 %v5700_v8, %v5699_v28  ;;  %v5702_v44 = vpop.f32.mrb[90].mxu1 }
 0x78e   :  { %v5703_v10 = vpop.f32.mrb[91].mxu1 }
 0x78f   :  { %v4395_v46 = vadd.f32 %v5701_v16, %v4794_v1 }
 0x79b   :  { %v5721_v24 = vpop.f32.mrb[108].mxu0 }
 0x79c   :  { %v5722_v12 = vpop.f32.mrb[109].mxu0 }
 0x79d   :  { %v5723_v55 = vadd.f32 %v5722_v12, %v5721_v24  ;;  %v5724_v0 = vpop.f32.mrb[110].mxu0 }
 0x79e   :  { %v5725_v15 = vpop.f32.mrb[111].mxu0 }
 0x79f   :  { %v4435_v20 = vadd.f32 %v5723_v55, %v4395_v46 }
 0x7a1   :  { %4440 = vst [vmem:[#allocation5] sm:$0x3] %v4435_v20 }
 0x7a2   :  { %6018 = shalt.err (!%p6015_p4)
}
 0x7a3   :  { %s6019_s1 = scalar_lea.hbm %s8184_s11, 32 }
 0x7a4   :  { %p6020_p5 = scmp.ne.s32.totalorder %s8184_s11, %s6019_s1  ;;  %p6023_p6 = scmp.lt.u32.totalorder %s6019_s1, %s8184_s11 }
 0x7a6   :  { %p6025_p7 = pnand %p6023_p6, %p6020_p5 }
 0x7a8   :  { %6028 = shalt.err (!%p6025_p7)
}
 0x7a9   :  { %4450 = dma.vmem_to_hbm [thread:$0]  %s4448_s3, 32, %s8184_s11, [#allocation6]  }
 0x7aa   :  { %6029 = dma.done.wait [#allocation6], 32  }
 0x7ab   :  { %6030 = vsyncadd [#allocation6], 4294967264 }
 0x7ac   :  { %4454 = vsyncpa [#allocation6], 1 }

</bundles_post_ra>
